<compile_context>
chip_gen: v7x
topology: tpu7x:2x2x1
jax: 0.10.0
libtpu: 0.0.40
codegen_flags: <defaults>
</compile_context>

<pallas_src>
import functools

import jax
import jax.numpy as jnp
from jax.experimental import pallas as pl
from jax.experimental.pallas import tpu as pltpu


# ----------------------------------------------------------------------------
# Fused kernel: conv1 + ReLU + conv2 + bilinear x4 for one batch element.
# ----------------------------------------------------------------------------
def _estimator_kernel(x_ref, w1_ref, b1_ref, w2_ref, b2_ref, mask_ref, ukt_ref,
                      o_ref, *, H, W):
    HW = H * W
    masks = mask_ref[...]                         # (9, HW), loaded once

    def im2col(a):
        """(rows, HW) -> (9*rows, HW): 3x3 'SAME' patches of the flat image.

        Tap (dy, dx) at flat output position f = y*W + x needs the source at
        flat position f + (dy-1)*W + (dx-1).  pltpu.roll (XLU) brings that
        value to lane f; the per-tap mask zeroes lanes whose true source is
        outside the image (vertical out-of-bounds or horizontal row wrap).
        """
        taps = []
        for dy in range(3):
            for dx in range(3):
                off = (dy - 1) * W + (dx - 1)
                k = dy * 3 + dx
                t = a if off == 0 else pltpu.roll(a, shift=(HW - off) % HW, axis=1)
                if k != 4:                        # center tap needs no mask
                    t = t * masks[k:k + 1, :]
                taps.append(t)
        return jnp.concatenate(taps, axis=0)

    # ---- conv1 (Cin->64) + bias + ReLU: one im2col matmul, all in VMEM ----
    p1 = im2col(x_ref[0])                                              # (72, HW)
    h = jnp.dot(w1_ref[...], p1,
                preferred_element_type=jnp.float32) + b1_ref[...]      # (64, HW)
    h = jnp.maximum(h, 0.0)

    # ---- conv2 (64->3) + bias: intermediate never leaves VMEM ----
    p2 = im2col(h)                                                     # (576, HW)
    y = jnp.dot(w2_ref[...], p2,
                preferred_element_type=jnp.float32) + b2_ref[...]      # (3, HW)

    # ---- bilinear x4 (align_corners=True) as ONE lane-dense matmul; result
    # is already the flat (C_OUT, Ho*Wo) layout -> single unmasked wide store.
    o_ref[0] = jnp.dot(y, ukt_ref[...], preferred_element_type=jnp.float32)


# ----------------------------------------------------------------------------
# align_corners=True bilinear interpolation matrix (n_out x n_in).
# ----------------------------------------------------------------------------
def _interp_matrix(n_in, scale):
    n_out = n_in * scale
    if n_in == 1 or n_out == 1:
        # PyTorch align_corners=True degenerate case samples index 0.
        return jnp.zeros((n_out, n_in), jnp.float32).at[:, 0].set(1.0)
    src = jnp.arange(n_out, dtype=jnp.float32) * (n_in - 1) / (n_out - 1)
    i0 = jnp.clip(jnp.floor(src).astype(jnp.int32), 0, n_in - 1)
    i1 = jnp.clip(i0 + 1, 0, n_in - 1)
    frac = src - i0.astype(jnp.float32)
    cols = jnp.arange(n_in)[None, :]
    return ((cols == i0[:, None]).astype(jnp.float32) * (1.0 - frac)[:, None]
            + (cols == i1[:, None]).astype(jnp.float32) * frac[:, None])


# ----------------------------------------------------------------------------
# Forward wrapper: NCHW in -> NCHW out, single fused pallas_call.
# ----------------------------------------------------------------------------
def estimator_forward(x_nchw, params, *, up=4):
    """x_nchw: (N, 4, H, W) f32 -> (N, 3, up*H, up*W) f32."""
    N, C_IN, H, W = x_nchw.shape
    C_MID = params["b1"].shape[0]
    C_OUT = params["b2"].shape[0]
    HW = H * W
    Ho, Wo = up * H, up * W
    C_IN_P = max(8, ((C_IN + 7) // 8) * 8)        # pad K-rows to a sublane tile

    # Weights -> (Cout, 9*Cin_padded), matching tap-major / channel-minor rows.
    w1 = jnp.transpose(params["w1"], (3, 0, 1, 2))                     # (64,3,3,Cin)
    w1 = jnp.pad(w1, ((0, 0), (0, 0), (0, 0), (0, C_IN_P - C_IN)))
    w1m = w1.reshape(C_MID, 9 * C_IN_P)                                # (64, 72)
    w2m = jnp.transpose(params["w2"], (3, 0, 1, 2)).reshape(C_OUT, 9 * C_MID)
    b1 = params["b1"].reshape(C_MID, 1)
    b2 = params["b2"].reshape(C_OUT, 1)

    # Per-tap validity masks over flat output coords (kill wrap / OOB sources).
    yy = jnp.arange(HW, dtype=jnp.int32) // W
    xx = jnp.arange(HW, dtype=jnp.int32) % W
    rows = []
    for dy in range(3):
        for dx in range(3):
            ok_y = jnp.logical_and(yy + (dy - 1) >= 0, yy + (dy - 1) < H)
            ok_x = jnp.logical_and(xx + (dx - 1) >= 0, xx + (dx - 1) < W)
            rows.append(jnp.logical_and(ok_y, ok_x))
    masks = jnp.stack(rows, axis=0).astype(jnp.float32)                # (9, HW)

    # Bilinear x4 as one kron matrix (HW, Ho*Wo); exact same math as the
    # separable Uh @ Y @ Uw^T, but the result lands directly in flat layout.
    uh = _interp_matrix(H, up)                   # (Ho, H)
    uw = _interp_matrix(W, up)                   # (Wo, W)
    ukt = jnp.kron(uh, uw).T                     # (HW, Ho*Wo)

    # Free relabel of contiguous NCHW + zero-pad channels to a sublane tile.
    x_flat = x_nchw.reshape(N, C_IN, HW)
    x_flat = jnp.pad(x_flat, ((0, 0), (0, C_IN_P - C_IN), (0, 0)))     # (N, 8, HW)

    kernel = functools.partial(_estimator_kernel, H=H, W=W)
    out_flat = pl.pallas_call(
        kernel,
        out_shape=jax.ShapeDtypeStruct((N, C_OUT, Ho * Wo), jnp.float32),
        grid_spec=pltpu.PrefetchScalarGridSpec(
            num_scalar_prefetch=0,
            grid=(N,),
            in_specs=[
                pl.BlockSpec((1, C_IN_P, HW), lambda n: (n, 0, 0)),
                pl.BlockSpec((C_MID, 9 * C_IN_P), lambda n: (0, 0)),
                pl.BlockSpec((C_MID, 1), lambda n: (0, 0)),
                pl.BlockSpec((C_OUT, 9 * C_MID), lambda n: (0, 0)),
                pl.BlockSpec((C_OUT, 1), lambda n: (0, 0)),
                pl.BlockSpec((9, HW), lambda n: (0, 0)),
                pl.BlockSpec((HW, Ho * Wo), lambda n: (0, 0)),
            ],
            out_specs=pl.BlockSpec((1, C_OUT, Ho * Wo), lambda n: (n, 0, 0)),
        ),
        compiler_params=pltpu.CompilerParams(
            dimension_semantics=("parallel",),       # 2-way for v7x dual TCs
            vmem_limit_bytes=32 * 1024 * 1024,
        ),
    )(x_flat, w1m, b1, w2m, b2, masks, ukt)

    return out_flat.reshape(N, C_OUT, Ho, Wo)        # free relabel to NCHW


# ----------------------------------------------------------------------------
# Pure-JAX reference (same math, via XLA) for a numerical self-check.
# ----------------------------------------------------------------------------
def _reference_forward(x, params, *, up=4):
    dn = ("NCHW", "HWIO", "NCHW")
    y = jax.lax.conv_general_dilated(x, params["w1"], (1, 1), "SAME",
                                     dimension_numbers=dn)
    y = jnp.maximum(y + params["b1"][None, :, None, None], 0.0)
    y = jax.lax.conv_general_dilated(y, params["w2"], (1, 1), "SAME",
                                     dimension_numbers=dn)
    y = y + params["b2"][None, :, None, None]
    uh = _interp_matrix(y.shape[2], up)
    uw = _interp_matrix(y.shape[3], up)
    return jnp.einsum("oh,pw,nchw->ncop", uh, uw, y)


def init_params(key):
    k1, k2, k3, k4 = jax.random.split(key, 4)
    # Deterministic synthetic weights (Kaiming-ish scale), HWIO layout.
    w1 = jax.random.normal(k1, (3, 3, 4, 64), jnp.float32) * (1.0 / (3 * 3 * 4)) ** 0.5
    b1 = jax.random.normal(k2, (64,), jnp.float32) * 0.01
    w2 = jax.random.normal(k3, (3, 3, 64, 3), jnp.float32) * (1.0 / (3 * 3 * 64)) ** 0.5
    b2 = jax.random.normal(k4, (3,), jnp.float32) * 0.01
    return {"w1": w1, "b1": b1, "w2": w2, "b2": b2}


if __name__ == "__main__":
    key = jax.random.PRNGKey(0)
    pkey, xkey = jax.random.split(key)
    params = init_params(pkey)
    x = jax.random.normal(xkey, (2, 4, 16, 16), jnp.float32)      # NCHW input

    out = jax.block_until_ready(jax.jit(estimator_forward)(x, params))
    assert out.shape == (2, 3, 64, 64), out.shape
    assert out.dtype == jnp.float32

    ref = jax.block_until_ready(jax.jit(_reference_forward)(x, params))
    max_err = float(jnp.max(jnp.abs(out - ref)))
    assert max_err < 5e-2, max_err

    print("KERNEL_OK")
</pallas_src>

<mosaic_0001>
module attributes {stable_mosaic.version = 11 : i64} {
  func.func @_estimator_kernel(%arg0: i32, %arg1: memref<1x8x256xf32, #tpu.memory_space<vmem>>, %arg2: memref<64x72xf32, #tpu.memory_space<vmem>>, %arg3: memref<64x1xf32, #tpu.memory_space<vmem>>, %arg4: memref<3x576xf32, #tpu.memory_space<vmem>>, %arg5: memref<3x1xf32, #tpu.memory_space<vmem>>, %arg6: memref<9x256xf32, #tpu.memory_space<vmem>>, %arg7: memref<256x4096xf32, #tpu.memory_space<vmem>>, %arg8: memref<1x3x4096xf32, #tpu.memory_space<vmem>>) attributes {dimension_semantics = [#tpu.dimension_semantics<parallel>], iteration_bounds = array<i64: 2>, scalar_prefetch = 0 : i64, scratch_operands = 0 : i64, tpu.core_type = #tpu.core_type<tc>, window_params = [{transform_indices = @transform_0, window_bounds = array<i64: 1, 8, 256>}, {pipeline_mode = #tpu.pipeline_mode<synchronous>, transform_indices = @transform_1, window_bounds = array<i64: 64, 72>}, {pipeline_mode = #tpu.pipeline_mode<synchronous>, transform_indices = @transform_2, window_bounds = array<i64: 64, 1>}, {pipeline_mode = #tpu.pipeline_mode<synchronous>, transform_indices = @transform_3, window_bounds = array<i64: 3, 576>}, {pipeline_mode = #tpu.pipeline_mode<synchronous>, transform_indices = @transform_4, window_bounds = array<i64: 3, 1>}, {pipeline_mode = #tpu.pipeline_mode<synchronous>, transform_indices = @transform_5, window_bounds = array<i64: 9, 256>}, {pipeline_mode = #tpu.pipeline_mode<synchronous>, transform_indices = @transform_6, window_bounds = array<i64: 256, 4096>}, {transform_indices = @transform_7, window_bounds = array<i64: 1, 3, 4096>}]} {
    %c0 = arith.constant 0 : index
    %c0_0 = arith.constant 0 : index
    %0 = vector.load %arg6[%c0, %c0_0] : memref<9x256xf32, #tpu.memory_space<vmem>>, vector<9x256xf32>
    %c0_1 = arith.constant 0 : index
    %c0_2 = arith.constant 0 : index
    %c0_3 = arith.constant 0 : index
    %1 = vector.load %arg1[%c0_1, %c0_2, %c0_3] : memref<1x8x256xf32, #tpu.memory_space<vmem>>, vector<1x8x256xf32>
    %2 = vector.shape_cast %1 : vector<1x8x256xf32> to vector<8x256xf32>
    %c17_i32 = arith.constant 17 : i32
    %3 = tpu.dynamic_rotate %2 by %c17_i32 dim 1 : vector<8x256xf32>, i32 -> vector<8x256xf32>
    %4 = vector.extract_strided_slice %0 {offsets = [0, 0], sizes = [1, 256], strides = [1, 1]} : vector<9x256xf32> to vector<1x256xf32>
    %5 = vector.broadcast %4 : vector<1x256xf32> to vector<8x256xf32>
    %6 = arith.mulf %3, %5 : vector<8x256xf32>
    %c16_i32 = arith.constant 16 : i32
    %7 = tpu.dynamic_rotate %2 by %c16_i32 dim 1 : vector<8x256xf32>, i32 -> vector<8x256xf32>
    %8 = vector.extract_strided_slice %0 {offsets = [1, 0], sizes = [1, 256], strides = [1, 1]} : vector<9x256xf32> to vector<1x256xf32>
    %9 = vector.broadcast %8 : vector<1x256xf32> to vector<8x256xf32>
    %10 = arith.mulf %7, %9 : vector<8x256xf32>
    %c15_i32 = arith.constant 15 : i32
    %11 = tpu.dynamic_rotate %2 by %c15_i32 dim 1 : vector<8x256xf32>, i32 -> vector<8x256xf32>
    %12 = vector.extract_strided_slice %0 {offsets = [2, 0], sizes = [1, 256], strides = [1, 1]} : vector<9x256xf32> to vector<1x256xf32>
    %13 = vector.broadcast %12 : vector<1x256xf32> to vector<8x256xf32>
    %14 = arith.mulf %11, %13 : vector<8x256xf32>
    %c1_i32 = arith.constant 1 : i32
    %15 = tpu.dynamic_rotate %2 by %c1_i32 dim 1 : vector<8x256xf32>, i32 -> vector<8x256xf32>
    %16 = vector.extract_strided_slice %0 {offsets = [3, 0], sizes = [1, 256], strides = [1, 1]} : vector<9x256xf32> to vector<1x256xf32>
    %17 = vector.broadcast %16 : vector<1x256xf32> to vector<8x256xf32>
    %18 = arith.mulf %15, %17 : vector<8x256xf32>
    %c255_i32 = arith.constant 255 : i32
    %19 = tpu.dynamic_rotate %2 by %c255_i32 dim 1 : vector<8x256xf32>, i32 -> vector<8x256xf32>
    %20 = vector.extract_strided_slice %0 {offsets = [5, 0], sizes = [1, 256], strides = [1, 1]} : vector<9x256xf32> to vector<1x256xf32>
    %21 = vector.broadcast %20 : vector<1x256xf32> to vector<8x256xf32>
    %22 = arith.mulf %19, %21 : vector<8x256xf32>
    %c241_i32 = arith.constant 241 : i32
    %23 = tpu.dynamic_rotate %2 by %c241_i32 dim 1 : vector<8x256xf32>, i32 -> vector<8x256xf32>
    %24 = vector.extract_strided_slice %0 {offsets = [6, 0], sizes = [1, 256], strides = [1, 1]} : vector<9x256xf32> to vector<1x256xf32>
    %25 = vector.broadcast %24 : vector<1x256xf32> to vector<8x256xf32>
    %26 = arith.mulf %23, %25 : vector<8x256xf32>
    %c240_i32 = arith.constant 240 : i32
    %27 = tpu.dynamic_rotate %2 by %c240_i32 dim 1 : vector<8x256xf32>, i32 -> vector<8x256xf32>
    %28 = vector.extract_strided_slice %0 {offsets = [7, 0], sizes = [1, 256], strides = [1, 1]} : vector<9x256xf32> to vector<1x256xf32>
    %29 = vector.broadcast %28 : vector<1x256xf32> to vector<8x256xf32>
    %30 = arith.mulf %27, %29 : vector<8x256xf32>
    %c239_i32 = arith.constant 239 : i32
    %31 = tpu.dynamic_rotate %2 by %c239_i32 dim 1 : vector<8x256xf32>, i32 -> vector<8x256xf32>
    %32 = vector.extract_strided_slice %0 {offsets = [8, 0], sizes = [1, 256], strides = [1, 1]} : vector<9x256xf32> to vector<1x256xf32>
    %33 = vector.broadcast %32 : vector<1x256xf32> to vector<8x256xf32>
    %34 = arith.mulf %31, %33 : vector<8x256xf32>
    %35 = tpu.concatenate %6, %10, %14, %18, %2, %22, %26, %30, %34 in 0 : vector<8x256xf32>, vector<8x256xf32>, vector<8x256xf32>, vector<8x256xf32>, vector<8x256xf32>, vector<8x256xf32>, vector<8x256xf32>, vector<8x256xf32>, vector<8x256xf32> -> vector<72x256xf32>
    %c0_4 = arith.constant 0 : index
    %c0_5 = arith.constant 0 : index
    %36 = vector.load %arg2[%c0_4, %c0_5] : memref<64x72xf32, #tpu.memory_space<vmem>>, vector<64x72xf32>
    %cst = arith.constant dense<0.000000e+00> : vector<64x256xf32>
    %37 = tpu.matmul %36, %35, %cst {dimension_numbers = #tpu.dot_dimension_numbers<[1], [0], [0], [1], [0, 0, 1, 1], [], []>} : vector<64x72xf32>, vector<72x256xf32>, vector<64x256xf32> -> vector<64x256xf32>
    %c0_6 = arith.constant 0 : index
    %c0_7 = arith.constant 0 : index
    %38 = vector.load %arg3[%c0_6, %c0_7] : memref<64x1xf32, #tpu.memory_space<vmem>>, vector<64x1xf32>
    %39 = vector.broadcast %38 : vector<64x1xf32> to vector<64x256xf32>
    %40 = arith.addf %37, %39 : vector<64x256xf32>
    %cst_8 = arith.constant 0.000000e+00 : f32
    %41 = vector.broadcast %cst_8 : f32 to vector<64x256xf32>
    %42 = arith.maximumf %40, %41 : vector<64x256xf32>
    %c17_i32_9 = arith.constant 17 : i32
    %43 = tpu.dynamic_rotate %42 by %c17_i32_9 dim 1 : vector<64x256xf32>, i32 -> vector<64x256xf32>
    %44 = vector.extract_strided_slice %0 {offsets = [0, 0], sizes = [1, 256], strides = [1, 1]} : vector<9x256xf32> to vector<1x256xf32>
    %45 = vector.broadcast %44 : vector<1x256xf32> to vector<64x256xf32>
    %46 = arith.mulf %43, %45 : vector<64x256xf32>
    %c16_i32_10 = arith.constant 16 : i32
    %47 = tpu.dynamic_rotate %42 by %c16_i32_10 dim 1 : vector<64x256xf32>, i32 -> vector<64x256xf32>
    %48 = vector.extract_strided_slice %0 {offsets = [1, 0], sizes = [1, 256], strides = [1, 1]} : vector<9x256xf32> to vector<1x256xf32>
    %49 = vector.broadcast %48 : vector<1x256xf32> to vector<64x256xf32>
    %50 = arith.mulf %47, %49 : vector<64x256xf32>
    %c15_i32_11 = arith.constant 15 : i32
    %51 = tpu.dynamic_rotate %42 by %c15_i32_11 dim 1 : vector<64x256xf32>, i32 -> vector<64x256xf32>
    %52 = vector.extract_strided_slice %0 {offsets = [2, 0], sizes = [1, 256], strides = [1, 1]} : vector<9x256xf32> to vector<1x256xf32>
    %53 = vector.broadcast %52 : vector<1x256xf32> to vector<64x256xf32>
    %54 = arith.mulf %51, %53 : vector<64x256xf32>
    %c1_i32_12 = arith.constant 1 : i32
    %55 = tpu.dynamic_rotate %42 by %c1_i32_12 dim 1 : vector<64x256xf32>, i32 -> vector<64x256xf32>
    %56 = vector.extract_strided_slice %0 {offsets = [3, 0], sizes = [1, 256], strides = [1, 1]} : vector<9x256xf32> to vector<1x256xf32>
    %57 = vector.broadcast %56 : vector<1x256xf32> to vector<64x256xf32>
    %58 = arith.mulf %55, %57 : vector<64x256xf32>
    %c255_i32_13 = arith.constant 255 : i32
    %59 = tpu.dynamic_rotate %42 by %c255_i32_13 dim 1 : vector<64x256xf32>, i32 -> vector<64x256xf32>
    %60 = vector.extract_strided_slice %0 {offsets = [5, 0], sizes = [1, 256], strides = [1, 1]} : vector<9x256xf32> to vector<1x256xf32>
    %61 = vector.broadcast %60 : vector<1x256xf32> to vector<64x256xf32>
    %62 = arith.mulf %59, %61 : vector<64x256xf32>
    %c241_i32_14 = arith.constant 241 : i32
    %63 = tpu.dynamic_rotate %42 by %c241_i32_14 dim 1 : vector<64x256xf32>, i32 -> vector<64x256xf32>
    %64 = vector.extract_strided_slice %0 {offsets = [6, 0], sizes = [1, 256], strides = [1, 1]} : vector<9x256xf32> to vector<1x256xf32>
    %65 = vector.broadcast %64 : vector<1x256xf32> to vector<64x256xf32>
    %66 = arith.mulf %63, %65 : vector<64x256xf32>
    %c240_i32_15 = arith.constant 240 : i32
    %67 = tpu.dynamic_rotate %42 by %c240_i32_15 dim 1 : vector<64x256xf32>, i32 -> vector<64x256xf32>
    %68 = vector.extract_strided_slice %0 {offsets = [7, 0], sizes = [1, 256], strides = [1, 1]} : vector<9x256xf32> to vector<1x256xf32>
    %69 = vector.broadcast %68 : vector<1x256xf32> to vector<64x256xf32>
    %70 = arith.mulf %67, %69 : vector<64x256xf32>
    %c239_i32_16 = arith.constant 239 : i32
    %71 = tpu.dynamic_rotate %42 by %c239_i32_16 dim 1 : vector<64x256xf32>, i32 -> vector<64x256xf32>
    %72 = vector.extract_strided_slice %0 {offsets = [8, 0], sizes = [1, 256], strides = [1, 1]} : vector<9x256xf32> to vector<1x256xf32>
    %73 = vector.broadcast %72 : vector<1x256xf32> to vector<64x256xf32>
    %74 = arith.mulf %71, %73 : vector<64x256xf32>
    %75 = tpu.concatenate %46, %50, %54, %58, %42, %62, %66, %70, %74 in 0 : vector<64x256xf32>, vector<64x256xf32>, vector<64x256xf32>, vector<64x256xf32>, vector<64x256xf32>, vector<64x256xf32>, vector<64x256xf32>, vector<64x256xf32>, vector<64x256xf32> -> vector<576x256xf32>
    %c0_17 = arith.constant 0 : index
    %c0_18 = arith.constant 0 : index
    %76 = vector.load %arg4[%c0_17, %c0_18] : memref<3x576xf32, #tpu.memory_space<vmem>>, vector<3x576xf32>
    %cst_19 = arith.constant dense<0.000000e+00> : vector<3x256xf32>
    %77 = tpu.matmul %76, %75, %cst_19 {dimension_numbers = #tpu.dot_dimension_numbers<[1], [0], [0], [1], [0, 0, 1, 1], [], []>} : vector<3x576xf32>, vector<576x256xf32>, vector<3x256xf32> -> vector<3x256xf32>
    %c0_20 = arith.constant 0 : index
    %c0_21 = arith.constant 0 : index
    %78 = vector.load %arg5[%c0_20, %c0_21] : memref<3x1xf32, #tpu.memory_space<vmem>>, vector<3x1xf32>
    %79 = vector.broadcast %78 : vector<3x1xf32> to vector<3x256xf32>
    %80 = arith.addf %77, %79 : vector<3x256xf32>
    %c0_22 = arith.constant 0 : index
    %c0_23 = arith.constant 0 : index
    %81 = vector.load %arg7[%c0_22, %c0_23] : memref<256x4096xf32, #tpu.memory_space<vmem>>, vector<256x4096xf32>
    %cst_24 = arith.constant dense<0.000000e+00> : vector<3x4096xf32>
    %82 = tpu.matmul %80, %81, %cst_24 {dimension_numbers = #tpu.dot_dimension_numbers<[1], [0], [0], [1], [0, 0, 1, 1], [], []>} : vector<3x256xf32>, vector<256x4096xf32>, vector<3x4096xf32> -> vector<3x4096xf32>
    %c0_25 = arith.constant 0 : index
    %c0_26 = arith.constant 0 : index
    %c0_27 = arith.constant 0 : index
    %83 = vector.load %arg8[%c0_25, %c0_26, %c0_27] : memref<1x3x4096xf32, #tpu.memory_space<vmem>>, vector<1x3x4096xf32>
    %84 = vector.shape_cast %83 : vector<1x3x4096xf32> to vector<3x4096xf32>
    %85 = vector.shape_cast %82 : vector<3x4096xf32> to vector<1x3x4096xf32>
    tpu.vector_store %arg8[%c0_25, %c0_26, %c0_27], %85 {strides = array<i32>} : memref<1x3x4096xf32, #tpu.memory_space<vmem>>, vector<1x3x4096xf32>,
    return
  }
  func.func @transform_0(%arg0: i32) -> (i32, i32, i32) {
    %c0_i32 = arith.constant 0 : i32
    %c0_i32_0 = arith.constant 0 : i32
    %c0_i32_1 = arith.constant 0 : i32
    return %arg0, %c0_i32, %c0_i32_0 : i32, i32, i32
  }
  func.func @transform_1(%arg0: i32) -> (i32, i32) {
    %c0_i32 = arith.constant 0 : i32
    %c0_i32_0 = arith.constant 0 : i32
    %c0_i32_1 = arith.constant 0 : i32
    return %c0_i32, %c0_i32_0 : i32, i32
  }
  func.func @transform_2(%arg0: i32) -> (i32, i32) {
    %c0_i32 = arith.constant 0 : i32
    %c0_i32_0 = arith.constant 0 : i32
    %c0_i32_1 = arith.constant 0 : i32
    return %c0_i32, %c0_i32_0 : i32, i32
  }
  func.func @transform_3(%arg0: i32) -> (i32, i32) {
    %c0_i32 = arith.constant 0 : i32
    %c0_i32_0 = arith.constant 0 : i32
    %c0_i32_1 = arith.constant 0 : i32
    return %c0_i32, %c0_i32_0 : i32, i32
  }
  func.func @transform_4(%arg0: i32) -> (i32, i32) {
    %c0_i32 = arith.constant 0 : i32
    %c0_i32_0 = arith.constant 0 : i32
    %c0_i32_1 = arith.constant 0 : i32
    return %c0_i32, %c0_i32_0 : i32, i32
  }
  func.func @transform_5(%arg0: i32) -> (i32, i32) {
    %c0_i32 = arith.constant 0 : i32
    %c0_i32_0 = arith.constant 0 : i32
    %c0_i32_1 = arith.constant 0 : i32
    return %c0_i32, %c0_i32_0 : i32, i32
  }
  func.func @transform_6(%arg0: i32) -> (i32, i32) {
    %c0_i32 = arith.constant 0 : i32
    %c0_i32_0 = arith.constant 0 : i32
    %c0_i32_1 = arith.constant 0 : i32
    return %c0_i32, %c0_i32_0 : i32, i32
  }
  func.func @transform_7(%arg0: i32) -> (i32, i32, i32) {
    %c0_i32 = arith.constant 0 : i32
    %c0_i32_0 = arith.constant 0 : i32
    %c0_i32_1 = arith.constant 0 : i32
    return %arg0, %c0_i32, %c0_i32_0 : i32, i32, i32
  }
}

</mosaic_0001>

<bundles_post_ra>
// kernel: estimator_forward.1
= control target key start
LH: loop header
LB: loop body
LE: loop exit
PB: predicated region body
PF: predicated region fallthrough
CT: control target
= control target key end

     0   :  { %s4968_s24 = smov 0   ;;  %s9452_s0 = inlined_call_operand.vmem [shape: f32[2,8,256], index: 0, kind: input, shape index: {}]   ;;  %s9453_s1 = inlined_call_operand.vmem [shape: f32[64,72], index: 1, kind: input, shape index: {}]   ;;  %s9454_s2 = inlined_call_operand.vmem [shape: f32[64,1], index: 2, kind: input, shape index: {}]   ;;  %s9455_s3 = inlined_call_operand.vmem [shape: f32[3,576], index: 3, kind: input, shape index: {}]   ;;  %s9456_s4 = inlined_call_operand.vmem [shape: f32[3,1], index: 4, kind: input, shape index: {}]   ;;  %s9457_s5 = inlined_call_operand.vmem [shape: f32[9,256], index: 5, kind: input, shape index: {}]   ;;  %s9458_s6 = inlined_call_operand.vmem [shape: f32[256,4096], index: 6, kind: input, shape index: {}]   ;;  %s9459_s7 = inlined_call_operand.vmem [shape: f32[2,3,4096], index: 7, kind: output, shape index: {}]  }
   0x1 LB: > { %s3672_s25 = sadd.s32 4294967295, %s4916_s24   ;;  %p3676_p0 = scmp.ge.s32.totalorder %s4916_s24, 1  ;;  %s4916_s24 = sphi %s4968_s24, %s17_s24  }
   0x2   : > { %p237_p1 = scmp.lt.s32.totalorder %s4916_s24, 3 }
   0x4   : > { %p238_p2 = pnand %p3676_p0, %p237_p1 }
   0x6   : > { %241 = sbr.rel (%p238_p2) target bundleno = 1710 (0x6ae), region = 48 }
   0xd   : > { %p269_p3 = scmp.lt.s32.totalorder %s3672_s25, 1  ;;  %s4918_s30 = smov 16   ;;  %v9460_v2 = vmov 0.0   ;;  %v432_v3 = vld [vmem:[%s9454_s2 + $0x8] sm:$0xff]  ;;  %v431_v4 = vld [vmem:[%s9454_s2] sm:$0xff]  ;;  %v4927_v5 = vmov 0   ;;  %v289_v12 = vlaneseq }
   0xe   : > { %s4919_s8 = smov 17   ;;  %s4920_s9 = smov 15   ;;  %568 = vmatprep.mubr.f32.mxu0 %v9460_v2  ;;  %4905 = vset.pattern.permute.xlu1 %v4927_v5  ;;  %v433_v6 = vld [vmem:[%s9454_s2 + $0x10] sm:$0xff]  ;;  %v434_v7 = vld [vmem:[%s9454_s2 + $0x18] sm:$0xff]  ;;  %v435_v8 = vld [vmem:[%s9454_s2 + $0x20] sm:$0xff]  ;;  %vm479_vm8 = vcmask 588800  }
   0xf   : > { %s9570_s25 = smov (!%p269_p3, %s3672_s25), 1  ;;  %s4921_s10 = smov 1   ;;  %4904 = vset.pattern.permute.xlu0 %v4927_v5  ;;  %v436_v9 = vld [vmem:[%s9454_s2 + $0x28] sm:$0xff]  ;;  %v437_v10 = vld [vmem:[%s9454_s2 + $0x30] sm:$0xff]  ;;  %v438_v11 = vld [vmem:[%s9454_s2 + $0x38] sm:$0xff]  ;;  %v5043_v13 = vshrl.u32 %v289_v12, 7 }
  0x10   : > { %s3694_s26 = sshll.u32 %s9570_s25, 4  ;;  %s4922_s11 = smov 127   ;;  %v5045_v14 = vand.u32 127, %v289_v12  ;;  %v5052_v17 = vld [vmem:[%s9457_s5] sm:$0xff]  ;;  %v5057_v18 = vld [vmem:[%s9457_s5 + $0x8] sm:$0xff]  ;;  %vm1161_vm9 = vcmask 523264  }
  0x11   : > { %s273_s29 = scalar_lea.vmem %s9452_s0, %s3694_s26  ;;  %s4923_s12 = smov 113   ;;  %v296_v15 = vsub.s32 0, %v5043_v13  ;;  %v313_v16 = vsub.s32 1, %v5043_v13  ;;  %v330_v27 = vsub.s32 2, %v5043_v13  ;;  %v347_v28 = vsub.s32 3, %v5043_v13 }
  0x12   : > { %v4982_v0 = vld [vmem:[%s273_s29] sm:$0xff]  ;;  %v4988_v1 = vld [vmem:[%s273_s29 + $0x8] sm:$0xff]  ;;  %s4925_s13 = smov 112   ;;  %s4926_s14 = smov 111   ;;  %vm308_vm0 = vcmp.lt.s32.totalorder %v5045_v14, 16  ;;  %vm291_vm1 = vcmp.lt.s32.totalorder %v5045_v14, 17 }
  0x13   : > { %304 = vrot.lane.b32.xlu1 %v4982_v0, %s4918_s30  ;;  %285 = vrot.lane.b32.xlu0 %v4982_v0, %s4919_s8  ;;  %v5062_v21 = vrot.slane %v5057_v18, %v296_v15  ;;  %v5065_v22 = vrot.slane %v5057_v18, %v313_v16  ;;  %v5068_v23 = vrot.slane %v5052_v17, %v296_v15  ;;  %vm325_vm2 = vcmp.lt.s32.totalorder %v5045_v14, 15 }
  0x14   : > { %v5071_v24 = vrot.slane %v5052_v17, %v313_v16  ;;  %vm342_vm3 = vcmp.lt.s32.totalorder %v5045_v14, 1  ;;  %v364_v41 = vsub.s32 5, %v5043_v13  ;;  %v5091_v42 = vrot.slane %v5052_v17, %v330_v27 }
  0x15   : > { %v5094_v43 = vrot.slane %v5057_v18, %v330_v27  ;;  %v5097_v44 = vrot.slane %v5052_v17, %v347_v28  ;;  %v5100_v45 = vrot.slane %v5057_v18, %v347_v28  ;;  %vm359_vm4 = vcmp.lt.s32.totalorder %v5045_v14, 127  ;;  %v3682_v28 = vld [vmem:[%s9457_s5 + $0x18] ss:$0 sm:$0xff] }
  0x16   : > { %v5112_v52 = vrot.slane %v5052_v17, %v364_v41  ;;  %v5115_v53 = vrot.slane %v5057_v18, %v364_v41  ;;  %vm376_vm5 = vcmp.lt.s32.totalorder %v5045_v14, 113  ;;  %vm393_vm6 = vcmp.lt.s32.totalorder %v5045_v14, 112  ;;  %v426_v41 = vld [vmem:[%s9453_s1 + $0x18] sm:$0xff] }
  0x17   : > { %306 = vrot.lane.b32.xlu1 %v4988_v1, %s4918_s30  ;;  %287 = vrot.lane.b32.xlu0 %v4988_v1, %s4919_s8  ;;  %vm410_vm7 = vcmp.lt.s32.totalorder %v5045_v14, 111  ;;  %v1381_v14 = vld [vmem:[%s9458_s6 + $0x20] sm:$0xff] }
  0x1b   : > { %323 = vrot.lane.b32.xlu1 %v4988_v1, %s4920_s9  ;;  %321 = vrot.lane.b32.xlu0 %v4982_v0, %s4920_s9 }
  0x1f   : > { %340 = vrot.lane.b32.xlu1 %v4988_v1, %s4921_s10  ;;  %338 = vrot.lane.b32.xlu0 %v4982_v0, %s4921_s10 }
  0x23   : > { %357 = vrot.lane.b32.xlu1 %v4988_v1, %s4922_s11  ;;  %355 = vrot.lane.b32.xlu0 %v4982_v0, %s4922_s11 }
  0x27   : > { %374 = vrot.lane.b32.xlu1 %v4988_v1, %s4923_s12  ;;  %372 = vrot.lane.b32.xlu0 %v4982_v0, %s4923_s12 }
  0x2b   : > { %391 = vrot.lane.b32.xlu1 %v4988_v1, %s4925_s13  ;;  %389 = vrot.lane.b32.xlu0 %v4982_v0, %s4925_s13 }
  0x2f   : > { %408 = vrot.lane.b32.xlu1 %v4988_v1, %s4926_s14  ;;  %406 = vrot.lane.b32.xlu0 %v4982_v0, %s4926_s14 }
  0x33   : > { %446 = vperm.xlu1 %4905, %v432_v3   ;;  %441 = vperm.xlu0 %4904, %v431_v4   ;;  %v381_v3 = vsub.s32 6, %v5043_v13 }
  0x35   : > { %v5136_v12 = vrot.slane %v5057_v18, %v381_v3 }
  0x37   : > { %451 = vperm.xlu1 %4905, %v433_v6   ;;  %456 = vperm.xlu0 %4904, %v434_v7   ;;  %v398_v6 = vsub.s32 7, %v5043_v13  ;;  %9497 = vst [vmem:[#allocation3_spill] sm:$0xff] %v5136_v12 }
  0x39   : > { %v5140_v13 = vrot.slane %v5052_v17, %v398_v6  ;;  %v5143_v15 = vrot.slane %v5057_v18, %v398_v6 }
  0x3b   : > { %461 = vperm.xlu1 %4905, %v435_v8   ;;  %466 = vperm.xlu0 %4904, %v436_v9   ;;  %9498 = vst [vmem:[#allocation4_spill] sm:$0xff] %v5140_v13  ;;  %9499 = vst [vmem:[#allocation5_spill] sm:$0xff] %v5143_v15 }
  0x3f   : > { %471 = vperm.xlu1 %4905, %v437_v10   ;;  %476 = vperm.xlu0 %4904, %v438_v11   ;;  %v5133_v11 = vrot.slane %v5052_v17, %v381_v3 }
  0x41   : > { %9496 = vst [vmem:[#allocation2_spill] sm:$0xff] %v5133_v11 }
  0x85   : > { %v305_v19 = vpop.permute.xlu1 %304  ;;  %v286_v20 = vpop.permute.xlu0 %285 }
  0x89   : > { %v307_v25 = vpop.permute.xlu1 %306  ;;  %v288_v26 = vpop.permute.xlu0 %287 }
  0x8a   : > { %v310_v29 = vsel %vm308_vm0, %v307_v25, %v305_v19  ;;  %v293_v30 = vsel %vm291_vm1, %v288_v26, %v286_v20  ;;  %v292_v31 = vsel %vm291_vm1, %v286_v20, %v288_v26  ;;  %v309_v32 = vsel %vm308_vm0, %v305_v19, %v307_v25 }
  0x8b   : > { %v303_v33 = vmul.f32 %v5062_v21, %v292_v31  ;;  %v320_v34 = vmul.f32 %v5065_v22, %v309_v32  ;;  %v302_v35 = vmul.f32 %v5068_v23, %v293_v30  ;;  %v319_v36 = vmul.f32 %v5071_v24, %v310_v29 }
  0x8d   : > { %v324_v37 = vpop.permute.xlu1 %323  ;;  %v322_v38 = vpop.permute.xlu0 %321  ;;  %v3696_v39 = vpack.c.bf16 %v320_v34, %v303_v33  ;;  %v3698_v40 = vpack.c.bf16 %v319_v36, %v302_v35  ;;  %v3681_v33 = vld [vmem:[%s9457_s5 + $0x10] ss:$0 sm:$0xff] }
  0x8e   : > { %v326_v46 = vsel %vm325_vm2, %v322_v38, %v324_v37  ;;  %v327_v47 = vsel %vm325_vm2, %v324_v37, %v322_v38  ;;  %v423_v38 = vld [vmem:[%s9453_s1] sm:$0xff] }
  0x8f   : > { %3697 = vmatprep.subr.bf16.mxu0 %v3696_v39  ;;  %v336_v54 = vmul.f32 %v5091_v42, %v327_v47  ;;  %v337_v55 = vmul.f32 %v5094_v43, %v326_v46  ;;  %v424_v39 = vld [vmem:[%s9453_s1 + $0x8] sm:$0xff]  ;;  %v427_v46 = vld [vmem:[%s9453_s1 + $0x20] sm:$0xff] }
  0x90   : > { %3699 = vmatpush1.bf16.msra.mxu0 %v3698_v40  ;;  %v425_v40 = vld [vmem:[%s9453_s1 + $0x10] sm:$0xff]  ;;  %v428_v47 = vld [vmem:[%s9453_s1 + $0x28] sm:$0xff] }
  0x91   : > { %v341_v48 = vpop.permute.xlu1 %340  ;;  %v339_v49 = vpop.permute.xlu0 %338 }
  0x92   : > { %v343_v50 = vsel %vm342_vm3, %v339_v49, %v341_v48  ;;  %v344_v51 = vsel %vm342_vm3, %v341_v48, %v339_v49  ;;  %v429_v48 = vld [vmem:[%s9453_s1 + $0x30] sm:$0xff]  ;;  %v430_v49 = vld [vmem:[%s9453_s1 + $0x38] sm:$0xff] }
  0x93   : > { %v353_v56 = vmul.f32 %v5097_v44, %v344_v51  ;;  %v354_v57 = vmul.f32 %v5100_v45, %v343_v50 }
  0x95   : > { %v358_v58 = vpop.permute.xlu1 %357  ;;  %v356_v59 = vpop.permute.xlu0 %355  ;;  %v3700_v60 = vpack.c.bf16 %v354_v57, %v337_v55  ;;  %v3702_v61 = vpack.c.bf16 %v353_v56, %v336_v54 }
  0x96   : > { %v360_v62 = vsel %vm359_vm4, %v356_v59, %v358_v58  ;;  %v361_v63 = vsel %vm359_vm4, %v358_v58, %v356_v59 }
  0x97   : > { %v370_v4 = vmul.f32 %v5112_v52, %v360_v62  ;;  %v371_v5 = vmul.f32 %v5115_v53, %v361_v63  ;;  %3701 = vmatprep.subr.bf16.mxu0 %v3700_v60 }
  0x98   : > { %3703 = vmatpush1.bf16.msra.mxu0 %v3702_v61 }
  0x99   : > { %v375_v7 = vpop.permute.xlu1 %374  ;;  %v373_v8 = vpop.permute.xlu0 %372  ;;  %v3704_v9 = vpack.c.bf16 %v371_v5, %v4988_v1  ;;  %v3706_v10 = vpack.c.bf16 %v370_v4, %v4982_v0 }
  0x9a   : > { %v377_v1 = vsel %vm376_vm5, %v373_v8, %v375_v7  ;;  %v378_v0 = vsel %vm376_vm5, %v375_v7, %v373_v8 }
  0x9b   : > { %3705 = vmatprep.subr.bf16.mxu0 %v3704_v9  ;;  %v387_v17 = vmul.f32 %v5133_v11, %v377_v1  ;;  %v388_v18 = vmul.f32 %v5136_v12, %v378_v0 }
  0x9c   : > { %3707 = vmatpush1.bf16.msra.mxu0 %v3706_v10 }
  0x9d   : > { %v392_v16 = vpop.permute.xlu1 %391  ;;  %v390_v19 = vpop.permute.xlu0 %389 }
  0x9e   : > { %v394_v20 = vsel %vm393_vm6, %v390_v19, %v392_v16  ;;  %v395_v25 = vsel %vm393_vm6, %v392_v16, %v390_v19 }
  0x9f   : > { %v404_v26 = vmul.f32 %v5140_v13, %v394_v20  ;;  %v405_v27 = vmul.f32 %v5143_v15, %v395_v25 }
  0xa1   : > { %v409_v29 = vpop.permute.xlu1 %408  ;;  %v3708_v30 = vpack.c.bf16 %v405_v27, %v388_v18  ;;  %v407_v31 = vpop.permute.xlu0 %406  ;;  %v3710_v32 = vpack.c.bf16 %v404_v26, %v387_v17 }
  0xa2   : > { %v411_v34 = vsel %vm410_vm7, %v407_v31, %v409_v29  ;;  %v412_v35 = vsel %vm410_vm7, %v409_v29, %v407_v31 }
  0xa3   : > { %3709 = vmatprep.subr.bf16.mxu0 %v3708_v30  ;;  %v422_v36 = vmul.f32 %v3682_v28, %v412_v35  ;;  %v421_v37 = vmul.f32 %v3681_v33, %v411_v34 }
  0xa4   : > { %3711 = vmatpush1.bf16.msra.mxu0 %v3710_v32 }
  0xa5   : > { %520 = vmatprep.subr.mxu0 %v422_v36 }
  0xa8   : > { %521 = vmatpush1.msra.mxu0 %v421_v37 }
  0xa9   : > { %3683 = vmatmul.mubr.msk.f32.vlgmr.msra.gmra.mrb[0].mxu0 %vm479_vm8, %v423_v38 }
  0xaa   : > { %574 = vmatprep.mubr.f32.mxu0 %v9460_v2 }
  0xad   : > { %3684 = vmatmul.mubr.msk.f32.gmra.mrb[2].mxu0 %vm479_vm8, %v424_v39 }
  0xae   : > { %580 = vmatprep.mubr.f32.mxu0 %v9460_v2 }
  0xb1   : > { %3685 = vmatmul.mubr.msk.f32.gmra.mrb[4].mxu0 %vm479_vm8, %v425_v40 }
  0xb2   : > { %586 = vmatprep.mubr.f32.mxu0 %v9460_v2  ;;  %v442_v50 = vpop.permute.xlu0 %441  ;;  %v447_v57 = vpop.permute.xlu1 %446 }
  0xb5   : > { %3686 = vmatmul.mubr.msk.f32.gmra.mrb[6].mxu0 %vm479_vm8, %v426_v41 }
  0xb6   : > { %592 = vmatprep.mubr.f32.mxu0 %v9460_v2  ;;  %v452_v17 = vpop.permute.xlu1 %451  ;;  %v457_v26 = vpop.permute.xlu0 %456 }
  0xb9   : > { %3687 = vmatmul.mubr.msk.f32.gmra.mrb[8].mxu0 %vm479_vm8, %v427_v46 }
  0xba   : > { %598 = vmatprep.mubr.f32.mxu0 %v9460_v2  ;;  %v462_v34 = vpop.permute.xlu1 %461  ;;  %v467_v36 = vpop.permute.xlu0 %466 }
  0xbd   : > { %3688 = vmatmul.mubr.msk.f32.gmra.mrb[10].mxu0 %vm479_vm8, %v428_v47 }
  0xbe   : > { %604 = vmatprep.mubr.f32.mxu0 %v9460_v2 }
  0xc1   : > { %3689 = vmatmul.mubr.msk.f32.gmra.mrb[12].mxu0 %vm479_vm8, %v429_v48  ;;  %v472_v48 = vpop.permute.xlu1 %471 }
  0xc2   : > { %610 = vmatprep.mubr.f32.mxu0 %v9460_v2 }
  0xc5   : > { %3690 = vmatmul.mubr.msk.f32.gmra.mrb[14].mxu0 %vm479_vm8, %v430_v49 }
 0x17c   : > { %v570_v51 = vpop.f32.mrb[0].mxu0 }
 0x17d   : > { %v571_v54 = vadd.f32 %v570_v51, %v442_v50  ;;  %v572_v55 = vpop.f32.mrb[1].mxu0 }
 0x17e   : > { %v573_v7 = vadd.f32 %v572_v55, %v442_v50  ;;  %v477_v50 = vpop.permute.xlu0 %476 }
 0x17f   : > { %v5207_v56 = vmax.f32 %v571_v54, 0.0 }
 0x180   : > { %v576_v58 = vpop.f32.mrb[2].mxu0  ;;  %v5233_v10 = vmax.f32 %v573_v7, 0.0 }
 0x181   : > { %9500 = vst [vmem:[#allocation6_spill] sm:$0xff] %v5207_v56  ;;  %v577_v59 = vadd.f32 %v576_v58, %v447_v57  ;;  %v578_v60 = vpop.f32.mrb[3].mxu0  ;;  %633 = vrot.lane.b32.xlu1 %v5207_v56, %s4919_s8 }
 0x182   : > { %9502 = vst [vmem:[#allocation8_spill] sm:$0xff] %v5233_v10  ;;  %v579_v1 = vadd.f32 %v578_v60, %v447_v57 }
 0x183   : > { %v5211_v61 = vmax.f32 %v577_v59, 0.0 }
 0x184   : > { %v582_v62 = vpop.f32.mrb[4].mxu0  ;;  %v5243_v19 = vmax.f32 %v579_v1, 0.0 }
 0x185   : > { %9501 = vst [vmem:[#allocation7_spill] sm:$0xff] %v5211_v61  ;;  %v584_v63 = vpop.f32.mrb[5].mxu0  ;;  %635 = vrot.lane.b32.xlu0 %v5211_v61, %s4919_s8  ;;  %697 = vrot.lane.b32.xlu1 %v5207_v56, %s4918_s30  ;;  %v583_v18 = vadd.f32 %v582_v62, %v452_v17 }
 0x186   : > { %9503 = vst [vmem:[#allocation9_spill] sm:$0xff] %v5243_v19  ;;  %v585_v30 = vadd.f32 %v584_v63, %v452_v17 }
 0x187   : > { %v5265_v27 = vmax.f32 %v583_v18, 0.0 }
 0x188   : > { %v588_v3 = vpop.f32.mrb[6].mxu0  ;;  %v5289_v31 = vmax.f32 %v585_v30, 0.0 }
 0x189   : > { %v590_v4 = vpop.f32.mrb[7].mxu0  ;;  %699 = vrot.lane.b32.xlu0 %v5211_v61, %s4918_s30  ;;  %761 = vrot.lane.b32.xlu1 %v5207_v56, %s4920_s9  ;;  %9504 = vst [vmem:[#allocation10_spill] sm:$0xff] %v5265_v27  ;;  %v589_v28 = vadd.f32 %v588_v3, %v457_v26 }
 0x18a   : > { %9506 = vst [vmem:[#allocation12_spill] sm:$0xff] %v5289_v31  ;;  %v591_v32 = vadd.f32 %v590_v4, %v457_v26 }
 0x18b   : > { %v5271_v29 = vmax.f32 %v589_v28, 0.0 }
 0x18c   : > { %v594_v5 = vpop.f32.mrb[8].mxu0  ;;  %v5295_v33 = vmax.f32 %v591_v32, 0.0 }
 0x18d   : > { %v5221_v6 = vpop.f32.mrb[9].mxu0  ;;  %763 = vrot.lane.b32.xlu0 %v5211_v61, %s4920_s9  ;;  %825 = vrot.lane.b32.xlu1 %v5207_v56, %s4921_s10  ;;  %9505 = vst [vmem:[#allocation11_spill] sm:$0xff] %v5271_v29  ;;  %v595_v35 = vadd.f32 %v594_v5, %v462_v34 }
 0x18e   : > { %9507 = vst [vmem:[#allocation13_spill] sm:$0xff] %v5295_v33  ;;  %v597_v40 = vadd.f32 %v5221_v6, %v462_v34 }
 0x18f   : > { %v5309_v37 = vmax.f32 %v595_v35, 0.0 }
 0x190   : > { %v600_v8 = vpop.f32.mrb[10].mxu0  ;;  %v5330_v41 = vmax.f32 %v597_v40, 0.0 }
 0x191   : > { %v5227_v9 = vpop.f32.mrb[11].mxu0  ;;  %827 = vrot.lane.b32.xlu0 %v5211_v61, %s4921_s10  ;;  %889 = vrot.lane.b32.xlu1 %v5207_v56, %s4922_s11  ;;  %9508 = vst [vmem:[#allocation14_spill] sm:$0xff] %v5309_v37  ;;  %v601_v38 = vadd.f32 %v600_v8, %v467_v36 }
 0x192   : > { %v603_v46 = vadd.f32 %v5227_v9, %v467_v36 }
 0x193   : > { %v5315_v39 = vmax.f32 %v601_v38, 0.0 }
 0x194   : > { %v5235_v0 = vpop.f32.mrb[12].mxu0  ;;  %v5337_v47 = vmax.f32 %v603_v46, 0.0 }
 0x195   : > { %v5237_v16 = vpop.f32.mrb[13].mxu0  ;;  %891 = vrot.lane.b32.xlu0 %v5211_v61, %s4922_s11  ;;  %649 = vrot.lane.b32.xlu1 %v5233_v10, %s4919_s8  ;;  %v607_v49 = vadd.f32 %v5235_v0, %v472_v48 }
 0x196   : > { %v609_v58 = vadd.f32 %v5237_v16, %v472_v48 }
 0x197   : > { %v5352_v51 = vmax.f32 %v607_v49, 0.0 }
 0x198   : > { %v5245_v20 = vpop.f32.mrb[14].mxu0  ;;  %v5376_v62 = vmax.f32 %v609_v58, 0.0 }
 0x199   : > { %v5247_v25 = vpop.f32.mrb[15].mxu0  ;;  %651 = vrot.lane.b32.xlu0 %v5243_v19, %s4919_s8  ;;  %713 = vrot.lane.b32.xlu1 %v5233_v10, %s4918_s30  ;;  %v613_v54 = vadd.f32 %v5245_v20, %v477_v50 }
 0x19a   : > { %v615_v63 = vadd.f32 %v5247_v25, %v477_v50 }
 0x19b   : > { %v5359_v55 = vmax.f32 %v613_v54, 0.0 }
 0x19c   : > { %v5387_v5 = vmax.f32 %v615_v63, 0.0 }
 0x19d   : > { %715 = vrot.lane.b32.xlu0 %v5243_v19, %s4918_s30  ;;  %777 = vrot.lane.b32.xlu1 %v5233_v10, %s4920_s9 }
 0x1a1   : > { %779 = vrot.lane.b32.xlu0 %v5243_v19, %s4920_s9  ;;  %841 = vrot.lane.b32.xlu1 %v5233_v10, %s4921_s10 }
 0x1a5   : > { %843 = vrot.lane.b32.xlu0 %v5243_v19, %s4921_s10  ;;  %905 = vrot.lane.b32.xlu1 %v5233_v10, %s4922_s11 }
 0x1a9   : > { %907 = vrot.lane.b32.xlu0 %v5243_v19, %s4922_s11  ;;  %637 = vrot.lane.b32.xlu1 %v5265_v27, %s4919_s8 }
 0x1ad   : > { %701 = vrot.lane.b32.xlu1 %v5265_v27, %s4918_s30  ;;  %639 = vrot.lane.b32.xlu0 %v5271_v29, %s4919_s8 }
 0x1b1   : > { %765 = vrot.lane.b32.xlu1 %v5265_v27, %s4920_s9  ;;  %703 = vrot.lane.b32.xlu0 %v5271_v29, %s4918_s30 }
 0x1b5   : > { %829 = vrot.lane.b32.xlu1 %v5265_v27, %s4921_s10  ;;  %767 = vrot.lane.b32.xlu0 %v5271_v29, %s4920_s9 }
 0x1b9   : > { %893 = vrot.lane.b32.xlu1 %v5265_v27, %s4922_s11  ;;  %831 = vrot.lane.b32.xlu0 %v5271_v29, %s4921_s10 }
 0x1bd   : > { %653 = vrot.lane.b32.xlu1 %v5289_v31, %s4919_s8  ;;  %895 = vrot.lane.b32.xlu0 %v5271_v29, %s4922_s11 }
 0x1c1   : > { %717 = vrot.lane.b32.xlu1 %v5289_v31, %s4918_s30  ;;  %655 = vrot.lane.b32.xlu0 %v5295_v33, %s4919_s8 }
 0x1c5   : > { %781 = vrot.lane.b32.xlu1 %v5289_v31, %s4920_s9  ;;  %719 = vrot.lane.b32.xlu0 %v5295_v33, %s4918_s30 }
 0x1c9   : > { %845 = vrot.lane.b32.xlu1 %v5289_v31, %s4921_s10  ;;  %783 = vrot.lane.b32.xlu0 %v5295_v33, %s4920_s9 }
 0x1cd   : > { %641 = vrot.lane.b32.xlu1 %v5309_v37, %s4919_s8  ;;  %847 = vrot.lane.b32.xlu0 %v5295_v33, %s4921_s10 }
 0x1d1   : > { %705 = vrot.lane.b32.xlu1 %v5309_v37, %s4918_s30  ;;  %643 = vrot.lane.b32.xlu0 %v5315_v39, %s4919_s8 }
 0x1d5   : > { %769 = vrot.lane.b32.xlu1 %v5309_v37, %s4920_s9  ;;  %707 = vrot.lane.b32.xlu0 %v5315_v39, %s4918_s30 }
 0x1d9   : > { %833 = vrot.lane.b32.xlu1 %v5309_v37, %s4921_s10  ;;  %771 = vrot.lane.b32.xlu0 %v5315_v39, %s4920_s9 }
 0x1dd   : > { %657 = vrot.lane.b32.xlu1 %v5330_v41, %s4919_s8  ;;  %835 = vrot.lane.b32.xlu0 %v5315_v39, %s4921_s10 }
 0x1e1   : > { %721 = vrot.lane.b32.xlu1 %v5330_v41, %s4918_s30  ;;  %659 = vrot.lane.b32.xlu0 %v5337_v47, %s4919_s8 }
 0x1e5   : > { %785 = vrot.lane.b32.xlu1 %v5330_v41, %s4920_s9  ;;  %723 = vrot.lane.b32.xlu0 %v5337_v47, %s4918_s30 }
 0x1e9   : > { %849 = vrot.lane.b32.xlu1 %v5330_v41, %s4921_s10  ;;  %787 = vrot.lane.b32.xlu0 %v5337_v47, %s4920_s9 }
 0x1ed   : > { %645 = vrot.lane.b32.xlu1 %v5352_v51, %s4919_s8  ;;  %851 = vrot.lane.b32.xlu0 %v5337_v47, %s4921_s10 }
 0x1f1   : > { %709 = vrot.lane.b32.xlu1 %v5352_v51, %s4918_s30  ;;  %647 = vrot.lane.b32.xlu0 %v5359_v55, %s4919_s8 }
 0x1f3   : > { %v634_v57 = vpop.permute.xlu1 %633 }
 0x1f5   : > { %773 = vrot.lane.b32.xlu1 %v5352_v51, %s4920_s9  ;;  %711 = vrot.lane.b32.xlu0 %v5359_v55, %s4918_s30 }
 0x1f7   : > { %v5370_v59 = vpop.permute.xlu1 %697  ;;  %v636_v60 = vpop.permute.xlu0 %635 }
 0x1f9   : > { %837 = vrot.lane.b32.xlu1 %v5352_v51, %s4921_s10  ;;  %775 = vrot.lane.b32.xlu0 %v5359_v55, %s4920_s9 }
 0x1fb   : > { %v5379_v3 = vpop.permute.xlu1 %761  ;;  %v5381_v4 = vpop.permute.xlu0 %699 }
 0x1fd   : > { %661 = vrot.lane.b32.xlu1 %v5376_v62, %s4919_s8  ;;  %839 = vrot.lane.b32.xlu0 %v5359_v55, %s4921_s10 }
 0x1ff   : > { %v5389_v6 = vpop.permute.xlu1 %825  ;;  %v5391_v7 = vpop.permute.xlu0 %763 }
 0x200   : > { %9509 = vst [vmem:[#allocation15_spill] sm:$0xff] %v5389_v6 }
 0x201   : > { %909 = vrot.lane.b32.xlu1 %v5289_v31, %s4922_s11  ;;  %663 = vrot.lane.b32.xlu0 %v5387_v5, %s4919_s8 }
 0x203   : > { %v5397_v8 = vpop.permute.xlu1 %889  ;;  %v5399_v9 = vpop.permute.xlu0 %827 }
 0x204   : > { %9510 = vst [vmem:[#allocation16_spill] sm:$0xff] %v5397_v8  ;;  %9511 = vst [vmem:[#allocation17_spill] sm:$0xff] %v5399_v9 }
 0x205   : > { %725 = vrot.lane.b32.xlu1 %v5376_v62, %s4918_s30  ;;  %911 = vrot.lane.b32.xlu0 %v5295_v33, %s4922_s11 }
 0x207   : > { %v650_v1 = vpop.permute.xlu1 %649  ;;  %v5405_v0 = vpop.permute.xlu0 %891 }
 0x208   : > { %9512 = vst [vmem:[#allocation18_spill] sm:$0xff] %v5405_v0  ;;  %v665_v16 = vsel %vm291_vm1, %v634_v57, %v650_v1  ;;  %v673_v26 = vsel %vm291_vm1, %v650_v1, %v634_v57 }
 0x209   : > { %789 = vrot.lane.b32.xlu1 %v5376_v62, %s4920_s9  ;;  %899 = vrot.lane.b32.xlu0 %v5315_v39, %s4922_s11  ;;  %v682_v28 = vmul.f32 %v665_v16, %v5062_v21  ;;  %v681_v38 = vmul.f32 %v673_v26, %v5068_v23  ;;  %v5476_v26 = vld [vmem:[%s9455_s3] sm:$0x77] }
 0x20a   : > { %9517 = vst [vmem:[#allocation23_spill] sm:$0xff] %v5476_v26 }
 0x20b   : > { %v5413_v20 = vpop.permute.xlu1 %713  ;;  %v652_v25 = vpop.permute.xlu0 %651 }
 0x20c   : > { %v674_v17 = vsel %vm291_vm1, %v652_v25, %v636_v60  ;;  %v666_v18 = vsel %vm291_vm1, %v636_v60, %v652_v25 }
 0x20d   : > { %853 = vrot.lane.b32.xlu1 %v5376_v62, %s4921_s10  ;;  %915 = vrot.lane.b32.xlu0 %v5337_v47, %s4922_s11  ;;  %v684_v30 = vmul.f32 %v666_v18, %v5062_v21  ;;  %v683_v32 = vmul.f32 %v674_v17, %v5068_v23 }
 0x20f   : > { %v5428_v34 = vpop.permute.xlu1 %777  ;;  %v5430_v35 = vpop.permute.xlu0 %715  ;;  %v3712_v36 = vpack.c.bf16 %v684_v30, %v682_v28  ;;  %v3714_v40 = vpack.c.bf16 %v683_v32, %v681_v38  ;;  %v1157_v28 = vcombine.high %v5476_v26, %v5476_v26 }
 0x211   : > { %897 = vrot.lane.b32.xlu1 %v5309_v37, %s4922_s11  ;;  %727 = vrot.lane.b32.xlu0 %v5387_v5, %s4918_s30 }
 0x212   : > { %3713 = vmatprep.subr.bf16.mxu1 %v3712_v36  ;;  %1228 = vmatprep.mubr.f32.mxu1 %v1157_v28 }
 0x213   : > { %v5437_v46 = vpop.permute.xlu1 %841  ;;  %v5439_v48 = vpop.permute.xlu0 %779  ;;  %3715 = vmatpush1.bf16.msra.mxu1 %v3714_v40 }
 0x214   : > { %9513 = vst [vmem:[#allocation19_spill] sm:$0xff] %v5437_v46 }
 0x215   : > { %913 = vrot.lane.b32.xlu1 %v5330_v41, %s4922_s11  ;;  %903 = vrot.lane.b32.xlu0 %v5359_v55, %s4922_s11 }
 0x217   : > { %v5445_v49 = vpop.permute.xlu1 %905  ;;  %v5447_v50 = vpop.permute.xlu0 %843 }
 0x218   : > { %9514 = vst [vmem:[#allocation20_spill] sm:$0xff] %v5445_v49  ;;  %9515 = vst [vmem:[#allocation21_spill] sm:$0xff] %v5447_v50 }
 0x219   : > { %901 = vrot.lane.b32.xlu1 %v5352_v51, %s4922_s11  ;;  %955 = vrot.lane.b32.xlu0 %v5211_v61, %s4923_s12 }
 0x21b   : > { %v638_v54 = vpop.permute.xlu1 %637  ;;  %v5453_v57 = vpop.permute.xlu0 %907 }
 0x21c   : > { %9516 = vst [vmem:[#allocation22_spill] sm:$0xff] %v5453_v57 }
 0x21d   : > { %917 = vrot.lane.b32.xlu1 %v5376_v62, %s4922_s11  ;;  %971 = vrot.lane.b32.xlu0 %v5243_v19, %s4923_s12 }
 0x21f   : > { %v702_v58 = vpop.permute.xlu1 %701  ;;  %v640_v60 = vpop.permute.xlu0 %639 }
 0x221   : > { %953 = vrot.lane.b32.xlu1 %v5207_v56, %s4923_s12  ;;  %791 = vrot.lane.b32.xlu0 %v5387_v5, %s4920_s9 }
 0x223   : > { %v766_v63 = vpop.permute.xlu1 %765  ;;  %v704_v1 = vpop.permute.xlu0 %703 }
 0x225   : > { %969 = vrot.lane.b32.xlu1 %v5233_v10, %s4923_s12  ;;  %959 = vrot.lane.b32.xlu0 %v5271_v29, %s4923_s12 }
 0x227   : > { %v830_v16 = vpop.permute.xlu1 %829  ;;  %v768_v25 = vpop.permute.xlu0 %767 }
 0x229   : > { %957 = vrot.lane.b32.xlu1 %v5265_v27, %s4923_s12  ;;  %975 = vrot.lane.b32.xlu0 %v5295_v33, %s4923_s12 }
 0x22b   : > { %v5471_v17 = vpop.permute.xlu1 %893  ;;  %v832_v18 = vpop.permute.xlu0 %831 }
 0x22d   : > { %973 = vrot.lane.b32.xlu1 %v5289_v31, %s4923_s12  ;;  %963 = vrot.lane.b32.xlu0 %v5315_v39, %s4923_s12 }
 0x22f   : > { %v654_v30 = vpop.permute.xlu1 %653  ;;  %v5484_v32 = vpop.permute.xlu0 %895 }
 0x230   : > { %v667_v36 = vsel %vm291_vm1, %v638_v54, %v654_v30  ;;  %v675_v38 = vsel %vm291_vm1, %v654_v30, %v638_v54 }
 0x231   : > { %961 = vrot.lane.b32.xlu1 %v5309_v37, %s4923_s12  ;;  %855 = vrot.lane.b32.xlu0 %v5387_v5, %s4921_s10  ;;  %v685_v15 = vmul.f32 %v675_v38, %v5068_v23  ;;  %v686_v11 = vmul.f32 %v667_v36, %v5062_v21 }
 0x233   : > { %v718_v40 = vpop.permute.xlu1 %717  ;;  %v656_v2 = vpop.permute.xlu0 %655 }
 0x234   : > { %v668_v13 = vsel %vm291_vm1, %v640_v60, %v656_v2  ;;  %v676_v28 = vsel %vm291_vm1, %v656_v2, %v640_v60  ;;  %v731_v54 = vsel %vm308_vm0, %v702_v58, %v718_v40  ;;  %v739_v30 = vsel %vm308_vm0, %v718_v40, %v702_v58 }
 0x235   : > { %v687_v12 = vmul.f32 %v676_v28, %v5068_v23  ;;  %v688_v49 = vmul.f32 %v668_v13, %v5062_v21  ;;  %977 = vrot.lane.b32.xlu1 %v5330_v41, %s4923_s12  ;;  %979 = vrot.lane.b32.xlu0 %v5337_v47, %s4923_s12  ;;  %v5515_v8 = vmul.f32 %v739_v30, %v5071_v24 }
 0x236   : > { %v5518_v57 = vmul.f32 %v731_v54, %v5065_v22 }
 0x237   : > { %v782_v2 = vpop.permute.xlu1 %781  ;;  %v720_v60 = vpop.permute.xlu0 %719  ;;  %v3716_v38 = vpack.c.bf16 %v688_v49, %v686_v11  ;;  %v3718_v36 = vpack.c.bf16 %v687_v12, %v685_v15 }
 0x238   : > { %v732_v28 = vsel %vm308_vm0, %v704_v1, %v720_v60  ;;  %v740_v13 = vsel %vm308_vm0, %v720_v60, %v704_v1  ;;  %v795_v11 = vsel %vm325_vm2, %v766_v63, %v782_v2  ;;  %v803_v12 = vsel %vm325_vm2, %v782_v2, %v766_v63 }
 0x239   : > { %v5521_v58 = vmul.f32 %v740_v13, %v5071_v24  ;;  %v5524_v40 = vmul.f32 %v732_v28, %v5065_v22  ;;  %965 = vrot.lane.b32.xlu1 %v5352_v51, %s4923_s12  ;;  %967 = vrot.lane.b32.xlu0 %v5359_v55, %s4923_s12  ;;  %v5543_v63 = vmul.f32 %v803_v12, %v5091_v42 }
 0x23a   : > { %3717 = vmatprep.subr.bf16.mxu1 %v3716_v38  ;;  %v5546_v2 = vmul.f32 %v795_v11, %v5094_v43 }
 0x23b   : > { %3719 = vmatpush1.bf16.msra.mxu1 %v3718_v36  ;;  %v846_v15 = vpop.permute.xlu1 %845  ;;  %v784_v49 = vpop.permute.xlu0 %783  ;;  %9518 = vst [vmem:[#allocation24_spill] sm:$0xff] %v5543_v63 }
 0x23c   : > { %v796_v30 = vsel %vm325_vm2, %v768_v25, %v784_v49  ;;  %v804_v60 = vsel %vm325_vm2, %v784_v49, %v768_v25  ;;  %v859_v28 = vsel %vm342_vm3, %v830_v16, %v846_v15  ;;  %v867_v25 = vsel %vm342_vm3, %v846_v15, %v830_v16 }
 0x23d   : > { %v5549_v38 = vmul.f32 %v804_v60, %v5091_v42  ;;  %v5552_v36 = vmul.f32 %v796_v30, %v5094_v43  ;;  %981 = vrot.lane.b32.xlu1 %v5376_v62, %s4923_s12  ;;  %1019 = vrot.lane.b32.xlu0 %v5211_v61, %s4925_s13  ;;  %v5571_v54 = vmul.f32 %v867_v25, %v5097_v44 }
 0x23e   : > { %v5574_v16 = vmul.f32 %v859_v28, %v5100_v45 }
 0x23f   : > { %9519 = vst [vmem:[#allocation25_spill] sm:$0xff] %v5549_v38  ;;  %v642_v13 = vpop.permute.xlu1 %641  ;;  %v848_v11 = vpop.permute.xlu0 %847  ;;  %9520 = vst [vmem:[#allocation26_spill] sm:$0xff] %v5571_v54 }
 0x240   : > { %v860_v30 = vsel %vm342_vm3, %v832_v18, %v848_v11  ;;  %v868_v60 = vsel %vm342_vm3, %v848_v11, %v832_v18  ;;  %9521 = vst [vmem:[#allocation27_spill] sm:$0xff] %v5574_v16 }
 0x241   : > { %v5577_v15 = vmul.f32 %v868_v60, %v5097_v44  ;;  %v5580_v12 = vmul.f32 %v860_v30, %v5100_v45  ;;  %1017 = vrot.lane.b32.xlu1 %v5207_v56, %s4925_s13  ;;  %1035 = vrot.lane.b32.xlu0 %v5243_v19, %s4925_s13 }
 0x243   : > { %9522 = vst [vmem:[#allocation28_spill] sm:$0xff] %v5577_v15  ;;  %9523 = vst [vmem:[#allocation29_spill] sm:$0xff] %v5580_v12  ;;  %v5586_v49 = vpop.permute.xlu1 %705  ;;  %v644_v18 = vpop.permute.xlu0 %643 }
 0x245   : > { %1033 = vrot.lane.b32.xlu1 %v5233_v10, %s4925_s13  ;;  %1023 = vrot.lane.b32.xlu0 %v5271_v29, %s4925_s13 }
 0x247   : > { %v770_v11 = vpop.permute.xlu1 %769  ;;  %v5596_v30 = vpop.permute.xlu0 %707 }
 0x249   : > { %1021 = vrot.lane.b32.xlu1 %v5265_v27, %s4925_s13  ;;  %1039 = vrot.lane.b32.xlu0 %v5295_v33, %s4925_s13 }
 0x24b   : > { %v834_v60 = vpop.permute.xlu1 %833  ;;  %v772_v25 = vpop.permute.xlu0 %771 }
 0x24d   : > { %1037 = vrot.lane.b32.xlu1 %v5289_v31, %s4925_s13  ;;  %1027 = vrot.lane.b32.xlu0 %v5315_v39, %s4925_s13 }
 0x24f   : > { %v658_v28 = vpop.permute.xlu1 %657  ;;  %v836_v1 = vpop.permute.xlu0 %835 }
 0x250   : > { %v669_v0 = vsel %vm291_vm1, %v642_v13, %v658_v28  ;;  %v677_v26 = vsel %vm291_vm1, %v658_v28, %v642_v13 }
 0x251   : > { %1025 = vrot.lane.b32.xlu1 %v5309_v37, %s4925_s13  ;;  %919 = vrot.lane.b32.xlu0 %v5387_v5, %s4922_s11  ;;  %v689_v6 = vmul.f32 %v677_v26, %v5068_v23  ;;  %v690_v46 = vmul.f32 %v669_v0, %v5062_v21 }
 0x253   : > { %v5614_v54 = vpop.permute.xlu1 %721  ;;  %v660_v15 = vpop.permute.xlu0 %659 }
 0x254   : > { %v670_v16 = vsel %vm291_vm1, %v644_v18, %v660_v15  ;;  %v678_v12 = vsel %vm291_vm1, %v660_v15, %v644_v18 }
 0x255   : > { %v691_v63 = vmul.f32 %v678_v12, %v5068_v23  ;;  %v692_v13 = vmul.f32 %v670_v16, %v5062_v21  ;;  %1041 = vrot.lane.b32.xlu1 %v5330_v41, %s4925_s13  ;;  %1043 = vrot.lane.b32.xlu0 %v5337_v47, %s4925_s13 }
 0x257   : > { %v786_v28 = vpop.permute.xlu1 %785  ;;  %v5628_v38 = vpop.permute.xlu0 %723  ;;  %v3720_v9 = vpack.c.bf16 %v692_v13, %v690_v46  ;;  %v3722_v50 = vpack.c.bf16 %v691_v63, %v689_v6 }
 0x258   : > { %v797_v0 = vsel %vm325_vm2, %v770_v11, %v786_v28  ;;  %v805_v26 = vsel %vm325_vm2, %v786_v28, %v770_v11 }
 0x259   : > { %1029 = vrot.lane.b32.xlu1 %v5352_v51, %s4925_s13  ;;  %1031 = vrot.lane.b32.xlu0 %v5359_v55, %s4925_s13  ;;  %v5645_v15 = vmul.f32 %v805_v26, %v5091_v42  ;;  %v5648_v18 = vmul.f32 %v797_v0, %v5094_v43 }
 0x25a   : > { %3721 = vmatprep.subr.bf16.mxu1 %v3720_v9 }
 0x25b   : > { %3723 = vmatpush1.bf16.msra.mxu1 %v3722_v50  ;;  %v850_v12 = vpop.permute.xlu1 %849  ;;  %v788_v16 = vpop.permute.xlu0 %787 }
 0x25c   : > { %v869_v46 = vsel %vm342_vm3, %v850_v12, %v834_v60  ;;  %v798_v6 = vsel %vm325_vm2, %v772_v25, %v788_v16  ;;  %v806_v63 = vsel %vm325_vm2, %v788_v16, %v772_v25  ;;  %v861_v11 = vsel %vm342_vm3, %v834_v60, %v850_v12 }
 0x25d   : > { %v5651_v9 = vmul.f32 %v806_v63, %v5091_v42  ;;  %v5654_v50 = vmul.f32 %v798_v6, %v5094_v43  ;;  %1045 = vrot.lane.b32.xlu1 %v5376_v62, %s4925_s13  ;;  %1083 = vrot.lane.b32.xlu0 %v5211_v61, %s4926_s14  ;;  %v5671_v6 = vmul.f32 %v869_v46, %v5097_v44 }
 0x25e   : > { %v5674_v60 = vmul.f32 %v861_v11, %v5100_v45 }
 0x25f   : > { %v646_v25 = vpop.permute.xlu1 %645  ;;  %v852_v13 = vpop.permute.xlu0 %851  ;;  %9524 = vst [vmem:[#allocation30_spill] sm:$0xff] %v5671_v6 }
 0x260   : > { %v862_v26 = vsel %vm342_vm3, %v836_v1, %v852_v13  ;;  %v870_v16 = vsel %vm342_vm3, %v852_v13, %v836_v1 }
 0x261   : > { %v5677_v12 = vmul.f32 %v870_v16, %v5097_v44  ;;  %v5680_v63 = vmul.f32 %v862_v26, %v5100_v45  ;;  %1081 = vrot.lane.b32.xlu1 %v5207_v56, %s4926_s14  ;;  %983 = vrot.lane.b32.xlu0 %v5387_v5, %s4923_s12 }
 0x263   : > { %9525 = vst [vmem:[#allocation31_spill] sm:$0xff] %v5677_v12  ;;  %v5686_v0 = vpop.permute.xlu1 %709  ;;  %v648_v1 = vpop.permute.xlu0 %647 }
 0x265   : > { %1097 = vrot.lane.b32.xlu1 %v5233_v10, %s4926_s14  ;;  %1099 = vrot.lane.b32.xlu0 %v5243_v19, %s4926_s14 }
 0x267   : > { %v5696_v13 = vpop.permute.xlu1 %773  ;;  %v5698_v26 = vpop.permute.xlu0 %711 }
 0x269   : > { %1085 = vrot.lane.b32.xlu1 %v5265_v27, %s4926_s14  ;;  %1087 = vrot.lane.b32.xlu0 %v5271_v29, %s4926_s14 }
 0x26b   : > { %v5704_v16 = vpop.permute.xlu1 %837  ;;  %v5706_v46 = vpop.permute.xlu0 %775 }
 0x26d   : > { %1101 = vrot.lane.b32.xlu1 %v5289_v31, %s4926_s14  ;;  %1103 = vrot.lane.b32.xlu0 %v5295_v33, %s4926_s14  ;;  %v730_v33 = vsel %vm308_vm0, %v5381_v4, %v5430_v35 }
 0x26f   : > { %v662_v11 = vpop.permute.xlu1 %661  ;;  %v5712_v28 = vpop.permute.xlu0 %839 }
 0x270   : > { %9526 = vst [vmem:[#allocation32_spill] sm:$0xff] %v5712_v28  ;;  %v671_v27 = vsel %vm291_vm1, %v646_v25, %v662_v11  ;;  %v679_v29 = vsel %vm291_vm1, %v662_v11, %v646_v25  ;;  %v738_v25 = vsel %vm308_vm0, %v5430_v35, %v5381_v4  ;;  %v748_v28 = vmul.f32 %v730_v33, %v5065_v22 }
 0x271   : > { %1089 = vrot.lane.b32.xlu1 %v5309_v37, %s4926_s14  ;;  %1047 = vrot.lane.b32.xlu0 %v5387_v5, %s4925_s13  ;;  %v729_v37 = vsel %vm308_vm0, %v5370_v59, %v5413_v20  ;;  %v693_v19 = vmul.f32 %v679_v29, %v5068_v23  ;;  %v694_v10 = vmul.f32 %v671_v27, %v5062_v21  ;;  %s3695_s13 = sshll.u32 %s9570_s25, 7 }
 0x272   : > { %v746_v33 = vmul.f32 %v729_v37, %v5065_v22  ;;  %v747_v35 = vmul.f32 %v738_v25, %v5071_v24  ;;  %s8055_s15 = scalar_lea.vmem %s9459_s7, %s3695_s13 }
 0x273   : > { %v910_v31 = vpop.permute.xlu1 %909  ;;  %v664_v61 = vpop.permute.xlu0 %663 }
 0x274   : > { %v672_v11 = vsel %vm291_vm1, %v648_v1, %v664_v61  ;;  %v680_v56 = vsel %vm291_vm1, %v664_v61, %v648_v1  ;;  %v923_v4 = vsel %vm359_vm4, %v5471_v17, %v910_v31  ;;  %v931_v61 = vsel %vm359_vm4, %v910_v31, %v5471_v17 }
 0x275   : > { %v695_v6 = vmul.f32 %v680_v56, %v5068_v23  ;;  %v696_v12 = vmul.f32 %v672_v11, %v5062_v21  ;;  %1105 = vrot.lane.b32.xlu1 %v5330_v41, %s4926_s14  ;;  %1091 = vrot.lane.b32.xlu0 %v5315_v39, %s4926_s14  ;;  %v737_v21 = vsel %vm308_vm0, %v5413_v20, %v5370_v59 }
 0x276   : > { %v5766_v1 = vmul.f32 %v923_v4, %v5112_v52  ;;  %v5769_v59 = vmul.f32 %v931_v61, %v5115_v53  ;;  %v3728_v37 = vpack.c.bf16 %v748_v28, %v746_v33  ;;  %v745_v20 = vmul.f32 %v737_v21, %v5071_v24 }
 0x277   : > { %v726_v23 = vpop.permute.xlu1 %725  ;;  %v912_v56 = vpop.permute.xlu0 %911  ;;  %v3724_v27 = vpack.c.bf16 %v696_v12, %v694_v10  ;;  %v3726_v29 = vpack.c.bf16 %v695_v6, %v693_v19  ;;  %v733_v28 = vsel %vm308_vm0, %v5586_v49, %v5614_v54  ;;  %v742_v4 = vsel %vm308_vm0, %v5628_v38, %v5596_v30 }
 0x278   : > { %v924_v31 = vsel %vm359_vm4, %v5484_v32, %v912_v56  ;;  %v932_v17 = vsel %vm359_vm4, %v912_v56, %v5484_v32  ;;  %v734_v32 = vsel %vm308_vm0, %v5596_v30, %v5628_v38  ;;  %v3730_v61 = vpack.c.bf16 %v747_v35, %v745_v20  ;;  %v1378_v35 = vld [vmem:[%s9458_s6 + $0x8] sm:$0xff] }
 0x279   : > { %v5772_v10 = vmul.f32 %v924_v31, %v5112_v52  ;;  %v5775_v19 = vmul.f32 %v932_v17, %v5115_v53  ;;  %1093 = vrot.lane.b32.xlu1 %v5352_v51, %s4926_s14  ;;  %1107 = vrot.lane.b32.xlu0 %v5337_v47, %s4926_s14  ;;  %v741_v21 = vsel %vm308_vm0, %v5614_v54, %v5586_v49  ;;  %v1410_v31 = vld [vmem:[%s9458_s6 + $0x108] sm:$0xff]  ;;  %v1377_v17 = vld [vmem:[%s9458_s6] sm:$0xff] }
 0x27a   : > { %3725 = vmatprep.subr.bf16.mxu1 %v3724_v27  ;;  %v756_v56 = vmul.f32 %v734_v32, %v5065_v22  ;;  %v1148_v27 = vld [vmem:[%s9456_s4] sm:$0x7]  ;;  %v755_v33 = vmul.f32 %v742_v4, %v5071_v24  ;;  %v9527_v54 = vpack.c.bf16 %v5524_v40, %v5518_v57  ;;  %v794_v57 = vsel %vm325_vm2, %v5391_v7, %v5439_v48 }
 0x27b   : > { %v3798_v6 = vpack.c.bf16 %v5772_v10, %v5766_v1  ;;  %3727 = vmatpush1.bf16.msra.mxu1 %v3726_v29  ;;  %v5788_v12 = vpop.permute.xlu1 %789  ;;  %v5790_v25 = vpop.permute.xlu0 %899  ;;  %v3796_v11 = vpack.c.bf16 %v5775_v19, %v5769_v59  ;;  %v754_v29 = vmul.f32 %v733_v28, %v5065_v22  ;;  %v753_v40 = vmul.f32 %v741_v21, %v5071_v24 }
 0x27c   : > { %3729 = vmatprep.subr.bf16.mxu1 %v3728_v37  ;;  %v1409_v37 = vld [vmem:[%s9458_s6 + $0x100] sm:$0xff]  ;;  %v743_v20 = vsel %vm308_vm0, %v726_v23, %v5686_v0  ;;  %v3856_v28 = vpack.c.bf16 %v1410_v31, %v1378_v35  ;;  %v793_v21 = vsel %vm325_vm2, %v5379_v3, %v5428_v34  ;;  %v1474_v35 = vld [vmem:[%s9458_s6 + $0x308] sm:$0xff]  ;;  %v812_v31 = vmul.f32 %v794_v57, %v5094_v43 }
 0x27d   : > { %1109 = vrot.lane.b32.xlu1 %v5376_v62, %s4926_s14  ;;  %1095 = vrot.lane.b32.xlu0 %v5359_v55, %s4926_s14  ;;  %v3736_v32 = vpack.c.bf16 %v756_v56, %v754_v29  ;;  %v3858_v4 = vpack.c.bf16 %v1409_v37, %v1377_v17  ;;  %v735_v56 = vsel %vm308_vm0, %v5686_v0, %v726_v23  ;;  %v1506_v57 = vld [vmem:[%s9458_s6 + $0x408] sm:$0xff] }
 0x27e   : > { %v9528_v29 = vpack.c.bf16 %v5521_v58, %v5515_v8  ;;  %v3738_v37 = vpack.c.bf16 %v755_v33, %v753_v40  ;;  %3857 = vmatprep.subr.bf16.mxu0 %v3856_v28  ;;  %v1473_v8 = vld [vmem:[%s9458_s6 + $0x300] sm:$0xff]  ;;  %v757_v58 = vmul.f32 %v743_v20, %v5071_v24  ;;  %v1538_v40 = vld [vmem:[%s9458_s6 + $0x508] sm:$0xff]  ;;  %v758_v20 = vmul.f32 %v735_v56, %v5065_v22 }
 0x27f   : > { %3731 = vmatpush1.bf16.msra.mxu1 %v3730_v61  ;;  %v5814_v38 = vpop.permute.xlu1 %853  ;;  %v5816_v30 = vpop.permute.xlu0 %915  ;;  %v1442_v61 = vld [vmem:[%s9458_s6 + $0x208] sm:$0xff]  ;;  %3859 = vmatpush1.bf16.msra.mxu0 %v3858_v4 }
 0x280   : > { %3733 = vmatprep.subr.bf16.mxu1 %v9527_v54  ;;  %v5827_v49 = vsel %vm359_vm4, %v5790_v25, %v5816_v30 }
 0x281   : > { %1151 = vperm.xlu1 %4905, %v1148_v27   ;;  %1111 = vrot.lane.b32.xlu0 %v5387_v5, %s4926_s14  ;;  %v802_v27 = vsel %vm325_vm2, %v5439_v48, %v5391_v7  ;;  %v3860_v7 = vpack.c.bf16 %v1474_v35, %v1442_v61  ;;  %v1441_v48 = vld [vmem:[%s9458_s6 + $0x200] sm:$0xff]  ;;  %v3864_v61 = vpack.c.bf16 %v1538_v40, %v1506_v57 }
 0x282   : > { %v3862_v33 = vpack.c.bf16 %v1473_v8, %v1441_v48  ;;  %v811_v48 = vmul.f32 %v802_v27, %v5091_v42  ;;  %v1634_v27 = vld [vmem:[%s9458_s6 + $0x808] sm:$0xff] }
 0x283   : > { %3735 = vmatpush1.bf16.msra.mxu1 %v9528_v29  ;;  %v5868_v54 = vpop.permute.xlu1 %897  ;;  %v728_v17 = vpop.permute.xlu0 %727  ;;  %3861 = vmatprep.subr.bf16.mxu0 %v3860_v7  ;;  %v1537_v29 = vld [vmem:[%s9458_s6 + $0x500] sm:$0xff]  ;;  %v1602_v7 = vld [vmem:[%s9458_s6 + $0x708] sm:$0xff] }
 0x284   : > { %3737 = vmatprep.subr.bf16.mxu1 %v3736_v32  ;;  %v736_v0 = vsel %vm308_vm0, %v5698_v26, %v728_v17  ;;  %v744_v23 = vsel %vm308_vm0, %v728_v17, %v5698_v26  ;;  %v1505_v26 = vld [vmem:[%s9458_s6 + $0x400] sm:$0xff]  ;;  %3863 = vmatpush1.bf16.msra.mxu0 %v3862_v33 }
 0x285   : > { %v759_v32 = vmul.f32 %v744_v23, %v5071_v24  ;;  %v760_v28 = vmul.f32 %v736_v0, %v5065_v22  ;;  %v801_v24 = vsel %vm325_vm2, %v5428_v34, %v5379_v3  ;;  %v810_v22 = vmul.f32 %v793_v21, %v5094_v43  ;;  %3865 = vmatprep.subr.bf16.mxu0 %v3864_v61  ;;  %v1569_v21 = vld [vmem:[%s9458_s6 + $0x600] sm:$0xff] }
 0x286   : > { %v3866_v8 = vpack.c.bf16 %v1537_v29, %v1505_v26  ;;  %v809_v0 = vmul.f32 %v801_v24, %v5091_v42  ;;  %v1698_v26 = vld [vmem:[%s9458_s6 + $0xa08] sm:$0xff]  ;;  %v9529_v24 = vpack.c.bf16 %v5552_v36, %v5546_v2  ;;  %v1697_v2 = vld [vmem:[%s9458_s6 + $0xa00] sm:$0xff] }
 0x287   : > { %3739 = vmatpush1.bf16.msra.mxu1 %v3738_v37  ;;  %v5899_v4 = vpop.permute.xlu1 %913  ;;  %v5909_v56 = vpop.permute.xlu0 %903  ;;  %v3740_v35 = vpack.c.bf16 %v760_v28, %v758_v20  ;;  %v3742_v17 = vpack.c.bf16 %v759_v32, %v757_v58  ;;  %v1570_v37 = vld [vmem:[%s9458_s6 + $0x608] sm:$0xff]  ;;  %v3744_v3 = vpack.c.bf16 %v812_v31, %v810_v22  ;;  %v1601_v58 = vld [vmem:[%s9458_s6 + $0x700] sm:$0xff] }
 0x288   : > { %v3868_v34 = vpack.c.bf16 %v1602_v7, %v1570_v37  ;;  %v1666_v31 = vld [vmem:[%s9458_s6 + $0x908] sm:$0xff]  ;;  %v3746_v57 = vpack.c.bf16 %v811_v48, %v809_v0  ;;  %3867 = vmatpush1.bf16.msra.mxu0 %v3866_v8  ;;  %v3870_v40 = vpack.c.bf16 %v1601_v58, %v1569_v21  ;;  %v1633_v32 = vld [vmem:[%s9458_s6 + $0x800] sm:$0xff]  ;;  %v807_v48 = vsel %vm325_vm2, %v5788_v12, %v5696_v13  ;;  %v9533_v21 = vld [vmem:[#allocation24_spill] sm:$0xff] }
 0x289   : > { %3741 = vmatprep.subr.bf16.mxu1 %v3740_v35  ;;  %v3872_v20 = vpack.c.bf16 %v1666_v31, %v1634_v27  ;;  %v1665_v28 = vld [vmem:[%s9458_s6 + $0x900] sm:$0xff]  ;;  %v1730_v29 = vld [vmem:[%s9458_s6 + $0xb08] sm:$0xff]  ;;  %v9530_v35 = vld [vmem:[#allocation21_spill] sm:$0xff] }
 0x28a   : > { %3869 = vmatprep.subr.bf16.mxu0 %v3868_v34  ;;  %v3874_v7 = vpack.c.bf16 %v1665_v28, %v1633_v32  ;;  %v3876_v8 = vpack.c.bf16 %v1730_v29, %v1698_v26  ;;  %v1729_v36 = vld [vmem:[%s9458_s6 + $0xb00] sm:$0xff]  ;;  %v9532_v34 = vld [vmem:[#allocation25_spill] sm:$0xff]  ;;  %v1762_v27 = vld [vmem:[%s9458_s6 + $0xc08] sm:$0xff]  ;;  %v9537_v32 = vpack.c.bf16 %v5654_v50, %v5648_v18  ;;  %v821_v26 = vmul.f32 %v807_v48, %v5091_v42 }
 0x28b   : > { %3743 = vmatpush1.bf16.msra.mxu1 %v3742_v17  ;;  %v5925_v23 = vpop.permute.xlu1 %901  ;;  %v5933_v33 = vpop.permute.xlu0 %955  ;;  %v9531_v17 = vld [vmem:[#allocation17_spill] sm:$0xff]  ;;  %v9534_v58 = vpack.c.bf16 %v9532_v34, %v9533_v21  ;;  %v1794_v31 = vld [vmem:[%s9458_s6 + $0xd08] sm:$0xff]  ;;  %v3878_v34 = vpack.c.bf16 %v1729_v36, %v1697_v2  ;;  %v1793_v48 = vld [vmem:[%s9458_s6 + $0xd00] sm:$0xff] }
 0x28c   : > { %3745 = vmatprep.subr.bf16.mxu1 %v3744_v3  ;;  %v858_v37 = vsel %vm342_vm3, %v9531_v17, %v9530_v35  ;;  %3871 = vmatpush1.bf16.msra.mxu0 %v3870_v40  ;;  %v799_v3 = vsel %vm325_vm2, %v5696_v13, %v5788_v12  ;;  %v9536_v40 = vld [vmem:[#allocation15_spill] sm:$0xff]  ;;  %v866_v13 = vsel %vm342_vm3, %v9530_v35, %v9531_v17 }
 0x28d   : > { %3873 = vmatprep.subr.bf16.mxu0 %v3872_v20  ;;  %v876_v12 = vmul.f32 %v858_v37, %v5100_v45  ;;  %v822_v35 = vmul.f32 %v799_v3, %v5094_v43  ;;  %v3880_v50 = vpack.c.bf16 %v1794_v31, %v1762_v27  ;;  %v1761_v37 = vld [vmem:[%s9458_s6 + $0xc00] sm:$0xff]  ;;  %v875_v3 = vmul.f32 %v866_v13, %v5097_v44  ;;  %v1890_v13 = vld [vmem:[%s9458_s6 + $0x1008] sm:$0xff] }
 0x28e   : > { %v3882_v21 = vpack.c.bf16 %v1793_v48, %v1761_v37  ;;  %v1825_v31 = vld [vmem:[%s9458_s6 + $0xe00] sm:$0xff]  ;;  %v9540_v37 = vld [vmem:[#allocation27_spill] sm:$0xff] }
 0x28f   : > { %3747 = vmatpush1.bf16.msra.mxu1 %v3746_v57  ;;  %v5941_v61 = vpop.permute.xlu1 %917  ;;  %v5952_v22 = vpop.permute.xlu0 %971  ;;  %v9535_v57 = vld [vmem:[#allocation19_spill] sm:$0xff] }
 0x290   : > { %3749 = vmatprep.subr.bf16.mxu1 %v9529_v24  ;;  %v857_v20 = vsel %vm342_vm3, %v9536_v40, %v9535_v57  ;;  %3875 = vmatpush1.bf16.msra.mxu0 %v3874_v7 }
 0x291   : > { %3877 = vmatprep.subr.bf16.mxu0 %v3876_v8  ;;  %v865_v8 = vsel %vm342_vm3, %v9535_v57, %v9536_v40  ;;  %v874_v2 = vmul.f32 %v857_v20, %v5100_v45  ;;  %v1857_v57 = vld [vmem:[%s9458_s6 + $0xf00] sm:$0xff] }
 0x292   : > { %v873_v40 = vmul.f32 %v865_v8, %v5097_v44 }
 0x293   : > { %3751 = vmatpush1.bf16.msra.mxu1 %v9534_v58  ;;  %v5975_v0 = vpop.permute.xlu1 %953  ;;  %v792_v28 = vpop.permute.xlu0 %791  ;;  %v3760_v58 = vpack.c.bf16 %v876_v12, %v874_v2  ;;  %v1922_v12 = vld [vmem:[%s9458_s6 + $0x1108] sm:$0xff]  ;;  %v1953_v2 = vld [vmem:[%s9458_s6 + $0x1200] sm:$0xff] }
 0x294   : > { %3753 = vmatprep.subr.bf16.mxu1 %v9537_v32  ;;  %v800_v29 = vsel %vm325_vm2, %v5706_v46, %v792_v28  ;;  %v808_v24 = vsel %vm325_vm2, %v792_v28, %v5706_v46  ;;  %v9538_v46 = vpack.c.bf16 %v5651_v9, %v5645_v15  ;;  %3879 = vmatpush1.bf16.msra.mxu0 %v3878_v34  ;;  %v1921_v34 = vld [vmem:[%s9458_s6 + $0x1100] sm:$0xff] }
 0x295   : > { %v823_v17 = vmul.f32 %v808_v24, %v5091_v42  ;;  %v824_v18 = vmul.f32 %v800_v29, %v5094_v43  ;;  %v1826_v42 = vld [vmem:[%s9458_s6 + $0xe08] sm:$0xff]  ;;  %3881 = vmatprep.subr.bf16.mxu0 %v3880_v50  ;;  %v3762_v28 = vpack.c.bf16 %v875_v3, %v873_v40  ;;  %v3888_v29 = vpack.c.bf16 %v1922_v12, %v1890_v13  ;;  %v1889_v24 = vld [vmem:[%s9458_s6 + $0x1000] sm:$0xff]  ;;  %v9539_v50 = vld [vmem:[#allocation29_spill] sm:$0xff] }
 0x296   : > { %v1858_v43 = vld [vmem:[%s9458_s6 + $0xf08] sm:$0xff]  ;;  %v9541_v48 = vpack.c.bf16 %v9539_v50, %v9540_v37  ;;  %v9542_v3 = vld [vmem:[#allocation28_spill] sm:$0xff]  ;;  %v9545_v40 = vpack.c.bf16 %v5680_v63, %v5674_v60  ;;  %v9548_v50 = vld [vmem:[#allocation30_spill] sm:$0xff] }
 0x297   : > { %3755 = vmatpush1.bf16.msra.mxu1 %v9538_v46  ;;  %v6014_v7 = vpop.permute.xlu1 %969  ;;  %v6027_v36 = vpop.permute.xlu0 %959  ;;  %v3756_v15 = vpack.c.bf16 %v824_v18, %v822_v35  ;;  %v3758_v9 = vpack.c.bf16 %v823_v17, %v821_v26  ;;  %v3884_v27 = vpack.c.bf16 %v1858_v43, %v1826_v42  ;;  %v3886_v26 = vpack.c.bf16 %v1857_v57, %v1825_v31  ;;  %v1954_v17 = vld [vmem:[%s9458_s6 + $0x1208] sm:$0xff] }
 0x298   : > { %3883 = vmatpush1.bf16.msra.mxu0 %v3882_v21  ;;  %v1986_v18 = vld [vmem:[%s9458_s6 + $0x1308] sm:$0xff]  ;;  %v3890_v42 = vpack.c.bf16 %v1921_v34, %v1889_v24  ;;  %v871_v43 = vsel %vm342_vm3, %v5814_v38, %v5704_v16  ;;  %v9543_v21 = vld [vmem:[#allocation26_spill] sm:$0xff]  ;;  %v993_v59 = vsel %vm376_vm5, %v6014_v7, %v5975_v0  ;;  %v985_v10 = vsel %vm376_vm5, %v5975_v0, %v6014_v7 }
 0x299   : > { %3757 = vmatprep.subr.bf16.mxu1 %v3756_v15  ;;  %3885 = vmatprep.subr.bf16.mxu0 %v3884_v27  ;;  %v3892_v8 = vpack.c.bf16 %v1986_v18, %v1954_v17  ;;  %v1985_v15 = vld [vmem:[%s9458_s6 + $0x1300] sm:$0xff]  ;;  %v2018_v31 = vld [vmem:[%s9458_s6 + $0x1408] sm:$0xff] }
 0x29a   : > { %v2050_v57 = vld [vmem:[%s9458_s6 + $0x1508] sm:$0xff]  ;;  %v2017_v34 = vld [vmem:[%s9458_s6 + $0x1400] sm:$0xff] }
 0x29b   : > { %3759 = vmatpush1.bf16.msra.mxu1 %v3758_v9  ;;  %v6037_v20 = vpop.permute.xlu1 %957  ;;  %v6045_v32 = vpop.permute.xlu0 %975  ;;  %v863_v9 = vsel %vm342_vm3, %v5704_v16, %v5814_v38  ;;  %v885_v16 = vmul.f32 %v871_v43, %v5097_v44  ;;  %v9546_v38 = vld [vmem:[#allocation32_spill] sm:$0xff]  ;;  %v3896_v63 = vpack.c.bf16 %v2050_v57, %v2018_v31  ;;  %v2049_v17 = vld [vmem:[%s9458_s6 + $0x1500] sm:$0xff]  ;;  %v9547_v18 = vld [vmem:[#allocation31_spill] sm:$0xff] }
 0x29c   : > { %3761 = vmatprep.subr.bf16.mxu1 %v3760_v58  ;;  %3887 = vmatpush1.bf16.msra.mxu0 %v3886_v26  ;;  %v9544_v58 = vpack.c.bf16 %v9542_v3, %v9543_v21  ;;  %v3894_v26 = vpack.c.bf16 %v1985_v15, %v1953_v2  ;;  %v9549_v37 = vpack.c.bf16 %v9547_v18, %v9548_v50  ;;  %v6126_v2 = vld [vmem:[%s9455_s3 + $0x8] sm:$0x77]  ;;  %v9551_v3 = vld [vmem:[#allocation9_spill] sm:$0xff]  ;;  %v2081_v31 = vld [vmem:[%s9458_s6 + $0x1600] sm:$0xff] }
 0x29d   : > { %3889 = vmatprep.subr.bf16.mxu0 %v3888_v29  ;;  %v886_v29 = vmul.f32 %v863_v9, %v5100_v45  ;;  %v3898_v15 = vpack.c.bf16 %v2049_v17, %v2017_v34  ;;  %v9550_v9 = vld [vmem:[#allocation8_spill] sm:$0xff]  ;;  %v2113_v57 = vld [vmem:[%s9458_s6 + $0x1700] sm:$0xff]  ;;  %v9556_v34 = vld [vmem:[#allocation13_spill] sm:$0xff] }
 0x29e   : > { %v3776_v21 = vpack.c.bf16 %v9551_v3, %v9550_v9  ;;  %v2145_v50 = vld [vmem:[%s9458_s6 + $0x1800] sm:$0xff]  ;;  %v9558_v9 = vld [vmem:[#allocation11_spill] sm:$0xff] }
 0x29f   : > { %3763 = vmatpush1.bf16.msra.mxu1 %v3762_v28  ;;  %v6053_v35 = vpop.permute.xlu1 %973  ;;  %v6064_v46 = vpop.permute.xlu0 %963 }
 0x2a0   : > { %3765 = vmatprep.subr.bf16.mxu1 %v9541_v48  ;;  %3891 = vmatpush1.bf16.msra.mxu0 %v3890_v42 }
 0x2a1   : > { %3893 = vmatprep.subr.bf16.mxu0 %v3892_v8 }
 0x2a3   : > { %3767 = vmatpush1.bf16.msra.mxu1 %v9544_v58  ;;  %v6083_v27 = vpop.permute.xlu1 %961  ;;  %v856_v13 = vpop.permute.xlu0 %855 }
 0x2a4   : > { %3769 = vmatprep.subr.bf16.mxu1 %v9545_v40  ;;  %v864_v12 = vsel %vm342_vm3, %v9546_v38, %v856_v13  ;;  %v872_v28 = vsel %vm342_vm3, %v856_v13, %v9546_v38  ;;  %3895 = vmatpush1.bf16.msra.mxu0 %v3894_v26  ;;  %v1158_v13 = vcombine.high %v6126_v2, %v6126_v2  ;;  %v2178_v38 = vld [vmem:[%s9458_s6 + $0x1908] sm:$0xff] }
 0x2a5   : > { %v887_v24 = vmul.f32 %v872_v28, %v5097_v44  ;;  %v888_v60 = vmul.f32 %v864_v12, %v5100_v45  ;;  %v2082_v44 = vld [vmem:[%s9458_s6 + $0x1608] sm:$0xff]  ;;  %3897 = vmatprep.subr.bf16.mxu0 %v3896_v63  ;;  %v9552_v28 = vld [vmem:[#allocation6_spill] sm:$0xff]  ;;  %v9555_v63 = vld [vmem:[#allocation12_spill] sm:$0xff] }
 0x2a6   : > { %v2114_v45 = vld [vmem:[%s9458_s6 + $0x1708] sm:$0xff]  ;;  %v3780_v17 = vpack.c.bf16 %v9556_v34, %v9555_v63  ;;  %v9563_v34 = vld [vmem:[#allocation14_spill] sm:$0xff] }
 0x2a7   : > { %3771 = vmatpush1.bf16.msra.mxu1 %v9549_v37  ;;  %v6113_v48 = vpop.permute.xlu1 %977  ;;  %v6121_v42 = vpop.permute.xlu0 %979  ;;  %v3772_v43 = vpack.c.bf16 %v888_v60, %v886_v29  ;;  %v3774_v8 = vpack.c.bf16 %v887_v24, %v885_v16  ;;  %v3900_v58 = vpack.c.bf16 %v2114_v45, %v2082_v44  ;;  %v2146_v16 = vld [vmem:[%s9458_s6 + $0x1808] sm:$0xff]  ;;  %v3902_v24 = vpack.c.bf16 %v2113_v57, %v2081_v31  ;;  %v2177_v37 = vld [vmem:[%s9458_s6 + $0x1900] sm:$0xff] }
 0x2a8   : > { %v9553_v26 = vld [vmem:[#allocation7_spill] sm:$0xff]  ;;  %3899 = vmatpush1.bf16.msra.mxu0 %v3898_v15  ;;  %v3904_v18 = vpack.c.bf16 %v2178_v38, %v2146_v16  ;;  %v9557_v15 = vld [vmem:[#allocation10_spill] sm:$0xff] }
 0x2a9   : > { %3773 = vmatprep.subr.bf16.mxu1 %v3772_v43  ;;  %v3778_v29 = vpack.c.bf16 %v9553_v26, %v9552_v28  ;;  %v9554_v60 = vld [vmem:[#allocation23_spill] sm:$0xff]  ;;  %3901 = vmatprep.subr.bf16.mxu0 %v3900_v58  ;;  %v3782_v3 = vpack.c.bf16 %v9558_v9, %v9557_v15  ;;  %v3784_v58 = vpack.c.bf16 %v5337_v47, %v5330_v41  ;;  %v2209_v57 = vld [vmem:[%s9458_s6 + $0x1a00] sm:$0xff] }
 0x2aa   : > { %v2210_v45 = vld [vmem:[%s9458_s6 + $0x1a08] sm:$0xff]  ;;  %v9559_v16 = vld [vmem:[#allocation18_spill] sm:$0xff] }
 0x2ab   : > { %3775 = vmatpush1.bf16.msra.mxu1 %v3774_v8  ;;  %v6136_v40 = vpop.permute.xlu1 %965  ;;  %v6146_v12 = vpop.permute.xlu0 %967  ;;  %v2242_v43 = vld [vmem:[%s9458_s6 + $0x1b08] sm:$0xff]  ;;  %v9560_v38 = vld [vmem:[#allocation22_spill] sm:$0xff] }
 0x2ac   : > { %3777 = vmatprep.subr.bf16.mxu1 %v3776_v21  ;;  %3903 = vmatpush1.bf16.msra.mxu0 %v3902_v24  ;;  %v3906_v21 = vpack.c.bf16 %v2177_v37, %v2145_v50  ;;  %v3908_v31 = vpack.c.bf16 %v2242_v43, %v2210_v45  ;;  %v930_v28 = vsel %vm359_vm4, %v9560_v38, %v9559_v16  ;;  %v2274_v41 = vld [vmem:[%s9458_s6 + $0x1c08] sm:$0xff]  ;;  %v9561_v24 = vld [vmem:[#allocation16_spill] sm:$0xff]  ;;  %v2273_v15 = vld [vmem:[%s9458_s6 + $0x1c00] sm:$0xff] }
 0x2ad   : > { %3905 = vmatprep.subr.bf16.mxu0 %v3904_v18  ;;  %v2306_v47 = vld [vmem:[%s9458_s6 + $0x1d08] sm:$0xff]  ;;  %v922_v50 = vsel %vm359_vm4, %v9559_v16, %v9560_v38  ;;  %v940_v37 = vmul.f32 %v930_v28, %v5115_v53  ;;  %v3788_v45 = vpack.c.bf16 %v5387_v5, %v5376_v62  ;;  %v933_v16 = vsel %vm359_vm4, %v5899_v4, %v5868_v54 }
 0x2ae   : > { %1229 = vmatmul.mubr.f32.vlgmr.msra.gmra.mrb[0].mxu1 %v9554_v60  ;;  %v9562_v60 = vld [vmem:[#allocation20_spill] sm:$0xff]  ;;  %v3912_v43 = vpack.c.bf16 %v2306_v47, %v2274_v41  ;;  %v946_v47 = vmul.f32 %v933_v16, %v5115_v53 }
 0x2af   : > { %3779 = vmatpush1.bf16.msra.mxu1 %v3778_v29  ;;  %v6159_v44 = vpop.permute.xlu1 %981  ;;  %1299 = vmatprep.mubr.f32.mxu1 %v1158_v13  ;;  %v6167_v8 = vpop.permute.xlu0 %1019  ;;  %v2241_v13 = vld [vmem:[%s9458_s6 + $0x1b00] sm:$0xff]  ;;  %v929_v63 = vsel %vm359_vm4, %v9562_v60, %v9561_v24 }
 0x2b0   : > { %3781 = vmatprep.subr.bf16.mxu1 %v3780_v17  ;;  %v3786_v17 = vpack.c.bf16 %v5315_v39, %v9563_v34  ;;  %3907 = vmatpush1.bf16.msra.mxu0 %v3906_v21  ;;  %v3910_v18 = vpack.c.bf16 %v2241_v13, %v2209_v57  ;;  %v2305_v39 = vld [vmem:[%s9458_s6 + $0x1d00] sm:$0xff]  ;;  %v938_v62 = vmul.f32 %v929_v63, %v5115_v53 }
 0x2b1   : > { %3909 = vmatprep.subr.bf16.mxu0 %v3908_v31  ;;  %v939_v21 = vmul.f32 %v922_v50, %v5112_v52  ;;  %v3914_v31 = vpack.c.bf16 %v2305_v39, %v2273_v15 }
 0x2b2   : > { %v3792_v57 = vpack.c.bf16 %v940_v37, %v938_v62  ;;  %v996_v62 = vsel %vm376_vm5, %v6045_v32, %v6027_v36 }
 0x2b3   : > { %3783 = vmatpush1.bf16.msra.mxu1 %v3782_v3  ;;  %v6183_v26 = vpop.permute.xlu1 %1017  ;;  %v6191_v29 = vpop.permute.xlu0 %1035  ;;  %v921_v3 = vsel %vm359_vm4, %v9561_v24, %v9562_v60 }
 0x2b4   : > { %3785 = vmatprep.subr.bf16.mxu1 %v3784_v58  ;;  %v3790_v58 = vpack.c.bf16 %v5359_v55, %v5352_v51  ;;  %3911 = vmatpush1.bf16.msra.mxu0 %v3910_v18  ;;  %v937_v13 = vmul.f32 %v921_v3, %v5112_v52  ;;  %v934_v51 = vsel %vm359_vm4, %v5816_v30, %v5790_v25 }
 0x2b5   : > { %3913 = vmatprep.subr.bf16.mxu0 %v3912_v43  ;;  %v925_v55 = vsel %vm359_vm4, %v5868_v54, %v5899_v4  ;;  %v948_v60 = vmul.f32 %v934_v51, %v5115_v53  ;;  %v927_v30 = vsel %vm359_vm4, %v5925_v23, %v5941_v61  ;;  %v947_v54 = vmul.f32 %v5827_v49, %v5112_v52 }
 0x2b6   : > { %v3794_v41 = vpack.c.bf16 %v939_v21, %v937_v13  ;;  %v945_v63 = vmul.f32 %v925_v55, %v5112_v52  ;;  %v935_v4 = vsel %vm359_vm4, %v5941_v61, %v5925_v23  ;;  %v949_v49 = vmul.f32 %v927_v30, %v5112_v52 }
 0x2b7   : > { %3787 = vmatpush1.bf16.msra.mxu1 %v3786_v17  ;;  %v6212_v9 = vpop.permute.xlu1 %1033  ;;  %v6219_v5 = vpop.permute.xlu0 %1023  ;;  %v3800_v34 = vpack.c.bf16 %v948_v60, %v946_v47  ;;  %v950_v18 = vmul.f32 %v935_v4, %v5115_v53  ;;  %v994_v23 = vsel %vm376_vm5, %v5952_v22, %v5933_v33  ;;  %v995_v43 = vsel %vm376_vm5, %v6053_v35, %v6037_v20 }
 0x2b8   : > { %3789 = vmatprep.subr.bf16.mxu1 %v3788_v45  ;;  %3915 = vmatpush1.bf16.msra.mxu0 %v3914_v31  ;;  %v987_v21 = vsel %vm376_vm5, %v6037_v20, %v6053_v35  ;;  %v997_v31 = vsel %vm376_vm5, %v6113_v48, %v6083_v27  ;;  %v988_v20 = vsel %vm376_vm5, %v6027_v36, %v6045_v32 }
 0x2b9   : > { %v989_v55 = vsel %vm376_vm5, %v6083_v27, %v6113_v48  ;;  %v990_v47 = vsel %vm376_vm5, %v6064_v46, %v6121_v42 }
 0x2bb   : > { %3791 = vmatpush1.bf16.msra.mxu1 %v3790_v58  ;;  %v6229_v38 = vpop.permute.xlu1 %1021  ;;  %v6231_v28 = vpop.permute.xlu0 %1039 }
 0x2bc   : > { %3793 = vmatprep.subr.bf16.mxu1 %v3792_v57  ;;  %v998_v57 = vsel %vm376_vm5, %v6121_v42, %v6064_v46  ;;  %v991_v46 = vsel %vm376_vm5, %v6136_v40, %v6159_v44  ;;  %v999_v42 = vsel %vm376_vm5, %v6159_v44, %v6136_v40  ;;  %v1058_v40 = vsel %vm393_vm6, %v6191_v29, %v6167_v8 }
 0x2bf   : > { %3795 = vmatpush1.bf16.msra.mxu1 %v3794_v41  ;;  %v6242_v24 = vpop.permute.xlu1 %1037  ;;  %v6249_v25 = vpop.permute.xlu0 %1027 }
 0x2c0   : > { %3797 = vmatprep.subr.bf16.mxu1 %v3796_v11  ;;  %v3802_v11 = vpack.c.bf16 %v947_v54, %v945_v63 }
 0x2c3   : > { %3799 = vmatpush1.bf16.msra.mxu1 %v3798_v6  ;;  %v6268_v19 = vpop.permute.xlu1 %1025  ;;  %v920_v17 = vpop.permute.xlu0 %919  ;;  %v9564_v6 = vld [vmem:[#allocation3_spill] sm:$0xff] }
 0x2c4   : > { %3801 = vmatprep.subr.bf16.mxu1 %v3800_v34  ;;  %v928_v61 = vsel %vm359_vm4, %v5909_v56, %v920_v17  ;;  %v936_v1 = vsel %vm359_vm4, %v920_v17, %v5909_v56  ;;  %v1002_v50 = vmul.f32 %v993_v59, %v9564_v6  ;;  %v986_v56 = vsel %vm376_vm5, %v5933_v33, %v5952_v22 }
 0x2c5   : > { %v951_v37 = vmul.f32 %v928_v61, %v5112_v52  ;;  %v952_v45 = vmul.f32 %v936_v1, %v5115_v53  ;;  %v1004_v0 = vmul.f32 %v994_v23, %v9564_v6  ;;  %v9565_v53 = vld [vmem:[#allocation2_spill] sm:$0xff]  ;;  %v1006_v33 = vmul.f32 %v995_v43, %v9564_v6 }
 0x2c6   : > { %v1001_v3 = vmul.f32 %v985_v10, %v9565_v53  ;;  %v1003_v58 = vmul.f32 %v986_v56, %v9565_v53  ;;  %v1008_v35 = vmul.f32 %v996_v62, %v9564_v6  ;;  %v1005_v51 = vmul.f32 %v987_v21, %v9565_v53  ;;  %v9566_v10 = vld [vmem:[#allocation5_spill] sm:$0xff] }
 0x2c7   : > { %3803 = vmatpush1.bf16.msra.mxu1 %v3802_v11  ;;  %v6293_v15 = vpop.permute.xlu1 %1041  ;;  %v3806_v7 = vpack.c.bf16 %v951_v37, %v949_v49  ;;  %v6300_v39 = vpop.permute.xlu0 %1043  ;;  %v3804_v52 = vpack.c.bf16 %v952_v45, %v950_v18  ;;  %v3808_v22 = vpack.c.bf16 %v1004_v0, %v1002_v50  ;;  %v1010_v36 = vmul.f32 %v997_v31, %v9564_v6 }
 0x2c8   : > { %v3810_v41 = vpack.c.bf16 %v1003_v58, %v1001_v3  ;;  %v1012_v32 = vmul.f32 %v998_v57, %v9564_v6  ;;  %v3812_v60 = vpack.c.bf16 %v1008_v35, %v1006_v33  ;;  %v1007_v63 = vmul.f32 %v988_v20, %v9565_v53 }
 0x2c9   : > { %3805 = vmatprep.subr.bf16.mxu1 %v3804_v52  ;;  %v1009_v54 = vmul.f32 %v989_v55, %v9565_v53  ;;  %v1011_v4 = vmul.f32 %v990_v47, %v9565_v53  ;;  %v1057_v59 = vsel %vm393_vm6, %v6212_v9, %v6183_v26  ;;  %v1013_v17 = vmul.f32 %v991_v46, %v9565_v53  ;;  %v9567_v52 = vld [vmem:[#allocation4_spill] sm:$0xff]  ;;  %v6444_v46 = vld [vmem:[%s9457_s5 + $0x18] ss:$0 sm:$0xff] }
 0x2ca   : > { %v3814_v48 = vpack.c.bf16 %v1007_v63, %v1005_v51  ;;  %v3816_v34 = vpack.c.bf16 %v1012_v32, %v1010_v36  ;;  %v1014_v23 = vmul.f32 %v999_v42, %v9564_v6  ;;  %v1049_v1 = vsel %vm393_vm6, %v6183_v26, %v6212_v9 }
 0x2cb   : > { %3807 = vmatpush1.bf16.msra.mxu1 %v3806_v7  ;;  %v6321_v13 = vpop.permute.xlu1 %1029  ;;  %v6328_v16 = vpop.permute.xlu0 %1031  ;;  %v3818_v49 = vpack.c.bf16 %v1011_v4, %v1009_v54  ;;  %v1066_v50 = vmul.f32 %v1057_v59, %v9566_v10  ;;  %v1059_v43 = vsel %vm393_vm6, %v6242_v24, %v6229_v38  ;;  %v1068_v26 = vmul.f32 %v1058_v40, %v9566_v10 }
 0x2cc   : > { %3809 = vmatprep.subr.bf16.mxu1 %v3808_v22  ;;  %v1051_v3 = vsel %vm393_vm6, %v6229_v38, %v6242_v24  ;;  %v1070_v62 = vmul.f32 %v1059_v43, %v9566_v10  ;;  %v1061_v21 = vsel %vm393_vm6, %v6293_v15, %v6268_v19  ;;  %v1062_v33 = vsel %vm393_vm6, %v6300_v39, %v6249_v25 }
 0x2cd   : > { %v1052_v38 = vsel %vm393_vm6, %v6219_v5, %v6231_v28  ;;  %v1069_v57 = vmul.f32 %v1051_v3, %v9567_v52  ;;  %v1053_v20 = vsel %vm393_vm6, %v6268_v19, %v6293_v15  ;;  %v1054_v35 = vsel %vm393_vm6, %v6249_v25, %v6300_v39 }
 0x2ce   : > { %v1071_v51 = vmul.f32 %v1052_v38, %v9567_v52  ;;  %v1073_v47 = vmul.f32 %v1053_v20, %v9567_v52  ;;  %v1075_v36 = vmul.f32 %v1054_v35, %v9567_v52 }
 0x2cf   : > { %3811 = vmatpush1.bf16.msra.mxu1 %v3810_v41  ;;  %v6342_v30 = vpop.permute.xlu1 %1045  ;;  %v6346_v27 = vpop.permute.xlu0 %1083  ;;  %v1074_v41 = vmul.f32 %v1061_v21, %v9566_v10  ;;  %v9568_v21 = vmov 0.0  }
 0x2d0   : > { %3813 = vmatprep.subr.bf16.mxu1 %v3812_v60  ;;  %v3830_v15 = vpack.c.bf16 %v1071_v51, %v1069_v57  ;;  %v1055_v60 = vsel %vm393_vm6, %v6321_v13, %v6342_v30  ;;  %v1063_v63 = vsel %vm393_vm6, %v6342_v30, %v6321_v13  ;;  %v3834_v4 = vpack.c.bf16 %v1075_v36, %v1073_v47  ;;  %v1414_v47 = vld [vmem:[%s9458_s6 + $0x128] sm:$0xff] }
 0x2d3   : > { %3815 = vmatpush1.bf16.msra.mxu1 %v3814_v48  ;;  %v1082_v11 = vpop.permute.xlu1 %1081  ;;  %v984_v18 = vpop.permute.xlu0 %983 }
 0x2d4   : > { %3817 = vmatprep.subr.bf16.mxu1 %v3816_v34  ;;  %v992_v44 = vsel %vm376_vm5, %v6146_v12, %v984_v18  ;;  %v1000_v61 = vsel %vm376_vm5, %v984_v18, %v6146_v12  ;;  %v1050_v12 = vsel %vm393_vm6, %v6167_v8, %v6191_v29  ;;  %v3824_v8 = vpack.c.bf16 %v1068_v26, %v1066_v50 }
 0x2d5   : > { %v1015_v37 = vmul.f32 %v992_v44, %v9565_v53  ;;  %v1016_v45 = vmul.f32 %v1000_v61, %v9564_v6  ;;  %v1065_v53 = vmul.f32 %v1049_v1, %v9567_v52  ;;  %v1060_v6 = vsel %vm393_vm6, %v6231_v28, %v6219_v5 }
 0x2d6   : > { %v1067_v29 = vmul.f32 %v1050_v12, %v9567_v52  ;;  %v1072_v24 = vmul.f32 %v1060_v6, %v9566_v10  ;;  %v1076_v5 = vmul.f32 %v1062_v33, %v9566_v10 }
 0x2d7   : > { %3819 = vmatpush1.bf16.msra.mxu1 %v3818_v49  ;;  %v1098_v56 = vpop.permute.xlu1 %1097  ;;  %v3822_v9 = vpack.c.bf16 %v1015_v37, %v1013_v17  ;;  %v1100_v0 = vpop.permute.xlu0 %1099  ;;  %v3820_v7 = vpack.c.bf16 %v1016_v45, %v1014_v23  ;;  %v1077_v49 = vmul.f32 %v1055_v60, %v9567_v52  ;;  %v1078_v17 = vmul.f32 %v1063_v63, %v9566_v10  ;;  %v1413_v63 = vld [vmem:[%s9458_s6 + $0x120] sm:$0xff] }
 0x2d8   : > { %v3826_v31 = vpack.c.bf16 %v1067_v29, %v1065_v53  ;;  %v3828_v28 = vpack.c.bf16 %v1072_v24, %v1070_v62  ;;  %v1121_v32 = vsel %vm410_vm7, %v1098_v56, %v1082_v11  ;;  %v1122_v25 = vsel %vm410_vm7, %v1100_v0, %v6346_v27 }
 0x2d9   : > { %3821 = vmatprep.subr.bf16.mxu1 %v3820_v7  ;;  %v3832_v39 = vpack.c.bf16 %v1076_v5, %v1074_v41  ;;  %v1113_v48 = vsel %vm410_vm7, %v1082_v11, %v1098_v56  ;;  %v1130_v42 = vmul.f32 %v6444_v46, %v1121_v32  ;;  %v1114_v59 = vsel %vm410_vm7, %v6346_v27, %v1100_v0 }
 0x2da   : > { %v1132_v13 = vmul.f32 %v6444_v46, %v1122_v25 }
 0x2db   : > { %3823 = vmatpush1.bf16.msra.mxu1 %v3822_v9  ;;  %v1086_v22 = vpop.permute.xlu1 %1085  ;;  %v1088_v58 = vpop.permute.xlu0 %1087 }
 0x2dc   : > { %3825 = vmatprep.subr.bf16.mxu1 %v3824_v8  ;;  %v3840_v43 = vpack.c.bf16 %v1132_v13, %v1130_v42  ;;  %v1510_v13 = vld [vmem:[%s9458_s6 + $0x428] sm:$0xff] }
 0x2df   : > { %3827 = vmatpush1.bf16.msra.mxu1 %v3826_v31  ;;  %v1102_v55 = vpop.permute.xlu1 %1101  ;;  %v1104_v19 = vpop.permute.xlu0 %1103 }
 0x2e0   : > { %3829 = vmatprep.subr.bf16.mxu1 %v3828_v28  ;;  %v1123_v27 = vsel %vm410_vm7, %v1102_v55, %v1086_v22  ;;  %v1124_v40 = vsel %vm410_vm7, %v1104_v19, %v1088_v58  ;;  %v1116_v12 = vsel %vm410_vm7, %v1088_v58, %v1104_v19 }
 0x2e1   : > { %v1134_v56 = vmul.f32 %v6444_v46, %v1123_v27  ;;  %v1136_v26 = vmul.f32 %v6444_v46, %v1124_v40  ;;  %v1606_v27 = vld [vmem:[%s9458_s6 + $0x728] sm:$0xff] }
 0x2e3   : > { %3831 = vmatpush1.bf16.msra.mxu1 %v3830_v15  ;;  %v1090_v54 = vpop.permute.xlu1 %1089  ;;  %v1048_v34 = vpop.permute.xlu0 %1047  ;;  %v3844_v29 = vpack.c.bf16 %v1136_v26, %v1134_v56  ;;  %v1702_v56 = vld [vmem:[%s9458_s6 + $0xa28] sm:$0xff] }
 0x2e4   : > { %3833 = vmatprep.subr.bf16.mxu1 %v3832_v39  ;;  %v1056_v30 = vsel %vm393_vm6, %v6328_v16, %v1048_v34  ;;  %v1064_v11 = vsel %vm393_vm6, %v1048_v34, %v6328_v16  ;;  %v4909_v16 = vld [vmem:[%s9457_s5 + $0x10] ss:$0 sm:$0xff]  ;;  %v1445_v34 = vld [vmem:[%s9458_s6 + $0x220] sm:$0xff] }
 0x2e5   : > { %v1079_v18 = vmul.f32 %v1056_v30, %v9567_v52  ;;  %v1080_v23 = vmul.f32 %v1064_v11, %v9566_v10  ;;  %v1129_v61 = vmul.f32 %v4909_v16, %v1113_v48  ;;  %v1131_v1 = vmul.f32 %v4909_v16, %v1114_v59  ;;  %v1147_v48 = vld [vmem:[%s9455_s3 + $0x10] sm:$0x7]  ;;  %v1477_v59 = vld [vmem:[%s9458_s6 + $0x320] sm:$0xff]  ;;  %v1542_v30 = vld [vmem:[%s9458_s6 + $0x528] sm:$0xff] }
 0x2e6   : > { %v1115_v10 = vsel %vm410_vm7, %v1086_v22, %v1102_v55  ;;  %v1135_v53 = vmul.f32 %v4909_v16, %v1116_v12  ;;  %v1382_v55 = vld [vmem:[%s9458_s6 + $0x28] sm:$0xff]  ;;  %v3990_v11 = vpack.c.bf16 %v1477_v59, %v1445_v34 }
 0x2e7   : > { %3835 = vmatpush1.bf16.msra.mxu1 %v3834_v4  ;;  %v1106_v44 = vpop.permute.xlu1 %1105  ;;  %v3838_v50 = vpack.c.bf16 %v1079_v18, %v1077_v49  ;;  %v1092_v37 = vpop.permute.xlu0 %1091  ;;  %v3836_v45 = vpack.c.bf16 %v1080_v23, %v1078_v17  ;;  %v3842_v0 = vpack.c.bf16 %v1131_v1, %v1129_v61  ;;  %v1133_v52 = vmul.f32 %v4909_v16, %v1115_v10  ;;  %v1478_v4 = vld [vmem:[%s9458_s6 + $0x328] sm:$0xff]  ;;  %v1509_v17 = vld [vmem:[%s9458_s6 + $0x420] sm:$0xff] }
 0x2e8   : > { %v1125_v6 = vsel %vm410_vm7, %v1106_v44, %v1090_v54  ;;  %v1117_v33 = vsel %vm410_vm7, %v1090_v54, %v1106_v44  ;;  %v3984_v60 = vpack.c.bf16 %v1414_v47, %v1382_v55  ;;  %v1446_v54 = vld [vmem:[%s9458_s6 + $0x228] sm:$0xff]  ;;  %v3992_v49 = vpack.c.bf16 %v1542_v30, %v1510_v13  ;;  %v1541_v18 = vld [vmem:[%s9458_s6 + $0x520] sm:$0xff] }
 0x2e9   : > { %3837 = vmatprep.subr.bf16.mxu1 %v3836_v45  ;;  %v1138_v22 = vmul.f32 %v6444_v46, %v1125_v6  ;;  %v3846_v58 = vpack.c.bf16 %v1135_v53, %v1133_v52  ;;  %v1137_v20 = vmul.f32 %v4909_v16, %v1117_v33  ;;  %v3988_v42 = vpack.c.bf16 %v1478_v4, %v1446_v54  ;;  %v1574_v23 = vld [vmem:[%s9458_s6 + $0x628] sm:$0xff]  ;;  %v1605_v61 = vld [vmem:[%s9458_s6 + $0x720] sm:$0xff] }
 0x2ea   : > { %v3994_v40 = vpack.c.bf16 %v1541_v18, %v1509_v17  ;;  %v3996_v44 = vpack.c.bf16 %v1606_v27, %v1574_v23  ;;  %v1638_v1 = vld [vmem:[%s9458_s6 + $0x828] sm:$0xff]  ;;  %v1669_v10 = vld [vmem:[%s9458_s6 + $0x920] sm:$0xff] }
 0x2eb   : > { %3839 = vmatpush1.bf16.msra.mxu1 %v3838_v50  ;;  %v1094_v9 = vpop.permute.xlu1 %1093  ;;  %v1108_v7 = vpop.permute.xlu0 %1107  ;;  %v1670_v50 = vld [vmem:[%s9458_s6 + $0x928] sm:$0xff]  ;;  %v1957_v55 = vld [vmem:[%s9458_s6 + $0x1220] sm:$0xff] }
 0x2ec   : > { %3841 = vmatprep.subr.bf16.mxu1 %v3840_v43  ;;  %v1126_v3 = vsel %vm410_vm7, %v1108_v7, %v1092_v37  ;;  %v1118_v62 = vsel %vm410_vm7, %v1092_v37, %v1108_v7  ;;  %v4000_v45 = vpack.c.bf16 %v1670_v50, %v1638_v1  ;;  %v1637_v43 = vld [vmem:[%s9458_s6 + $0x820] sm:$0xff]  ;;  %v1734_v12 = vld [vmem:[%s9458_s6 + $0xb28] sm:$0xff] }
 0x2ed   : > { %v1140_v8 = vmul.f32 %v6444_v46, %v1126_v3  ;;  %v1139_v31 = vmul.f32 %v4909_v16, %v1118_v62  ;;  %v4002_v26 = vpack.c.bf16 %v1669_v10, %v1637_v43  ;;  %v1733_v7 = vld [vmem:[%s9458_s6 + $0xb20] sm:$0xff]  ;;  %v1766_v52 = vld [vmem:[%s9458_s6 + $0xc28] sm:$0xff] }
 0x2ee   : > { %1300 = vmatmul.mubr.f32.vlgmr.msra.gmra.mrb[0].mxu1 %v6126_v2  ;;  %v1798_v53 = vld [vmem:[%s9458_s6 + $0xd28] sm:$0xff]  ;;  %v1765_v62 = vld [vmem:[%s9458_s6 + $0xc20] sm:$0xff] }
 0x2ef   : > { %3843 = vmatpush1.bf16.msra.mxu1 %v3842_v0  ;;  %1370 = vmatprep.mubr.f32.mxu1 %v9568_v21  ;;  %v1110_v38 = vpop.permute.xlu1 %1109  ;;  %v1096_v24 = vpop.permute.xlu0 %1095  ;;  %v3848_v57 = vpack.c.bf16 %v1140_v8, %v1138_v22  ;;  %v3850_v5 = vpack.c.bf16 %v1139_v31, %v1137_v20  ;;  %v1701_v0 = vld [vmem:[%s9458_s6 + $0xa20] sm:$0xff]  ;;  %v4008_v3 = vpack.c.bf16 %v1798_v53, %v1766_v52  ;;  %v1862_v21 = vld [vmem:[%s9458_s6 + $0xf28] sm:$0xff] }
 0x2f0   : > { %3845 = vmatprep.subr.bf16.mxu1 %v3844_v29  ;;  %v1119_v35 = vsel %vm410_vm7, %v1094_v9, %v1110_v38  ;;  %v1127_v2 = vsel %vm410_vm7, %v1110_v38, %v1094_v9  ;;  %v4004_v9 = vpack.c.bf16 %v1734_v12, %v1702_v56  ;;  %v4006_v6 = vpack.c.bf16 %v1733_v7, %v1701_v0  ;;  %v1797_v8 = vld [vmem:[%s9458_s6 + $0xd20] sm:$0xff]  ;;  %v1830_v29 = vld [vmem:[%s9458_s6 + $0xe28] sm:$0xff] }
 0x2f1   : > { %v1141_v36 = vmul.f32 %v4909_v16, %v1119_v35  ;;  %v1142_v19 = vmul.f32 %v6444_v46, %v1127_v2  ;;  %v4010_v33 = vpack.c.bf16 %v1797_v8, %v1765_v62  ;;  %v4012_v22 = vpack.c.bf16 %v1862_v21, %v1830_v29  ;;  %v1829_v38 = vld [vmem:[%s9458_s6 + $0xe20] sm:$0xff]  ;;  %v1926_v31 = vld [vmem:[%s9458_s6 + $0x1128] sm:$0xff]  ;;  %v1412_v62 = vld [vmem:[%s9458_s6 + $0x118] sm:$0xff] }
 0x2f2   : > { %v1893_v35 = vld [vmem:[%s9458_s6 + $0x1020] sm:$0xff]  ;;  %v2370_v43 = vld [vmem:[%s9458_s6 + $0x1f08] sm:$0xff] }
 0x2f3   : > { %3847 = vmatpush1.bf16.msra.mxu1 %v3846_v58  ;;  %v1112_v41 = vpop.permute.xlu0 %1111  ;;  %v1894_v58 = vld [vmem:[%s9458_s6 + $0x1028] sm:$0xff]  ;;  %v1925_v2 = vld [vmem:[%s9458_s6 + $0x1120] sm:$0xff] }
 0x2f4   : > { %3849 = vmatprep.subr.bf16.mxu1 %v3848_v57  ;;  %v1120_v28 = vsel %vm410_vm7, %v1096_v24, %v1112_v41  ;;  %v1128_v51 = vsel %vm410_vm7, %v1112_v41, %v1096_v24  ;;  %v1861_v24 = vld [vmem:[%s9458_s6 + $0xf20] sm:$0xff]  ;;  %v4016_v20 = vpack.c.bf16 %v1926_v31, %v1894_v58  ;;  %v1958_v41 = vld [vmem:[%s9458_s6 + $0x1228] sm:$0xff] }
 0x2f5   : > { %v1143_v15 = vmul.f32 %v4909_v16, %v1120_v28  ;;  %v1144_v32 = vmul.f32 %v6444_v46, %v1128_v51  ;;  %v3986_v46 = vpack.c.bf16 %v1413_v63, %v1381_v14  ;;  %v1573_v16 = vld [vmem:[%s9458_s6 + $0x620] sm:$0xff]  ;;  %v4014_v57 = vpack.c.bf16 %v1861_v24, %v1829_v38  ;;  %v2118_v14 = vld [vmem:[%s9458_s6 + $0x1728] sm:$0xff]  ;;  %v1411_v38 = vld [vmem:[%s9458_s6 + $0x110] sm:$0xff] }
 0x2f6   : > { %v3998_v37 = vpack.c.bf16 %v1605_v61, %v1573_v16  ;;  %v4018_v28 = vpack.c.bf16 %v1925_v2, %v1893_v35  ;;  %v1989_v47 = vld [vmem:[%s9458_s6 + $0x1320] sm:$0xff]  ;;  %v2342_v10 = vld [vmem:[%s9458_s6 + $0x1e28] sm:$0xff]  ;;  %v1476_v2 = vld [vmem:[%s9458_s6 + $0x318] sm:$0xff] }
 0x2f7   : > { %3851 = vmatpush1.bf16.msra.mxu1 %v3850_v5  ;;  %v3854_v25 = vpack.c.bf16 %v1143_v15, %v1141_v36  ;;  %v3852_v39 = vpack.c.bf16 %v1144_v32, %v1142_v19  ;;  %v1990_v5 = vld [vmem:[%s9458_s6 + $0x1328] sm:$0xff]  ;;  %v4022_v15 = vpack.c.bf16 %v1989_v47, %v1957_v55  ;;  %v2085_v4 = vld [vmem:[%s9458_s6 + $0x1620] sm:$0xff]  ;;  %v1443_v47 = vld [vmem:[%s9458_s6 + $0x210] sm:$0xff] }
 0x2f8   : > { %v4020_v51 = vpack.c.bf16 %v1990_v5, %v1958_v41  ;;  %v2022_v36 = vld [vmem:[%s9458_s6 + $0x1428] sm:$0xff]  ;;  %v2149_v13 = vld [vmem:[%s9458_s6 + $0x1820] sm:$0xff] }
 0x2f9   : > { %3853 = vmatprep.subr.bf16.mxu1 %v3852_v39  ;;  %v2054_v19 = vld [vmem:[%s9458_s6 + $0x1528] sm:$0xff]  ;;  %v2053_v39 = vld [vmem:[%s9458_s6 + $0x1520] sm:$0xff] }
 0x2fa   : > { %v4024_v32 = vpack.c.bf16 %v2054_v19, %v2022_v36  ;;  %v2181_v30 = vld [vmem:[%s9458_s6 + $0x1920] sm:$0xff]  ;;  %v2374_v12 = vld [vmem:[%s9458_s6 + $0x1f28] sm:$0xff]  ;;  %v1475_v36 = vld [vmem:[%s9458_s6 + $0x310] sm:$0xff] }
 0x2fb   : > { %3855 = vmatpush1.bf16.msra.mxu1 %v3854_v25  ;;  %v2021_v25 = vld [vmem:[%s9458_s6 + $0x1420] sm:$0xff]  ;;  %v4034_v17 = vpack.c.bf16 %v2181_v30, %v2149_v13  ;;  %v4044_v0 = vpack.c.bf16 %v2374_v12, %v2342_v10  ;;  %v1386_v8 = vld [vmem:[%s9458_s6 + $0x48] sm:$0xff] }
 0x2fc   : > { %3985 = vmatprep.subr.bf16.mxu1 %v3984_v60  ;;  %v2086_v60 = vld [vmem:[%s9458_s6 + $0x1628] sm:$0xff]  ;;  %v4026_v63 = vpack.c.bf16 %v2053_v39, %v2021_v25  ;;  %v2213_v23 = vld [vmem:[%s9458_s6 + $0x1a20] sm:$0xff]  ;;  %v1508_v25 = vld [vmem:[%s9458_s6 + $0x418] sm:$0xff] }
 0x2fd   : > { %v4028_v54 = vpack.c.bf16 %v2118_v14, %v2086_v60  ;;  %v2245_v27 = vld [vmem:[%s9458_s6 + $0x1b20] sm:$0xff]  ;;  %v1418_v21 = vld [vmem:[%s9458_s6 + $0x148] sm:$0xff]  ;;  %v1540_v14 = vld [vmem:[%s9458_s6 + $0x518] sm:$0xff] }
 0x2fe   : > { %3691 = vmatmul.mubr.msk.f32.vlgmr.msra.gmra.mrb[0].mxu1 %vm1161_vm9, %v1147_v48  ;;  %v2117_v48 = vld [vmem:[%s9458_s6 + $0x1720] sm:$0xff]  ;;  %v4038_v16 = vpack.c.bf16 %v2245_v27, %v2213_v23  ;;  %v1450_v41 = vld [vmem:[%s9458_s6 + $0x248] sm:$0xff] }
 0x2ff   : > { %3987 = vmatpush1.bf16.msra.mxu1 %v3986_v46  ;;  %v2150_v46 = vld [vmem:[%s9458_s6 + $0x1828] sm:$0xff]  ;;  %v4030_v34 = vpack.c.bf16 %v2117_v48, %v2085_v4  ;;  %v2277_v1 = vld [vmem:[%s9458_s6 + $0x1c20] sm:$0xff]  ;;  %v3926_v4 = vpack.c.bf16 %v1475_v36, %v1443_v47 }
 0x300   : > { %3989 = vmatprep.subr.bf16.mxu1 %v3988_v42  ;;  %v2182_v42 = vld [vmem:[%s9458_s6 + $0x1928] sm:$0xff]  ;;  %v2309_v50 = vld [vmem:[%s9458_s6 + $0x1d20] sm:$0xff] }
 0x301   : > { %v4032_v59 = vpack.c.bf16 %v2182_v42, %v2150_v46  ;;  %v2341_v52 = vld [vmem:[%s9458_s6 + $0x1e20] sm:$0xff]  ;;  %v1482_v5 = vld [vmem:[%s9458_s6 + $0x348] sm:$0xff]  ;;  %v1507_v46 = vld [vmem:[%s9458_s6 + $0x410] sm:$0xff] }
 0x302   : > { %v2373_v53 = vld [vmem:[%s9458_s6 + $0x1f20] sm:$0xff]  ;;  %v4116_v60 = vpack.c.bf16 %v1482_v5, %v1450_v41  ;;  %v1539_v42 = vld [vmem:[%s9458_s6 + $0x510] sm:$0xff]  ;;  %v1674_v10 = vld [vmem:[%s9458_s6 + $0x948] sm:$0xff] }
 0x303   : > { %3991 = vmatpush1.bf16.msra.mxu1 %v3990_v11  ;;  %v2214_v11 = vld [vmem:[%s9458_s6 + $0x1a28] sm:$0xff]  ;;  %v1385_v24 = vld [vmem:[%s9458_s6 + $0x40] sm:$0xff]  ;;  %v3930_v23 = vpack.c.bf16 %v1539_v42, %v1507_v46 }
 0x304   : > { %3993 = vmatprep.subr.bf16.mxu1 %v3992_v49  ;;  %v2246_v49 = vld [vmem:[%s9458_s6 + $0x1b28] sm:$0xff]  ;;  %v1417_v58 = vld [vmem:[%s9458_s6 + $0x140] sm:$0xff] }
 0x305   : > { %v4036_v18 = vpack.c.bf16 %v2246_v49, %v2214_v11  ;;  %v4114_v55 = vpack.c.bf16 %v1417_v58, %v1385_v24  ;;  %v1513_v13 = vld [vmem:[%s9458_s6 + $0x440] sm:$0xff]  ;;  %v1572_v11 = vld [vmem:[%s9458_s6 + $0x618] sm:$0xff] }
 0x306   : > { %v1545_v30 = vld [vmem:[%s9458_s6 + $0x540] sm:$0xff]  ;;  %v1604_v49 = vld [vmem:[%s9458_s6 + $0x718] sm:$0xff] }
 0x307   : > { %3995 = vmatpush1.bf16.msra.mxu1 %v3994_v40  ;;  %v2278_v40 = vld [vmem:[%s9458_s6 + $0x1c28] sm:$0xff]  ;;  %v4122_v27 = vpack.c.bf16 %v1545_v30, %v1513_v13  ;;  %v1705_v58 = vld [vmem:[%s9458_s6 + $0xa40] sm:$0xff]  ;;  %v1892_v13 = vld [vmem:[%s9458_s6 + $0x1018] sm:$0xff] }
 0x308   : > { %3997 = vmatprep.subr.bf16.mxu1 %v3996_v44  ;;  %v2310_v44 = vld [vmem:[%s9458_s6 + $0x1d28] sm:$0xff]  ;;  %v1924_v30 = vld [vmem:[%s9458_s6 + $0x1118] sm:$0xff] }
 0x309   : > { %v4040_v61 = vpack.c.bf16 %v2310_v44, %v2278_v40  ;;  %v1571_v40 = vld [vmem:[%s9458_s6 + $0x610] sm:$0xff] }
 0x30a   : > { %v1603_v44 = vld [vmem:[%s9458_s6 + $0x710] sm:$0xff] }
 0x30b   : > { %3999 = vmatpush1.bf16.msra.mxu1 %v3998_v37  ;;  %v4042_v37 = vpack.c.bf16 %v2309_v50, %v2277_v1  ;;  %v1577_v1 = vld [vmem:[%s9458_s6 + $0x640] sm:$0xff] }
 0x30c   : > { %4001 = vmatprep.subr.bf16.mxu1 %v4000_v45  ;;  %v2338_v45 = vld [vmem:[%s9458_s6 + $0x1e08] sm:$0xff]  ;;  %v1609_v50 = vld [vmem:[%s9458_s6 + $0x740] sm:$0xff] }
 0x30d   : > { %v3916_v56 = vpack.c.bf16 %v2370_v43, %v2338_v45  ;;  %v1668_v45 = vld [vmem:[%s9458_s6 + $0x918] sm:$0xff]  ;;  %v1642_v43 = vld [vmem:[%s9458_s6 + $0x848] sm:$0xff]  ;;  %v4126_v12 = vpack.c.bf16 %v1609_v50, %v1577_v1 }
 0x30e   : > { %v1956_v1 = vld [vmem:[%s9458_s6 + $0x1218] sm:$0xff] }
 0x30f   : > { %4003 = vmatpush1.bf16.msra.mxu1 %v4002_v26  ;;  %v2337_v26 = vld [vmem:[%s9458_s6 + $0x1e00] sm:$0xff]  ;;  %3917 = vmatprep.subr.bf16.mxu0 %v3916_v56  ;;  %v3934_v56 = vpack.c.bf16 %v1603_v44, %v1571_v40  ;;  %v3952_v40 = vpack.c.bf16 %v1924_v30, %v1892_v13  ;;  %v1988_v50 = vld [vmem:[%s9458_s6 + $0x1318] sm:$0xff]  ;;  %v2218_v13 = vld [vmem:[%s9458_s6 + $0x1a48] sm:$0xff] }
 0x310   : > { %4005 = vmatprep.subr.bf16.mxu1 %v4004_v9  ;;  %v2369_v9 = vld [vmem:[%s9458_s6 + $0x1f00] sm:$0xff]  ;;  %v2250_v30 = vld [vmem:[%s9458_s6 + $0x1b48] sm:$0xff] }
 0x311   : > { %v3918_v7 = vpack.c.bf16 %v2369_v9, %v2337_v26  ;;  %v1635_v26 = vld [vmem:[%s9458_s6 + $0x810] sm:$0xff] }
 0x312   : > { %v1667_v9 = vld [vmem:[%s9458_s6 + $0x910] sm:$0xff] }
 0x313   : > { %4007 = vmatpush1.bf16.msra.mxu1 %v4006_v6  ;;  %v4046_v6 = vpack.c.bf16 %v2373_v53, %v2341_v52  ;;  %3919 = vmatpush1.bf16.msra.mxu0 %v3918_v7  ;;  %v4128_v7 = vpack.c.bf16 %v1674_v10, %v1642_v43  ;;  %v1641_v52 = vld [vmem:[%s9458_s6 + $0x840] sm:$0xff] }
 0x314   : > { %4009 = vmatprep.subr.bf16.mxu1 %v4008_v3  ;;  %v1380_v3 = vld [vmem:[%s9458_s6 + $0x18] sm:$0xff]  ;;  %v1673_v53 = vld [vmem:[%s9458_s6 + $0x940] sm:$0xff] }
 0x315   : > { %v3920_v29 = vpack.c.bf16 %v1412_v62, %v1380_v3  ;;  %v1732_v3 = vld [vmem:[%s9458_s6 + $0xb18] sm:$0xff]  ;;  %v1706_v62 = vld [vmem:[%s9458_s6 + $0xa48] sm:$0xff] }
 0x317   : > { %4011 = vmatpush1.bf16.msra.mxu1 %v4010_v33  ;;  %v4112_v33 = vpack.c.bf16 %v1418_v21, %v1386_v8  ;;  %3921 = vmatprep.subr.bf16.mxu0 %v3920_v29  ;;  %v1738_v8 = vld [vmem:[%s9458_s6 + $0xb48] sm:$0xff]  ;;  %v3938_v29 = vpack.c.bf16 %v1667_v9, %v1635_v26  ;;  %v4130_v21 = vpack.c.bf16 %v1673_v53, %v1641_v52  ;;  %v2020_v52 = vld [vmem:[%s9458_s6 + $0x1418] sm:$0xff] }
 0x318   : > { %4013 = vmatprep.subr.bf16.mxu1 %v4012_v22  ;;  %v1379_v22 = vld [vmem:[%s9458_s6 + $0x10] sm:$0xff]  ;;  %v4132_v24 = vpack.c.bf16 %v1738_v8, %v1706_v62  ;;  %v3956_v26 = vpack.c.bf16 %v1988_v50, %v1956_v1  ;;  %v2052_v53 = vld [vmem:[%s9458_s6 + $0x1518] sm:$0xff]  ;;  %v2282_v1 = vld [vmem:[%s9458_s6 + $0x1c48] sm:$0xff] }
 0x319   : > { %v2314_v50 = vld [vmem:[%s9458_s6 + $0x1d48] sm:$0xff] }
 0x31b   : > { %4015 = vmatpush1.bf16.msra.mxu1 %v4014_v57  ;;  %v1444_v57 = vld [vmem:[%s9458_s6 + $0x218] sm:$0xff] }
 0x31c   : > { %4017 = vmatprep.subr.bf16.mxu1 %v4016_v20  ;;  %v1152_v20 = vpop.permute.xlu1 %1151  ;;  %v3924_v39 = vpack.c.bf16 %v1476_v2, %v1444_v57  ;;  %v1764_v57 = vld [vmem:[%s9458_s6 + $0xc18] sm:$0xff]  ;;  %v1802_v2 = vld [vmem:[%s9458_s6 + $0xd48] sm:$0xff] }
 0x31f   : > { %4019 = vmatpush1.bf16.msra.mxu1 %v4018_v28 }
 0x320   : > { %4021 = vmatprep.subr.bf16.mxu1 %v4020_v51  ;;  %v3922_v51 = vpack.c.bf16 %v1411_v38, %v1379_v22  ;;  %v1731_v22 = vld [vmem:[%s9458_s6 + $0xb10] sm:$0xff] }
 0x323   : > { %4023 = vmatpush1.bf16.msra.mxu1 %v4022_v15  ;;  %v1449_v15 = vld [vmem:[%s9458_s6 + $0x240] sm:$0xff] }
 0x324   : > { %4025 = vmatprep.subr.bf16.mxu1 %v4024_v32  ;;  %v1481_v32 = vld [vmem:[%s9458_s6 + $0x340] sm:$0xff] }
 0x325   : > { %v4118_v48 = vpack.c.bf16 %v1481_v32, %v1449_v15  ;;  %v1769_v15 = vld [vmem:[%s9458_s6 + $0xc40] sm:$0xff] }
 0x326   : > { %v1801_v32 = vld [vmem:[%s9458_s6 + $0xd40] sm:$0xff] }
 0x327   : > { %4027 = vmatpush1.bf16.msra.mxu1 %v4026_v63  ;;  %v1514_v63 = vld [vmem:[%s9458_s6 + $0x448] sm:$0xff] }
 0x328   : > { %4029 = vmatprep.subr.bf16.mxu1 %v4028_v54  ;;  %v1546_v54 = vld [vmem:[%s9458_s6 + $0x548] sm:$0xff] }
 0x32b   : > { %4031 = vmatpush1.bf16.msra.mxu1 %v4030_v34  ;;  %v3928_v34 = vpack.c.bf16 %v1540_v14, %v1508_v25  ;;  %v1828_v25 = vld [vmem:[%s9458_s6 + $0xe18] sm:$0xff]  ;;  %v1866_v14 = vld [vmem:[%s9458_s6 + $0xf48] sm:$0xff] }
 0x32c   : > { %4033 = vmatprep.subr.bf16.mxu1 %v4032_v59  ;;  %v4120_v59 = vpack.c.bf16 %v1546_v54, %v1514_v63  ;;  %v4138_v54 = vpack.c.bf16 %v1801_v32, %v1769_v15  ;;  %v2148_v15 = vld [vmem:[%s9458_s6 + $0x1818] sm:$0xff] }
 0x32d   : > { %v2180_v32 = vld [vmem:[%s9458_s6 + $0x1918] sm:$0xff] }
 0x32f   : > { %4035 = vmatpush1.bf16.msra.mxu1 %v4034_v17  ;;  %v1578_v17 = vld [vmem:[%s9458_s6 + $0x648] sm:$0xff] }
 0x330   : > { %4037 = vmatprep.subr.bf16.mxu1 %v4036_v18  ;;  %v1610_v18 = vld [vmem:[%s9458_s6 + $0x748] sm:$0xff] }
 0x333   : > { %4039 = vmatpush1.bf16.msra.mxu1 %v4038_v16  ;;  %v3932_v16 = vpack.c.bf16 %v1604_v49, %v1572_v11  ;;  %v1898_v11 = vld [vmem:[%s9458_s6 + $0x1048] sm:$0xff] }
 0x334   : > { %4041 = vmatprep.subr.bf16.mxu1 %v4040_v61  ;;  %v4124_v61 = vpack.c.bf16 %v1610_v18, %v1578_v17  ;;  %v1930_v49 = vld [vmem:[%s9458_s6 + $0x1148] sm:$0xff] }
 0x335   : > { %v4144_v44 = vpack.c.bf16 %v1930_v49, %v1898_v11 }
 0x337   : > { %4043 = vmatpush1.bf16.msra.mxu1 %v4042_v37  ;;  %v1636_v37 = vld [vmem:[%s9458_s6 + $0x818] sm:$0xff] }
 0x338   : > { %4045 = vmatprep.subr.bf16.mxu1 %v4044_v0  ;;  %v3936_v0 = vpack.c.bf16 %v1668_v45, %v1636_v37  ;;  %v1962_v37 = vld [vmem:[%s9458_s6 + $0x1248] sm:$0xff] }
 0x339   : > { %v1994_v45 = vld [vmem:[%s9458_s6 + $0x1348] sm:$0xff] }
 0x33a   : > { %v4148_v9 = vpack.c.bf16 %v1994_v45, %v1962_v37 }
 0x33b   : > { %4047 = vmatpush1.bf16.msra.mxu1 %v4046_v6  ;;  %v1700_v6 = vld [vmem:[%s9458_s6 + $0xa18] sm:$0xff] }
 0x33c   : > { %4113 = vmatprep.subr.bf16.mxu1 %v4112_v33  ;;  %v1699_v33 = vld [vmem:[%s9458_s6 + $0xa10] sm:$0xff]  ;;  %v3940_v38 = vpack.c.bf16 %v1732_v3, %v1700_v6  ;;  %v2026_v6 = vld [vmem:[%s9458_s6 + $0x1448] sm:$0xff] }
 0x33d   : > { %v3942_v41 = vpack.c.bf16 %v1731_v22, %v1699_v33  ;;  %v2058_v3 = vld [vmem:[%s9458_s6 + $0x1548] sm:$0xff]  ;;  %v3960_v33 = vpack.c.bf16 %v2052_v53, %v2020_v52 }
 0x33e   : > { %v4152_v22 = vpack.c.bf16 %v2058_v3, %v2026_v6  ;;  %v2346_v52 = vld [vmem:[%s9458_s6 + $0x1e48] sm:$0xff] }
 0x33f   : > { %v2378_v53 = vld [vmem:[%s9458_s6 + $0x1f48] sm:$0xff] }
 0x3d1   : > { %v1372_v31 = vpop.f32.mrb[0].mxu1 }
 0x3d2   : > { %v1374_v35 = vpop.f32.mrb[1].mxu1  ;;  %v6747_v19 = vadd.f32 %v1372_v31, %v1152_v20  ;;  %v1737_v31 = vld [vmem:[%s9458_s6 + $0xb40] sm:$0xff] }
 0x3d3   : > { %v6739_v28 = vadd.f32 %v1374_v35, %v1152_v20  ;;  %v1796_v20 = vld [vmem:[%s9458_s6 + $0xd18] sm:$0xff]  ;;  %v1770_v35 = vld [vmem:[%s9458_s6 + $0xc48] sm:$0xff]  ;;  %v4134_v5 = vpack.c.bf16 %v1737_v31, %v1705_v58 }
 0x3d4   : > { %v3944_v47 = vpack.c.bf16 %v1796_v20, %v1764_v57  ;;  %v4136_v36 = vpack.c.bf16 %v1802_v2, %v1770_v35  ;;  %v2084_v58 = vld [vmem:[%s9458_s6 + $0x1618] sm:$0xff]  ;;  %v2090_v57 = vld [vmem:[%s9458_s6 + $0x1648] sm:$0xff] }
 0x3d5   : > { %2465 = vmatprep.mubr.f32.mxu0 %v6739_v28  ;;  %2607 = vmatprep.mubr.f32.mxu1 %v6739_v28  ;;  %v2116_v31 = vld [vmem:[%s9458_s6 + $0x1718] sm:$0xff]  ;;  %v2122_v20 = vld [vmem:[%s9458_s6 + $0x1748] sm:$0xff] }
 0x3d6   : > { %2466 = vmatmul.mubr.f32.vlgmr.msra.gmra.mrb[16].mxu0 %v6747_v19  ;;  %2608 = vmatmul.mubr.f32.vlgmr.msra.gmra.mrb[2].mxu1 %v6747_v19 }
 0x3d7   : > { %3923 = vmatpush1.bf16.msra.mxu0 %v3922_v51  ;;  %4115 = vmatpush1.bf16.msra.mxu1 %v4114_v55  ;;  %v1763_v51 = vld [vmem:[%s9458_s6 + $0xc10] sm:$0xff] }
 0x3d8   : > { %2536 = vmatprep.mubr.f32.mxu0 %v6739_v28  ;;  %2749 = vmatprep.mubr.f32.mxu1 %v6739_v28  ;;  %v1795_v55 = vld [vmem:[%s9458_s6 + $0xd10] sm:$0xff] }
 0x3d9   : > { %3925 = vmatprep.subr.bf16.mxu0 %v3924_v39  ;;  %4117 = vmatprep.subr.bf16.mxu1 %v4116_v60  ;;  %v1860_v39 = vld [vmem:[%s9458_s6 + $0xf18] sm:$0xff]  ;;  %v1834_v60 = vld [vmem:[%s9458_s6 + $0xe48] sm:$0xff]  ;;  %v3946_v63 = vpack.c.bf16 %v1795_v55, %v1763_v51  ;;  %v3964_v51 = vpack.c.bf16 %v2116_v31, %v2084_v58  ;;  %v4156_v55 = vpack.c.bf16 %v2122_v20, %v2090_v57 }
 0x3da   : > { %v3948_v46 = vpack.c.bf16 %v1860_v39, %v1828_v25  ;;  %v4140_v42 = vpack.c.bf16 %v1866_v14, %v1834_v60  ;;  %v2154_v25 = vld [vmem:[%s9458_s6 + $0x1848] sm:$0xff] }
 0x3db   : > { %3927 = vmatpush1.bf16.msra.mxu0 %v3926_v4  ;;  %4119 = vmatpush1.bf16.msra.mxu1 %v4118_v48  ;;  %v1827_v4 = vld [vmem:[%s9458_s6 + $0xe10] sm:$0xff]  ;;  %v2186_v39 = vld [vmem:[%s9458_s6 + $0x1948] sm:$0xff] }
 0x3dc   : > { %3929 = vmatprep.subr.bf16.mxu0 %v3928_v34  ;;  %4121 = vmatprep.subr.bf16.mxu1 %v4120_v59  ;;  %v1859_v48 = vld [vmem:[%s9458_s6 + $0xf10] sm:$0xff]  ;;  %v1833_v34 = vld [vmem:[%s9458_s6 + $0xe40] sm:$0xff]  ;;  %v1390_v58 = vld [vmem:[%s9458_s6 + $0x68] sm:$0xff] }
 0x3dd   : > { %v1865_v59 = vld [vmem:[%s9458_s6 + $0xf40] sm:$0xff]  ;;  %v3950_v17 = vpack.c.bf16 %v1859_v48, %v1827_v4  ;;  %v3968_v4 = vpack.c.bf16 %v2180_v32, %v2148_v15  ;;  %v4160_v48 = vpack.c.bf16 %v2186_v39, %v2154_v25  ;;  %v1422_v31 = vld [vmem:[%s9458_s6 + $0x168] sm:$0xff] }
 0x3de   : > { %v4142_v18 = vpack.c.bf16 %v1865_v59, %v1833_v34  ;;  %v2212_v34 = vld [vmem:[%s9458_s6 + $0x1a18] sm:$0xff]  ;;  %v1454_v15 = vld [vmem:[%s9458_s6 + $0x268] sm:$0xff] }
 0x3df   : > { %3931 = vmatpush1.bf16.msra.mxu0 %v3930_v23  ;;  %4123 = vmatpush1.bf16.msra.mxu1 %v4122_v27  ;;  %v1891_v23 = vld [vmem:[%s9458_s6 + $0x1010] sm:$0xff]  ;;  %v2244_v59 = vld [vmem:[%s9458_s6 + $0x1b18] sm:$0xff]  ;;  %v1486_v32 = vld [vmem:[%s9458_s6 + $0x368] sm:$0xff] }
 0x3e0   : > { %3933 = vmatprep.subr.bf16.mxu0 %v3932_v16  ;;  %4125 = vmatprep.subr.bf16.mxu1 %v4124_v61  ;;  %v1923_v27 = vld [vmem:[%s9458_s6 + $0x1110] sm:$0xff]  ;;  %v1897_v16 = vld [vmem:[%s9458_s6 + $0x1040] sm:$0xff] }
 0x3e1   : > { %v1929_v61 = vld [vmem:[%s9458_s6 + $0x1140] sm:$0xff]  ;;  %v3954_v43 = vpack.c.bf16 %v1923_v27, %v1891_v23  ;;  %v3972_v23 = vpack.c.bf16 %v2244_v59, %v2212_v34  ;;  %v4164_v27 = vpack.c.bf16 %v2250_v30, %v2218_v13  ;;  %v1518_v34 = vld [vmem:[%s9458_s6 + $0x468] sm:$0xff] }
 0x3e2   : > { %v4146_v10 = vpack.c.bf16 %v1929_v61, %v1897_v16  ;;  %v2276_v16 = vld [vmem:[%s9458_s6 + $0x1c18] sm:$0xff]  ;;  %v1550_v59 = vld [vmem:[%s9458_s6 + $0x568] sm:$0xff] }
 0x3e3   : > { %3935 = vmatpush1.bf16.msra.mxu0 %v3934_v56  ;;  %4127 = vmatpush1.bf16.msra.mxu1 %v4126_v12  ;;  %v1955_v56 = vld [vmem:[%s9458_s6 + $0x1210] sm:$0xff]  ;;  %v2308_v61 = vld [vmem:[%s9458_s6 + $0x1d18] sm:$0xff] }
 0x3e4   : > { %3937 = vmatprep.subr.bf16.mxu0 %v3936_v0  ;;  %4129 = vmatprep.subr.bf16.mxu1 %v4128_v7  ;;  %v1987_v12 = vld [vmem:[%s9458_s6 + $0x1310] sm:$0xff]  ;;  %v1961_v0 = vld [vmem:[%s9458_s6 + $0x1240] sm:$0xff] }
 0x3e5   : > { %v1993_v7 = vld [vmem:[%s9458_s6 + $0x1340] sm:$0xff]  ;;  %v3958_v62 = vpack.c.bf16 %v1987_v12, %v1955_v56  ;;  %v3976_v56 = vpack.c.bf16 %v2308_v61, %v2276_v16  ;;  %v4168_v12 = vpack.c.bf16 %v2314_v50, %v2282_v1  ;;  %v1582_v16 = vld [vmem:[%s9458_s6 + $0x668] sm:$0xff] }
 0x3e6   : > { %v4150_v8 = vpack.c.bf16 %v1993_v7, %v1961_v0  ;;  %v2340_v0 = vld [vmem:[%s9458_s6 + $0x1e18] sm:$0xff]  ;;  %v1614_v61 = vld [vmem:[%s9458_s6 + $0x768] sm:$0xff] }
 0x3e7   : > { %3939 = vmatpush1.bf16.msra.mxu0 %v3938_v29  ;;  %4131 = vmatpush1.bf16.msra.mxu1 %v4130_v21  ;;  %v2019_v29 = vld [vmem:[%s9458_s6 + $0x1410] sm:$0xff]  ;;  %v2372_v7 = vld [vmem:[%s9458_s6 + $0x1f18] sm:$0xff] }
 0x3e8   : > { %3941 = vmatprep.subr.bf16.mxu0 %v3940_v38  ;;  %4133 = vmatprep.subr.bf16.mxu1 %v4132_v24  ;;  %v2051_v21 = vld [vmem:[%s9458_s6 + $0x1510] sm:$0xff]  ;;  %v2025_v38 = vld [vmem:[%s9458_s6 + $0x1440] sm:$0xff] }
 0x3e9   : > { %v2057_v24 = vld [vmem:[%s9458_s6 + $0x1540] sm:$0xff]  ;;  %v3962_v35 = vpack.c.bf16 %v2051_v21, %v2019_v29  ;;  %v3980_v29 = vpack.c.bf16 %v2372_v7, %v2340_v0  ;;  %v4172_v21 = vpack.c.bf16 %v2378_v53, %v2346_v52  ;;  %v1646_v0 = vld [vmem:[%s9458_s6 + $0x868] sm:$0xff] }
 0x3ea   : > { %v4154_v2 = vpack.c.bf16 %v2057_v24, %v2025_v38  ;;  %v1384_v38 = vld [vmem:[%s9458_s6 + $0x38] sm:$0xff]  ;;  %v1678_v7 = vld [vmem:[%s9458_s6 + $0x968] sm:$0xff] }
 0x3eb   : > { %3943 = vmatpush1.bf16.msra.mxu0 %v3942_v41  ;;  %4135 = vmatpush1.bf16.msra.mxu1 %v4134_v5  ;;  %v2083_v41 = vld [vmem:[%s9458_s6 + $0x1610] sm:$0xff]  ;;  %v1416_v24 = vld [vmem:[%s9458_s6 + $0x138] sm:$0xff] }
 0x3ec   : > { %3945 = vmatprep.subr.bf16.mxu0 %v3944_v47  ;;  %4137 = vmatprep.subr.bf16.mxu1 %v4136_v36  ;;  %v2115_v5 = vld [vmem:[%s9458_s6 + $0x1710] sm:$0xff]  ;;  %v2089_v47 = vld [vmem:[%s9458_s6 + $0x1640] sm:$0xff] }
 0x3ed   : > { %v2121_v36 = vld [vmem:[%s9458_s6 + $0x1740] sm:$0xff]  ;;  %v3966_v60 = vpack.c.bf16 %v2115_v5, %v2083_v41  ;;  %v1383_v41 = vld [vmem:[%s9458_s6 + $0x30] sm:$0xff] }
 0x3ee   : > { %v4158_v14 = vpack.c.bf16 %v2121_v36, %v2089_v47  ;;  %v1415_v5 = vld [vmem:[%s9458_s6 + $0x130] sm:$0xff]  ;;  %v1448_v47 = vld [vmem:[%s9458_s6 + $0x238] sm:$0xff] }
 0x3ef   : > { %3947 = vmatpush1.bf16.msra.mxu0 %v3946_v63  ;;  %4139 = vmatpush1.bf16.msra.mxu1 %v4138_v54  ;;  %v2147_v63 = vld [vmem:[%s9458_s6 + $0x1810] sm:$0xff]  ;;  %v1480_v36 = vld [vmem:[%s9458_s6 + $0x338] sm:$0xff]  ;;  %v4050_v25 = vpack.c.bf16 %v1415_v5, %v1383_v41  ;;  %v1741_v5 = vld [vmem:[%s9458_s6 + $0xb60] sm:$0xff] }
 0x3f0   : > { %3949 = vmatprep.subr.bf16.mxu0 %v3948_v46  ;;  %4141 = vmatprep.subr.bf16.mxu1 %v4140_v42  ;;  %v2179_v54 = vld [vmem:[%s9458_s6 + $0x1910] sm:$0xff]  ;;  %v2153_v46 = vld [vmem:[%s9458_s6 + $0x1840] sm:$0xff] }
 0x3f1   : > { %v2185_v42 = vld [vmem:[%s9458_s6 + $0x1940] sm:$0xff]  ;;  %v3970_v11 = vpack.c.bf16 %v2179_v54, %v2147_v63  ;;  %v4052_v54 = vpack.c.bf16 %v1480_v36, %v1448_v47  ;;  %v1774_v47 = vld [vmem:[%s9458_s6 + $0xc68] sm:$0xff] }
 0x3f2   : > { %v4162_v49 = vpack.c.bf16 %v2185_v42, %v2153_v46  ;;  %v1453_v63 = vld [vmem:[%s9458_s6 + $0x260] sm:$0xff]  ;;  %v1512_v46 = vld [vmem:[%s9458_s6 + $0x438] sm:$0xff]  ;;  %v1806_v36 = vld [vmem:[%s9458_s6 + $0xd68] sm:$0xff] }
 0x3f3   : > { %3951 = vmatpush1.bf16.msra.mxu0 %v3950_v17  ;;  %4143 = vmatpush1.bf16.msra.mxu1 %v4142_v18  ;;  %v2211_v17 = vld [vmem:[%s9458_s6 + $0x1a10] sm:$0xff]  ;;  %v1544_v42 = vld [vmem:[%s9458_s6 + $0x538] sm:$0xff] }
 0x3f4   : > { %3953 = vmatprep.subr.bf16.mxu0 %v3952_v40  ;;  %4145 = vmatprep.subr.bf16.mxu1 %v4144_v44  ;;  %v2243_v18 = vld [vmem:[%s9458_s6 + $0x1b10] sm:$0xff]  ;;  %v2217_v40 = vld [vmem:[%s9458_s6 + $0x1a40] sm:$0xff] }
 0x3f5   : > { %v2249_v44 = vld [vmem:[%s9458_s6 + $0x1b40] sm:$0xff]  ;;  %v3974_v37 = vpack.c.bf16 %v2243_v18, %v2211_v17  ;;  %v1543_v17 = vld [vmem:[%s9458_s6 + $0x530] sm:$0xff] }
 0x3f6   : > { %v4166_v45 = vpack.c.bf16 %v2249_v44, %v2217_v40  ;;  %v1517_v18 = vld [vmem:[%s9458_s6 + $0x460] sm:$0xff]  ;;  %v1576_v40 = vld [vmem:[%s9458_s6 + $0x638] sm:$0xff] }
 0x3f7   : > { %3955 = vmatpush1.bf16.msra.mxu0 %v3954_v43  ;;  %4147 = vmatpush1.bf16.msra.mxu1 %v4146_v10  ;;  %v2275_v43 = vld [vmem:[%s9458_s6 + $0x1c10] sm:$0xff]  ;;  %v1608_v44 = vld [vmem:[%s9458_s6 + $0x738] sm:$0xff] }
 0x3f8   : > { %3957 = vmatprep.subr.bf16.mxu0 %v3956_v26  ;;  %4149 = vmatprep.subr.bf16.mxu1 %v4148_v9  ;;  %v2307_v10 = vld [vmem:[%s9458_s6 + $0x1d10] sm:$0xff]  ;;  %v2281_v26 = vld [vmem:[%s9458_s6 + $0x1c40] sm:$0xff] }
 0x3f9   : > { %v2313_v9 = vld [vmem:[%s9458_s6 + $0x1d40] sm:$0xff]  ;;  %v3978_v6 = vpack.c.bf16 %v2307_v10, %v2275_v43  ;;  %v1607_v43 = vld [vmem:[%s9458_s6 + $0x730] sm:$0xff] }
 0x3fa   : > { %v4170_v3 = vpack.c.bf16 %v2313_v9, %v2281_v26  ;;  %v1581_v10 = vld [vmem:[%s9458_s6 + $0x660] sm:$0xff]  ;;  %v1640_v26 = vld [vmem:[%s9458_s6 + $0x838] sm:$0xff] }
 0x3fb   : > { %3959 = vmatpush1.bf16.msra.mxu0 %v3958_v62  ;;  %4151 = vmatpush1.bf16.msra.mxu1 %v4150_v8  ;;  %v2339_v62 = vld [vmem:[%s9458_s6 + $0x1e10] sm:$0xff]  ;;  %v1672_v9 = vld [vmem:[%s9458_s6 + $0x938] sm:$0xff] }
 0x3fc   : > { %3961 = vmatprep.subr.bf16.mxu0 %v3960_v33  ;;  %4153 = vmatprep.subr.bf16.mxu1 %v4152_v22  ;;  %v2371_v8 = vld [vmem:[%s9458_s6 + $0x1f10] sm:$0xff]  ;;  %v2345_v33 = vld [vmem:[%s9458_s6 + $0x1e40] sm:$0xff] }
 0x3fd   : > { %v2377_v22 = vld [vmem:[%s9458_s6 + $0x1f40] sm:$0xff]  ;;  %v3982_v57 = vpack.c.bf16 %v2371_v8, %v2339_v62  ;;  %v1671_v62 = vld [vmem:[%s9458_s6 + $0x930] sm:$0xff] }
 0x3fe   : > { %v4174_v20 = vpack.c.bf16 %v2377_v22, %v2345_v33  ;;  %v1645_v8 = vld [vmem:[%s9458_s6 + $0x860] sm:$0xff]  ;;  %v1704_v33 = vld [vmem:[%s9458_s6 + $0xa38] sm:$0xff] }
 0x3ff   : > { %3963 = vmatpush1.bf16.msra.mxu0 %v3962_v35  ;;  %4155 = vmatpush1.bf16.msra.mxu1 %v4154_v2  ;;  %v4048_v35 = vpack.c.bf16 %v1416_v24, %v1384_v38  ;;  %v4240_v2 = vpack.c.bf16 %v1422_v31, %v1390_v58  ;;  %v1736_v22 = vld [vmem:[%s9458_s6 + $0xb38] sm:$0xff]  ;;  %v1710_v38 = vld [vmem:[%s9458_s6 + $0xa68] sm:$0xff] }
 0x400   : > { %3965 = vmatprep.subr.bf16.mxu0 %v3964_v51  ;;  %4157 = vmatprep.subr.bf16.mxu1 %v4156_v55  ;;  %v1389_v51 = vld [vmem:[%s9458_s6 + $0x60] sm:$0xff]  ;;  %v1742_v24 = vld [vmem:[%s9458_s6 + $0xb68] sm:$0xff] }
 0x401   : > { %v1421_v55 = vld [vmem:[%s9458_s6 + $0x160] sm:$0xff]  ;;  %v4260_v41 = vpack.c.bf16 %v1742_v24, %v1710_v38 }
 0x402   : > { %v4242_v39 = vpack.c.bf16 %v1421_v55, %v1389_v51  ;;  %v1768_v51 = vld [vmem:[%s9458_s6 + $0xc38] sm:$0xff] }
 0x403   : > { %3967 = vmatpush1.bf16.msra.mxu0 %v3966_v60  ;;  %4159 = vmatpush1.bf16.msra.mxu1 %v4158_v14  ;;  %v1447_v60 = vld [vmem:[%s9458_s6 + $0x230] sm:$0xff]  ;;  %v1800_v55 = vld [vmem:[%s9458_s6 + $0xd38] sm:$0xff] }
 0x404   : > { %3969 = vmatprep.subr.bf16.mxu0 %v3968_v4  ;;  %4161 = vmatprep.subr.bf16.mxu1 %v4160_v48  ;;  %v1479_v14 = vld [vmem:[%s9458_s6 + $0x330] sm:$0xff]  ;;  %v4244_v4 = vpack.c.bf16 %v1486_v32, %v1454_v15  ;;  %v1485_v48 = vld [vmem:[%s9458_s6 + $0x360] sm:$0xff] }
 0x405   : > { %v4054_v13 = vpack.c.bf16 %v1479_v14, %v1447_v60  ;;  %v4246_v30 = vpack.c.bf16 %v1485_v48, %v1453_v63  ;;  %v1799_v60 = vld [vmem:[%s9458_s6 + $0xd30] sm:$0xff]  ;;  %v1773_v14 = vld [vmem:[%s9458_s6 + $0xc60] sm:$0xff]  ;;  %v4264_v63 = vpack.c.bf16 %v1806_v36, %v1774_v47  ;;  %v1864_v48 = vld [vmem:[%s9458_s6 + $0xf38] sm:$0xff] }
 0x407   : > { %3971 = vmatpush1.bf16.msra.mxu0 %v3970_v11  ;;  %4163 = vmatpush1.bf16.msra.mxu1 %v4162_v49  ;;  %v4056_v11 = vpack.c.bf16 %v1544_v42, %v1512_v46  ;;  %v1511_v49 = vld [vmem:[%s9458_s6 + $0x430] sm:$0xff]  ;;  %v1838_v46 = vld [vmem:[%s9458_s6 + $0xe68] sm:$0xff] }
 0x408   : > { %3973 = vmatprep.subr.bf16.mxu0 %v3972_v23  ;;  %4165 = vmatprep.subr.bf16.mxu1 %v4164_v27  ;;  %v4248_v23 = vpack.c.bf16 %v1550_v59, %v1518_v34  ;;  %v1549_v27 = vld [vmem:[%s9458_s6 + $0x560] sm:$0xff]  ;;  %v4058_v1 = vpack.c.bf16 %v1543_v17, %v1511_v49  ;;  %v1870_v42 = vld [vmem:[%s9458_s6 + $0xf68] sm:$0xff] }
 0x409   : > { %v4250_v50 = vpack.c.bf16 %v1549_v27, %v1517_v18  ;;  %v1837_v49 = vld [vmem:[%s9458_s6 + $0xe60] sm:$0xff]  ;;  %v4268_v17 = vpack.c.bf16 %v1870_v42, %v1838_v46  ;;  %v1928_v27 = vld [vmem:[%s9458_s6 + $0x1138] sm:$0xff] }
 0x40a   : > { %v1869_v18 = vld [vmem:[%s9458_s6 + $0xf60] sm:$0xff] }
 0x40b   : > { %3975 = vmatpush1.bf16.msra.mxu0 %v3974_v37  ;;  %4167 = vmatpush1.bf16.msra.mxu1 %v4166_v45  ;;  %v4060_v37 = vpack.c.bf16 %v1608_v44, %v1576_v40  ;;  %v1575_v45 = vld [vmem:[%s9458_s6 + $0x630] sm:$0xff]  ;;  %v1902_v40 = vld [vmem:[%s9458_s6 + $0x1068] sm:$0xff] }
 0x40c   : > { %3977 = vmatprep.subr.bf16.mxu0 %v3976_v56  ;;  %4169 = vmatprep.subr.bf16.mxu1 %v4168_v12  ;;  %v4252_v56 = vpack.c.bf16 %v1614_v61, %v1582_v16  ;;  %v1613_v12 = vld [vmem:[%s9458_s6 + $0x760] sm:$0xff]  ;;  %v4062_v52 = vpack.c.bf16 %v1607_v43, %v1575_v45  ;;  %v1934_v44 = vld [vmem:[%s9458_s6 + $0x1168] sm:$0xff]  ;;  %v4270_v61 = vpack.c.bf16 %v1869_v18, %v1837_v49  ;;  %v2248_v18 = vld [vmem:[%s9458_s6 + $0x1b38] sm:$0xff] }
 0x40d   : > { %v4254_v53 = vpack.c.bf16 %v1613_v12, %v1581_v10  ;;  %v1901_v45 = vld [vmem:[%s9458_s6 + $0x1060] sm:$0xff]  ;;  %v4272_v43 = vpack.c.bf16 %v1934_v44, %v1902_v40  ;;  %v1992_v12 = vld [vmem:[%s9458_s6 + $0x1338] sm:$0xff] }
 0x40e   : > { %v1933_v10 = vld [vmem:[%s9458_s6 + $0x1160] sm:$0xff] }
 0x40f   : > { %3979 = vmatpush1.bf16.msra.mxu0 %v3978_v6  ;;  %4171 = vmatpush1.bf16.msra.mxu1 %v4170_v3  ;;  %v4064_v6 = vpack.c.bf16 %v1672_v9, %v1640_v26  ;;  %v1639_v3 = vld [vmem:[%s9458_s6 + $0x830] sm:$0xff]  ;;  %v1966_v26 = vld [vmem:[%s9458_s6 + $0x1268] sm:$0xff]  ;;  %v2189_v49 = vld [vmem:[%s9458_s6 + $0x1960] sm:$0xff] }
 0x410   : > { %3981 = vmatprep.subr.bf16.mxu0 %v3980_v29  ;;  %4173 = vmatprep.subr.bf16.mxu1 %v4172_v21  ;;  %v4256_v29 = vpack.c.bf16 %v1678_v7, %v1646_v0  ;;  %v1677_v21 = vld [vmem:[%s9458_s6 + $0x960] sm:$0xff]  ;;  %v4066_v58 = vpack.c.bf16 %v1671_v62, %v1639_v3  ;;  %v1998_v9 = vld [vmem:[%s9458_s6 + $0x1368] sm:$0xff]  ;;  %v4274_v7 = vpack.c.bf16 %v1933_v10, %v1901_v45  ;;  %v2312_v10 = vld [vmem:[%s9458_s6 + $0x1d38] sm:$0xff] }
 0x411   : > { %v4258_v31 = vpack.c.bf16 %v1677_v21, %v1645_v8  ;;  %v1965_v3 = vld [vmem:[%s9458_s6 + $0x1260] sm:$0xff]  ;;  %v4276_v62 = vpack.c.bf16 %v1998_v9, %v1966_v26  ;;  %v2056_v21 = vld [vmem:[%s9458_s6 + $0x1538] sm:$0xff] }
 0x412   : > { %v1997_v8 = vld [vmem:[%s9458_s6 + $0x1360] sm:$0xff] }
 0x413   : > { %3983 = vmatpush1.bf16.msra.mxu0 %v3982_v57  ;;  %4175 = vmatpush1.bf16.msra.mxu1 %v4174_v20  ;;  %v4068_v57 = vpack.c.bf16 %v1736_v22, %v1704_v33  ;;  %v1703_v20 = vld [vmem:[%s9458_s6 + $0xa30] sm:$0xff]  ;;  %v2030_v33 = vld [vmem:[%s9458_s6 + $0x1468] sm:$0xff]  ;;  %v4278_v24 = vpack.c.bf16 %v1997_v8, %v1965_v3  ;;  %v2253_v45 = vld [vmem:[%s9458_s6 + $0x1b60] sm:$0xff] }
 0x414   : > { %4049 = vmatprep.subr.bf16.mxu0 %v4048_v35  ;;  %4241 = vmatprep.subr.bf16.mxu1 %v4240_v2  ;;  %v1735_v35 = vld [vmem:[%s9458_s6 + $0xb30] sm:$0xff]  ;;  %v1709_v2 = vld [vmem:[%s9458_s6 + $0xa60] sm:$0xff]  ;;  %v2062_v22 = vld [vmem:[%s9458_s6 + $0x1568] sm:$0xff] }
 0x415   : > { %v4070_v15 = vpack.c.bf16 %v1735_v35, %v1703_v20  ;;  %v4262_v32 = vpack.c.bf16 %v1741_v5, %v1709_v2  ;;  %v2029_v20 = vld [vmem:[%s9458_s6 + $0x1460] sm:$0xff]  ;;  %v4280_v35 = vpack.c.bf16 %v2062_v22, %v2030_v33  ;;  %v2120_v5 = vld [vmem:[%s9458_s6 + $0x1738] sm:$0xff] }
 0x416   : > { %2537 = vmatmul.mubr.f32.vlgmr.msra.gmra.mrb[18].mxu0 %v6747_v19  ;;  %2750 = vmatmul.mubr.f32.vlgmr.msra.gmra.mrb[4].mxu1 %v6747_v19  ;;  %v2061_v2 = vld [vmem:[%s9458_s6 + $0x1560] sm:$0xff]  ;;  %v2376_v8 = vld [vmem:[%s9458_s6 + $0x1f38] sm:$0xff] }
 0x417   : > { %4051 = vmatpush1.bf16.msra.mxu0 %v4050_v25  ;;  %2678 = vmatprep.mubr.f32.mxu0 %v6739_v28  ;;  %v4072_v25 = vpack.c.bf16 %v1800_v55, %v1768_v51  ;;  %v2094_v51 = vld [vmem:[%s9458_s6 + $0x1668] sm:$0xff]  ;;  %v4282_v36 = vpack.c.bf16 %v2061_v2, %v2029_v20  ;;  %v2317_v3 = vld [vmem:[%s9458_s6 + $0x1d60] sm:$0xff]  ;;  %v1420_v2 = vld [vmem:[%s9458_s6 + $0x158] sm:$0xff] }
 0x418   : > { %4243 = vmatpush1.bf16.msra.mxu1 %v4242_v39  ;;  %2891 = vmatprep.mubr.f32.mxu1 %v6739_v28  ;;  %v1767_v39 = vld [vmem:[%s9458_s6 + $0xc30] sm:$0xff]  ;;  %v2126_v55 = vld [vmem:[%s9458_s6 + $0x1768] sm:$0xff]  ;;  %v2381_v20 = vld [vmem:[%s9458_s6 + $0x1f60] sm:$0xff] }
 0x419   : > { %4053 = vmatprep.subr.bf16.mxu0 %v4052_v54  ;;  %4245 = vmatprep.subr.bf16.mxu1 %v4244_v4  ;;  %v1805_v54 = vld [vmem:[%s9458_s6 + $0xd60] sm:$0xff]  ;;  %v1832_v4 = vld [vmem:[%s9458_s6 + $0xe38] sm:$0xff]  ;;  %v4074_v34 = vpack.c.bf16 %v1799_v60, %v1767_v39  ;;  %v4284_v60 = vpack.c.bf16 %v2126_v55, %v2094_v51 }
 0x41a   : > { %v4266_v59 = vpack.c.bf16 %v1805_v54, %v1773_v14  ;;  %v2093_v39 = vld [vmem:[%s9458_s6 + $0x1660] sm:$0xff]  ;;  %v2184_v54 = vld [vmem:[%s9458_s6 + $0x1938] sm:$0xff] }
 0x41b   : > { %4055 = vmatpush1.bf16.msra.mxu0 %v4054_v13  ;;  %v4076_v13 = vpack.c.bf16 %v1864_v48, %v1832_v4  ;;  %v2125_v14 = vld [vmem:[%s9458_s6 + $0x1760] sm:$0xff]  ;;  %v2158_v4 = vld [vmem:[%s9458_s6 + $0x1868] sm:$0xff] }
 0x41c   : > { %4247 = vmatpush1.bf16.msra.mxu1 %v4246_v30  ;;  %4057 = vmatprep.subr.bf16.mxu0 %v4056_v11  ;;  %v1831_v30 = vld [vmem:[%s9458_s6 + $0xe30] sm:$0xff]  ;;  %v2190_v48 = vld [vmem:[%s9458_s6 + $0x1968] sm:$0xff]  ;;  %v4286_v42 = vpack.c.bf16 %v2125_v14, %v2093_v39  ;;  %v1425_v39 = vld [vmem:[%s9458_s6 + $0x180] sm:$0xff] }
 0x41d   : > { %4249 = vmatprep.subr.bf16.mxu1 %v4248_v23  ;;  %v1863_v11 = vld [vmem:[%s9458_s6 + $0xf30] sm:$0xff]  ;;  %v1896_v23 = vld [vmem:[%s9458_s6 + $0x1038] sm:$0xff] }
 0x41e   : > { %v4078_v16 = vpack.c.bf16 %v1863_v11, %v1831_v30  ;;  %v2157_v30 = vld [vmem:[%s9458_s6 + $0x1860] sm:$0xff]  ;;  %v4288_v11 = vpack.c.bf16 %v2190_v48, %v2158_v4  ;;  %v1484_v14 = vld [vmem:[%s9458_s6 + $0x358] sm:$0xff]  ;;  %v1490_v4 = vld [vmem:[%s9458_s6 + $0x388] sm:$0xff] }
 0x41f   : > { %4059 = vmatpush1.bf16.msra.mxu0 %v4058_v1  ;;  %v4080_v1 = vpack.c.bf16 %v1928_v27, %v1896_v23  ;;  %v2222_v23 = vld [vmem:[%s9458_s6 + $0x1a68] sm:$0xff]  ;;  %v4290_v44 = vpack.c.bf16 %v2189_v49, %v2157_v30  ;;  %v1516_v30 = vld [vmem:[%s9458_s6 + $0x458] sm:$0xff] }
 0x420   : > { %4251 = vmatpush1.bf16.msra.mxu1 %v4250_v50  ;;  %4061 = vmatprep.subr.bf16.mxu0 %v4060_v37  ;;  %v1895_v50 = vld [vmem:[%s9458_s6 + $0x1030] sm:$0xff]  ;;  %v2254_v27 = vld [vmem:[%s9458_s6 + $0x1b68] sm:$0xff] }
 0x421   : > { %4253 = vmatprep.subr.bf16.mxu1 %v4252_v56  ;;  %v1927_v37 = vld [vmem:[%s9458_s6 + $0x1130] sm:$0xff]  ;;  %v1960_v56 = vld [vmem:[%s9458_s6 + $0x1238] sm:$0xff] }
 0x422   : > { %v4082_v0 = vpack.c.bf16 %v1927_v37, %v1895_v50  ;;  %v2221_v50 = vld [vmem:[%s9458_s6 + $0x1a60] sm:$0xff]  ;;  %v4292_v37 = vpack.c.bf16 %v2254_v27, %v2222_v23 }
 0x423   : > { %4063 = vmatpush1.bf16.msra.mxu0 %v4062_v52  ;;  %v4084_v52 = vpack.c.bf16 %v1992_v12, %v1960_v56  ;;  %v2286_v56 = vld [vmem:[%s9458_s6 + $0x1c68] sm:$0xff]  ;;  %v4294_v9 = vpack.c.bf16 %v2253_v45, %v2221_v50  ;;  %v1553_v50 = vld [vmem:[%s9458_s6 + $0x580] sm:$0xff]  ;;  %v1612_v45 = vld [vmem:[%s9458_s6 + $0x758] sm:$0xff] }
 0x424   : > { %4255 = vmatpush1.bf16.msra.mxu1 %v4254_v53  ;;  %4065 = vmatprep.subr.bf16.mxu0 %v4064_v6  ;;  %v1959_v53 = vld [vmem:[%s9458_s6 + $0x1230] sm:$0xff]  ;;  %v2318_v12 = vld [vmem:[%s9458_s6 + $0x1d68] sm:$0xff] }
 0x425   : > { %4257 = vmatprep.subr.bf16.mxu1 %v4256_v29  ;;  %v1991_v6 = vld [vmem:[%s9458_s6 + $0x1330] sm:$0xff]  ;;  %v2024_v29 = vld [vmem:[%s9458_s6 + $0x1438] sm:$0xff] }
 0x426   : > { %v4086_v38 = vpack.c.bf16 %v1991_v6, %v1959_v53  ;;  %v2285_v53 = vld [vmem:[%s9458_s6 + $0x1c60] sm:$0xff]  ;;  %v4296_v6 = vpack.c.bf16 %v2318_v12, %v2286_v56 }
 0x427   : > { %4067 = vmatpush1.bf16.msra.mxu0 %v4066_v58  ;;  %v4088_v58 = vpack.c.bf16 %v2056_v21, %v2024_v29  ;;  %v2350_v29 = vld [vmem:[%s9458_s6 + $0x1e68] sm:$0xff]  ;;  %v4298_v22 = vpack.c.bf16 %v2317_v3, %v2285_v53  ;;  %v1617_v53 = vld [vmem:[%s9458_s6 + $0x780] sm:$0xff]  ;;  %v1676_v3 = vld [vmem:[%s9458_s6 + $0x958] sm:$0xff] }
 0x428   : > { %4259 = vmatpush1.bf16.msra.mxu1 %v4258_v31  ;;  %4069 = vmatprep.subr.bf16.mxu0 %v4068_v57  ;;  %v2023_v31 = vld [vmem:[%s9458_s6 + $0x1430] sm:$0xff]  ;;  %v2382_v21 = vld [vmem:[%s9458_s6 + $0x1f68] sm:$0xff] }
 0x429   : > { %4261 = vmatprep.subr.bf16.mxu1 %v4260_v41  ;;  %v2055_v57 = vld [vmem:[%s9458_s6 + $0x1530] sm:$0xff]  ;;  %v2088_v41 = vld [vmem:[%s9458_s6 + $0x1638] sm:$0xff] }
 0x42a   : > { %v4090_v47 = vpack.c.bf16 %v2055_v57, %v2023_v31  ;;  %v2349_v31 = vld [vmem:[%s9458_s6 + $0x1e60] sm:$0xff]  ;;  %v4300_v57 = vpack.c.bf16 %v2382_v21, %v2350_v29 }
 0x42b   : > { %4071 = vmatpush1.bf16.msra.mxu0 %v4070_v15  ;;  %v4092_v15 = vpack.c.bf16 %v2120_v5, %v2088_v41  ;;  %v1394_v41 = vld [vmem:[%s9458_s6 + $0x88] sm:$0xff]  ;;  %v4302_v55 = vpack.c.bf16 %v2381_v20, %v2349_v31  ;;  %v1681_v31 = vld [vmem:[%s9458_s6 + $0x980] sm:$0xff]  ;;  %v1740_v20 = vld [vmem:[%s9458_s6 + $0xb58] sm:$0xff] }
 0x42c   : > { %4263 = vmatpush1.bf16.msra.mxu1 %v4262_v32  ;;  %4073 = vmatprep.subr.bf16.mxu0 %v4072_v25  ;;  %v2087_v32 = vld [vmem:[%s9458_s6 + $0x1630] sm:$0xff]  ;;  %v1426_v5 = vld [vmem:[%s9458_s6 + $0x188] sm:$0xff] }
 0x42d   : > { %4265 = vmatprep.subr.bf16.mxu1 %v4264_v63  ;;  %v2119_v25 = vld [vmem:[%s9458_s6 + $0x1730] sm:$0xff]  ;;  %v2152_v63 = vld [vmem:[%s9458_s6 + $0x1838] sm:$0xff] }
 0x42e   : > { %v4094_v46 = vpack.c.bf16 %v2119_v25, %v2087_v32  ;;  %v4368_v32 = vpack.c.bf16 %v1426_v5, %v1394_v41  ;;  %v1393_v25 = vld [vmem:[%s9458_s6 + $0x80] sm:$0xff] }
 0x42f   : > { %4075 = vmatpush1.bf16.msra.mxu0 %v4074_v34  ;;  %v4096_v34 = vpack.c.bf16 %v2184_v54, %v2152_v63  ;;  %v1458_v54 = vld [vmem:[%s9458_s6 + $0x288] sm:$0xff]  ;;  %v4370_v48 = vpack.c.bf16 %v1425_v39, %v1393_v25  ;;  %v1772_v25 = vld [vmem:[%s9458_s6 + $0xc58] sm:$0xff] }
 0x430   : > { %4267 = vmatpush1.bf16.msra.mxu1 %v4266_v59  ;;  %4077 = vmatprep.subr.bf16.mxu0 %v4076_v13  ;;  %v2151_v59 = vld [vmem:[%s9458_s6 + $0x1830] sm:$0xff]  ;;  %v4372_v49 = vpack.c.bf16 %v1490_v4, %v1458_v54  ;;  %v1804_v39 = vld [vmem:[%s9458_s6 + $0xd58] sm:$0xff] }
 0x431   : > { %4269 = vmatprep.subr.bf16.mxu1 %v4268_v17  ;;  %v2183_v13 = vld [vmem:[%s9458_s6 + $0x1930] sm:$0xff]  ;;  %v2216_v17 = vld [vmem:[%s9458_s6 + $0x1a38] sm:$0xff]  ;;  %v4200_v4 = vpack.c.bf16 %v1804_v39, %v1772_v25  ;;  %v2098_v25 = vld [vmem:[%s9458_s6 + $0x1688] sm:$0xff] }
 0x432   : > { %v4098_v40 = vpack.c.bf16 %v2183_v13, %v2151_v59  ;;  %v1489_v13 = vld [vmem:[%s9458_s6 + $0x380] sm:$0xff]  ;;  %v2130_v39 = vld [vmem:[%s9458_s6 + $0x1788] sm:$0xff] }
 0x433   : > { %4079 = vmatpush1.bf16.msra.mxu0 %v4078_v16  ;;  %v4100_v16 = vpack.c.bf16 %v2248_v18, %v2216_v17  ;;  %v1522_v17 = vld [vmem:[%s9458_s6 + $0x488] sm:$0xff] }
 0x434   : > { %4271 = vmatpush1.bf16.msra.mxu1 %v4270_v61  ;;  %4081 = vmatprep.subr.bf16.mxu0 %v4080_v1  ;;  %v2215_v61 = vld [vmem:[%s9458_s6 + $0x1a30] sm:$0xff]  ;;  %v1554_v18 = vld [vmem:[%s9458_s6 + $0x588] sm:$0xff] }
 0x435   : > { %4273 = vmatprep.subr.bf16.mxu1 %v4272_v43  ;;  %v2247_v1 = vld [vmem:[%s9458_s6 + $0x1b30] sm:$0xff]  ;;  %v2280_v43 = vld [vmem:[%s9458_s6 + $0x1c38] sm:$0xff] }
 0x436   : > { %v4102_v26 = vpack.c.bf16 %v2247_v1, %v2215_v61  ;;  %v1521_v61 = vld [vmem:[%s9458_s6 + $0x480] sm:$0xff]  ;;  %v4376_v1 = vpack.c.bf16 %v1554_v18, %v1522_v17 }
 0x437   : > { %4083 = vmatpush1.bf16.msra.mxu0 %v4082_v0  ;;  %v4104_v0 = vpack.c.bf16 %v2312_v10, %v2280_v43  ;;  %v1586_v43 = vld [vmem:[%s9458_s6 + $0x688] sm:$0xff]  ;;  %v4378_v12 = vpack.c.bf16 %v1553_v50, %v1521_v61  ;;  %v1873_v61 = vld [vmem:[%s9458_s6 + $0xf80] sm:$0xff]  ;;  %v1932_v50 = vld [vmem:[%s9458_s6 + $0x1158] sm:$0xff] }
 0x438   : > { %4275 = vmatpush1.bf16.msra.mxu1 %v4274_v7  ;;  %4085 = vmatprep.subr.bf16.mxu0 %v4084_v52  ;;  %v2279_v7 = vld [vmem:[%s9458_s6 + $0x1c30] sm:$0xff]  ;;  %v1618_v10 = vld [vmem:[%s9458_s6 + $0x788] sm:$0xff] }
 0x439   : > { %4277 = vmatprep.subr.bf16.mxu1 %v4276_v62  ;;  %v2311_v52 = vld [vmem:[%s9458_s6 + $0x1d30] sm:$0xff]  ;;  %v2344_v62 = vld [vmem:[%s9458_s6 + $0x1e38] sm:$0xff] }
 0x43a   : > { %v4106_v33 = vpack.c.bf16 %v2311_v52, %v2279_v7  ;;  %v1585_v7 = vld [vmem:[%s9458_s6 + $0x680] sm:$0xff]  ;;  %v4380_v52 = vpack.c.bf16 %v1618_v10, %v1586_v43 }
 0x43b   : > { %4087 = vmatpush1.bf16.msra.mxu0 %v4086_v38  ;;  %v4108_v38 = vpack.c.bf16 %v2376_v8, %v2344_v62  ;;  %v1650_v62 = vld [vmem:[%s9458_s6 + $0x888] sm:$0xff]  ;;  %v4382_v21 = vpack.c.bf16 %v1617_v53, %v1585_v7  ;;  %v1937_v7 = vld [vmem:[%s9458_s6 + $0x1180] sm:$0xff]  ;;  %v1996_v53 = vld [vmem:[%s9458_s6 + $0x1358] sm:$0xff] }
 0x43c   : > { %4279 = vmatpush1.bf16.msra.mxu1 %v4278_v24  ;;  %4089 = vmatprep.subr.bf16.mxu0 %v4088_v58  ;;  %v2343_v24 = vld [vmem:[%s9458_s6 + $0x1e30] sm:$0xff]  ;;  %v1682_v8 = vld [vmem:[%s9458_s6 + $0x988] sm:$0xff] }
 0x43d   : > { %4281 = vmatprep.subr.bf16.mxu1 %v4280_v35  ;;  %v2375_v58 = vld [vmem:[%s9458_s6 + $0x1f30] sm:$0xff]  ;;  %v1388_v35 = vld [vmem:[%s9458_s6 + $0x58] sm:$0xff] }
 0x43e   : > { %v4110_v51 = vpack.c.bf16 %v2375_v58, %v2343_v24  ;;  %v1649_v24 = vld [vmem:[%s9458_s6 + $0x880] sm:$0xff]  ;;  %v4384_v58 = vpack.c.bf16 %v1682_v8, %v1650_v62 }
 0x43f   : > { %4091 = vmatpush1.bf16.msra.mxu0 %v4090_v47  ;;  %v4176_v47 = vpack.c.bf16 %v1420_v2, %v1388_v35  ;;  %v1714_v35 = vld [vmem:[%s9458_s6 + $0xa88] sm:$0xff]  ;;  %v4386_v5 = vpack.c.bf16 %v1681_v31, %v1649_v24  ;;  %v2001_v24 = vld [vmem:[%s9458_s6 + $0x1380] sm:$0xff]  ;;  %v2060_v31 = vld [vmem:[%s9458_s6 + $0x1558] sm:$0xff] }
 0x440   : > { %4283 = vmatpush1.bf16.msra.mxu1 %v4282_v36  ;;  %4093 = vmatprep.subr.bf16.mxu0 %v4092_v15  ;;  %v1387_v36 = vld [vmem:[%s9458_s6 + $0x50] sm:$0xff]  ;;  %v1746_v2 = vld [vmem:[%s9458_s6 + $0xb88] sm:$0xff] }
 0x441   : > { %4285 = vmatprep.subr.bf16.mxu1 %v4284_v60  ;;  %v1419_v15 = vld [vmem:[%s9458_s6 + $0x150] sm:$0xff]  ;;  %v1452_v60 = vld [vmem:[%s9458_s6 + $0x258] sm:$0xff] }
 0x442   : > { %v4178_v63 = vpack.c.bf16 %v1419_v15, %v1387_v36  ;;  %v4180_v59 = vpack.c.bf16 %v1484_v14, %v1452_v60  ;;  %v1713_v36 = vld [vmem:[%s9458_s6 + $0xa80] sm:$0xff]  ;;  %v4388_v15 = vpack.c.bf16 %v1746_v2, %v1714_v35  ;;  %v1778_v60 = vld [vmem:[%s9458_s6 + $0xc88] sm:$0xff] }
 0x443   : > { %4095 = vmatpush1.bf16.msra.mxu0 %v4094_v46  ;;  %v1451_v46 = vld [vmem:[%s9458_s6 + $0x250] sm:$0xff]  ;;  %v1810_v14 = vld [vmem:[%s9458_s6 + $0xd88] sm:$0xff] }
 0x444   : > { %4287 = vmatpush1.bf16.msra.mxu1 %v4286_v42  ;;  %4097 = vmatprep.subr.bf16.mxu0 %v4096_v34  ;;  %v1483_v42 = vld [vmem:[%s9458_s6 + $0x350] sm:$0xff]  ;;  %v1457_v34 = vld [vmem:[%s9458_s6 + $0x280] sm:$0xff] }
 0x445   : > { %4289 = vmatprep.subr.bf16.mxu1 %v4288_v11  ;;  %v1548_v11 = vld [vmem:[%s9458_s6 + $0x558] sm:$0xff]  ;;  %v4182_v23 = vpack.c.bf16 %v1483_v42, %v1451_v46  ;;  %v4374_v27 = vpack.c.bf16 %v1489_v13, %v1457_v34  ;;  %v1803_v46 = vld [vmem:[%s9458_s6 + $0xd50] sm:$0xff]  ;;  %v1777_v42 = vld [vmem:[%s9458_s6 + $0xc80] sm:$0xff]  ;;  %v4392_v34 = vpack.c.bf16 %v1810_v14, %v1778_v60 }
 0x446   : > { %v1836_v13 = vld [vmem:[%s9458_s6 + $0xe58] sm:$0xff] }
 0x447   : > { %4099 = vmatpush1.bf16.msra.mxu0 %v4098_v40  ;;  %v4184_v40 = vpack.c.bf16 %v1548_v11, %v1516_v30  ;;  %v1868_v30 = vld [vmem:[%s9458_s6 + $0xf58] sm:$0xff]  ;;  %v1842_v11 = vld [vmem:[%s9458_s6 + $0xe88] sm:$0xff] }
 0x448   : > { %4291 = vmatpush1.bf16.msra.mxu1 %v4290_v44  ;;  %4101 = vmatprep.subr.bf16.mxu0 %v4100_v16  ;;  %v1515_v44 = vld [vmem:[%s9458_s6 + $0x450] sm:$0xff] }
 0x449   : > { %4293 = vmatprep.subr.bf16.mxu1 %v4292_v37  ;;  %v1547_v16 = vld [vmem:[%s9458_s6 + $0x550] sm:$0xff]  ;;  %v1580_v37 = vld [vmem:[%s9458_s6 + $0x658] sm:$0xff] }
 0x44a   : > { %v4186_v56 = vpack.c.bf16 %v1547_v16, %v1515_v44  ;;  %v1841_v44 = vld [vmem:[%s9458_s6 + $0xe80] sm:$0xff] }
 0x44b   : > { %4103 = vmatpush1.bf16.msra.mxu0 %v4102_v26  ;;  %v4188_v26 = vpack.c.bf16 %v1612_v45, %v1580_v37  ;;  %v1906_v37 = vld [vmem:[%s9458_s6 + $0x1088] sm:$0xff]  ;;  %v4398_v10 = vpack.c.bf16 %v1873_v61, %v1841_v44  ;;  %v2193_v44 = vld [vmem:[%s9458_s6 + $0x1980] sm:$0xff]  ;;  %v2252_v61 = vld [vmem:[%s9458_s6 + $0x1b58] sm:$0xff] }
 0x44c   : > { %4295 = vmatpush1.bf16.msra.mxu1 %v4294_v9  ;;  %4105 = vmatprep.subr.bf16.mxu0 %v4104_v0  ;;  %v1579_v9 = vld [vmem:[%s9458_s6 + $0x650] sm:$0xff]  ;;  %v1938_v45 = vld [vmem:[%s9458_s6 + $0x1188] sm:$0xff] }
 0x44d   : > { %4297 = vmatprep.subr.bf16.mxu1 %v4296_v6  ;;  %v1611_v0 = vld [vmem:[%s9458_s6 + $0x750] sm:$0xff]  ;;  %v1644_v6 = vld [vmem:[%s9458_s6 + $0x858] sm:$0xff] }
 0x44e   : > { %v4190_v29 = vpack.c.bf16 %v1611_v0, %v1579_v9  ;;  %v1905_v9 = vld [vmem:[%s9458_s6 + $0x1080] sm:$0xff]  ;;  %v4400_v0 = vpack.c.bf16 %v1938_v45, %v1906_v37 }
 0x44f   : > { %4107 = vmatpush1.bf16.msra.mxu0 %v4106_v33  ;;  %v4192_v33 = vpack.c.bf16 %v1676_v3, %v1644_v6  ;;  %v1970_v6 = vld [vmem:[%s9458_s6 + $0x1288] sm:$0xff]  ;;  %v4402_v8 = vpack.c.bf16 %v1937_v7, %v1905_v9  ;;  %v2257_v9 = vld [vmem:[%s9458_s6 + $0x1b80] sm:$0xff]  ;;  %v2316_v7 = vld [vmem:[%s9458_s6 + $0x1d58] sm:$0xff] }
 0x450   : > { %4299 = vmatpush1.bf16.msra.mxu1 %v4298_v22  ;;  %4109 = vmatprep.subr.bf16.mxu0 %v4108_v38  ;;  %v1643_v22 = vld [vmem:[%s9458_s6 + $0x850] sm:$0xff]  ;;  %v2002_v3 = vld [vmem:[%s9458_s6 + $0x1388] sm:$0xff] }
 0x451   : > { %4301 = vmatprep.subr.bf16.mxu1 %v4300_v57  ;;  %v1675_v38 = vld [vmem:[%s9458_s6 + $0x950] sm:$0xff]  ;;  %v1708_v57 = vld [vmem:[%s9458_s6 + $0xa58] sm:$0xff] }
 0x452   : > { %v4194_v41 = vpack.c.bf16 %v1675_v38, %v1643_v22  ;;  %v1969_v22 = vld [vmem:[%s9458_s6 + $0x1280] sm:$0xff]  ;;  %v4404_v38 = vpack.c.bf16 %v2002_v3, %v1970_v6 }
 0x453   : > { %4111 = vmatpush1.bf16.msra.mxu0 %v4110_v51  ;;  %v4196_v51 = vpack.c.bf16 %v1740_v20, %v1708_v57  ;;  %v2034_v57 = vld [vmem:[%s9458_s6 + $0x1488] sm:$0xff]  ;;  %v4406_v2 = vpack.c.bf16 %v2001_v24, %v1969_v22  ;;  %v2321_v22 = vld [vmem:[%s9458_s6 + $0x1d80] sm:$0xff]  ;;  %v2380_v24 = vld [vmem:[%s9458_s6 + $0x1f58] sm:$0xff] }
 0x454   : > { %4303 = vmatpush1.bf16.msra.mxu1 %v4302_v55  ;;  %4177 = vmatprep.subr.bf16.mxu0 %v4176_v47  ;;  %v1707_v55 = vld [vmem:[%s9458_s6 + $0xa50] sm:$0xff]  ;;  %v2066_v20 = vld [vmem:[%s9458_s6 + $0x1588] sm:$0xff] }
 0x455   : > { %4369 = vmatprep.subr.bf16.mxu1 %v4368_v32  ;;  %v1739_v47 = vld [vmem:[%s9458_s6 + $0xb50] sm:$0xff]  ;;  %v1745_v32 = vld [vmem:[%s9458_s6 + $0xb80] sm:$0xff] }
 0x456   : > { %2679 = vmatmul.mubr.f32.vlgmr.msra.gmra.mrb[20].mxu0 %v6747_v19  ;;  %v4390_v54 = vpack.c.bf16 %v1745_v32, %v1713_v36  ;;  %v2065_v36 = vld [vmem:[%s9458_s6 + $0x1580] sm:$0xff]  ;;  %v2124_v32 = vld [vmem:[%s9458_s6 + $0x1758] sm:$0xff] }
 0x457   : > { %2892 = vmatmul.mubr.f32.vlgmr.msra.gmra.mrb[6].mxu1 %v6747_v19  ;;  %4179 = vmatpush1.bf16.msra.mxu0 %v4178_v63  ;;  %v4198_v63 = vpack.c.bf16 %v1739_v47, %v1707_v55  ;;  %v2033_v55 = vld [vmem:[%s9458_s6 + $0x1480] sm:$0xff]  ;;  %v4408_v47 = vpack.c.bf16 %v2066_v20, %v2034_v57 }
 0x458   : > { %2820 = vmatprep.mubr.f32.mxu0 %v6739_v28  ;;  %4371 = vmatpush1.bf16.msra.mxu1 %v4370_v48  ;;  %v1771_v48 = vld [vmem:[%s9458_s6 + $0xc50] sm:$0xff]  ;;  %v4410_v14 = vpack.c.bf16 %v2065_v36, %v2033_v55  ;;  %v2385_v55 = vld [vmem:[%s9458_s6 + $0x1f80] sm:$0xff]  ;;  %v1424_v36 = vld [vmem:[%s9458_s6 + $0x178] sm:$0xff] }
 0x459   : > { %3033 = vmatprep.mubr.f32.mxu1 %v6739_v28  ;;  %4181 = vmatprep.subr.bf16.mxu0 %v4180_v59  ;;  %v1809_v59 = vld [vmem:[%s9458_s6 + $0xd80] sm:$0xff]  ;;  %v4202_v17 = vpack.c.bf16 %v1803_v46, %v1771_v48  ;;  %v4412_v46 = vpack.c.bf16 %v2130_v39, %v2098_v25 }
 0x45a   : > { %4373 = vmatprep.subr.bf16.mxu1 %v4372_v49  ;;  %v1874_v49 = vld [vmem:[%s9458_s6 + $0xf88] sm:$0xff]  ;;  %v4394_v18 = vpack.c.bf16 %v1809_v59, %v1777_v42  ;;  %v2097_v48 = vld [vmem:[%s9458_s6 + $0x1680] sm:$0xff]  ;;  %v2188_v59 = vld [vmem:[%s9458_s6 + $0x1958] sm:$0xff] }
 0x45b   : > { %4183 = vmatpush1.bf16.msra.mxu0 %v4182_v23  ;;  %v4204_v23 = vpack.c.bf16 %v1868_v30, %v1836_v13  ;;  %v4396_v16 = vpack.c.bf16 %v1874_v49, %v1842_v11  ;;  %v2129_v42 = vld [vmem:[%s9458_s6 + $0x1780] sm:$0xff]  ;;  %v2162_v13 = vld [vmem:[%s9458_s6 + $0x1888] sm:$0xff] }
 0x45c   : > { %4375 = vmatpush1.bf16.msra.mxu1 %v4374_v27  ;;  %4185 = vmatprep.subr.bf16.mxu0 %v4184_v40  ;;  %v1835_v27 = vld [vmem:[%s9458_s6 + $0xe50] sm:$0xff]  ;;  %v2194_v30 = vld [vmem:[%s9458_s6 + $0x1988] sm:$0xff]  ;;  %v4414_v49 = vpack.c.bf16 %v2129_v42, %v2097_v48  ;;  %v1429_v48 = vld [vmem:[%s9458_s6 + $0x1a0] sm:$0xff] }
 0x45d   : > { %4377 = vmatprep.subr.bf16.mxu1 %v4376_v1  ;;  %v1867_v40 = vld [vmem:[%s9458_s6 + $0xf50] sm:$0xff]  ;;  %v1900_v1 = vld [vmem:[%s9458_s6 + $0x1058] sm:$0xff] }
 0x45e   : > { %v4206_v43 = vpack.c.bf16 %v1867_v40, %v1835_v27  ;;  %v2161_v27 = vld [vmem:[%s9458_s6 + $0x1880] sm:$0xff]  ;;  %v4416_v40 = vpack.c.bf16 %v2194_v30, %v2162_v13  ;;  %v1488_v42 = vld [vmem:[%s9458_s6 + $0x378] sm:$0xff]  ;;  %v1494_v13 = vld [vmem:[%s9458_s6 + $0x3a8] sm:$0xff] }
 0x45f   : > { %4187 = vmatpush1.bf16.msra.mxu0 %v4186_v56  ;;  %v4208_v56 = vpack.c.bf16 %v1932_v50, %v1900_v1  ;;  %v2226_v1 = vld [vmem:[%s9458_s6 + $0x1a88] sm:$0xff]  ;;  %v4418_v45 = vpack.c.bf16 %v2193_v44, %v2161_v27  ;;  %v1520_v27 = vld [vmem:[%s9458_s6 + $0x478] sm:$0xff] }
 0x460   : > { %4379 = vmatpush1.bf16.msra.mxu1 %v4378_v12  ;;  %4189 = vmatprep.subr.bf16.mxu0 %v4188_v26  ;;  %v1899_v12 = vld [vmem:[%s9458_s6 + $0x1050] sm:$0xff]  ;;  %v2258_v50 = vld [vmem:[%s9458_s6 + $0x1b88] sm:$0xff] }
 0x461   : > { %4381 = vmatprep.subr.bf16.mxu1 %v4380_v52  ;;  %v1931_v26 = vld [vmem:[%s9458_s6 + $0x1150] sm:$0xff]  ;;  %v1964_v52 = vld [vmem:[%s9458_s6 + $0x1258] sm:$0xff] }
 0x462   : > { %v4210_v62 = vpack.c.bf16 %v1931_v26, %v1899_v12  ;;  %v2225_v12 = vld [vmem:[%s9458_s6 + $0x1a80] sm:$0xff]  ;;  %v4420_v26 = vpack.c.bf16 %v2258_v50, %v2226_v1 }
 0x463   : > { %4191 = vmatpush1.bf16.msra.mxu0 %v4190_v29  ;;  %v4212_v29 = vpack.c.bf16 %v1996_v53, %v1964_v52  ;;  %v2290_v52 = vld [vmem:[%s9458_s6 + $0x1c88] sm:$0xff]  ;;  %v4422_v3 = vpack.c.bf16 %v2257_v9, %v2225_v12  ;;  %v1557_v12 = vld [vmem:[%s9458_s6 + $0x5a0] sm:$0xff]  ;;  %v1616_v9 = vld [vmem:[%s9458_s6 + $0x778] sm:$0xff] }
 0x464   : > { %4383 = vmatpush1.bf16.msra.mxu1 %v4382_v21  ;;  %4193 = vmatprep.subr.bf16.mxu0 %v4192_v33  ;;  %v1963_v21 = vld [vmem:[%s9458_s6 + $0x1250] sm:$0xff]  ;;  %v2322_v53 = vld [vmem:[%s9458_s6 + $0x1d88] sm:$0xff] }
 0x465   : > { %4385 = vmatprep.subr.bf16.mxu1 %v4384_v58  ;;  %v1995_v33 = vld [vmem:[%s9458_s6 + $0x1350] sm:$0xff]  ;;  %v2028_v58 = vld [vmem:[%s9458_s6 + $0x1458] sm:$0xff] }
 0x466   : > { %v4214_v35 = vpack.c.bf16 %v1995_v33, %v1963_v21  ;;  %v2289_v21 = vld [vmem:[%s9458_s6 + $0x1c80] sm:$0xff]  ;;  %v4424_v33 = vpack.c.bf16 %v2322_v53, %v2290_v52 }
 0x467   : > { %4195 = vmatpush1.bf16.msra.mxu0 %v4194_v41  ;;  %v4216_v41 = vpack.c.bf16 %v2060_v31, %v2028_v58  ;;  %v2354_v58 = vld [vmem:[%s9458_s6 + $0x1e88] sm:$0xff]  ;;  %v4426_v20 = vpack.c.bf16 %v2321_v22, %v2289_v21  ;;  %v1621_v21 = vld [vmem:[%s9458_s6 + $0x7a0] sm:$0xff]  ;;  %v1680_v22 = vld [vmem:[%s9458_s6 + $0x978] sm:$0xff] }
 0x468   : > { %4387 = vmatpush1.bf16.msra.mxu1 %v4386_v5  ;;  %4197 = vmatprep.subr.bf16.mxu0 %v4196_v51  ;;  %v2027_v5 = vld [vmem:[%s9458_s6 + $0x1450] sm:$0xff]  ;;  %v2386_v31 = vld [vmem:[%s9458_s6 + $0x1f88] sm:$0xff] }
 0x469   : > { %4389 = vmatprep.subr.bf16.mxu1 %v4388_v15  ;;  %v2059_v51 = vld [vmem:[%s9458_s6 + $0x1550] sm:$0xff]  ;;  %v2092_v15 = vld [vmem:[%s9458_s6 + $0x1658] sm:$0xff] }
 0x46a   : > { %v4218_v60 = vpack.c.bf16 %v2059_v51, %v2027_v5  ;;  %v2353_v5 = vld [vmem:[%s9458_s6 + $0x1e80] sm:$0xff]  ;;  %v4428_v51 = vpack.c.bf16 %v2386_v31, %v2354_v58 }
 0x46b   : > { %4199 = vmatpush1.bf16.msra.mxu0 %v4198_v63  ;;  %v4220_v63 = vpack.c.bf16 %v2124_v32, %v2092_v15  ;;  %v1398_v15 = vld [vmem:[%s9458_s6 + $0xa8] sm:$0xff]  ;;  %v4430_v39 = vpack.c.bf16 %v2385_v55, %v2353_v5  ;;  %v1685_v5 = vld [vmem:[%s9458_s6 + $0x9a0] sm:$0xff]  ;;  %v1744_v55 = vld [vmem:[%s9458_s6 + $0xb78] sm:$0xff] }
 0x46c   : > { %4391 = vmatpush1.bf16.msra.mxu1 %v4390_v54  ;;  %4201 = vmatprep.subr.bf16.mxu0 %v4200_v4  ;;  %v2091_v54 = vld [vmem:[%s9458_s6 + $0x1650] sm:$0xff]  ;;  %v1430_v32 = vld [vmem:[%s9458_s6 + $0x1a8] sm:$0xff] }
 0x46d   : > { %4393 = vmatprep.subr.bf16.mxu1 %v4392_v34  ;;  %v2123_v4 = vld [vmem:[%s9458_s6 + $0x1750] sm:$0xff]  ;;  %v2156_v34 = vld [vmem:[%s9458_s6 + $0x1858] sm:$0xff] }
 0x46e   : > { %v4222_v11 = vpack.c.bf16 %v2123_v4, %v2091_v54  ;;  %v4496_v54 = vpack.c.bf16 %v1430_v32, %v1398_v15  ;;  %v1397_v4 = vld [vmem:[%s9458_s6 + $0xa0] sm:$0xff] }
 0x46f   : > { %4203 = vmatpush1.bf16.msra.mxu0 %v4202_v17  ;;  %v4224_v17 = vpack.c.bf16 %v2188_v59, %v2156_v34  ;;  %v1462_v59 = vld [vmem:[%s9458_s6 + $0x2a8] sm:$0xff]  ;;  %v4498_v30 = vpack.c.bf16 %v1429_v48, %v1397_v4  ;;  %v1776_v4 = vld [vmem:[%s9458_s6 + $0xc78] sm:$0xff] }
 0x470   : > { %4395 = vmatpush1.bf16.msra.mxu1 %v4394_v18  ;;  %4205 = vmatprep.subr.bf16.mxu0 %v4204_v23  ;;  %v2155_v18 = vld [vmem:[%s9458_s6 + $0x1850] sm:$0xff]  ;;  %v4500_v44 = vpack.c.bf16 %v1494_v13, %v1462_v59  ;;  %v1808_v48 = vld [vmem:[%s9458_s6 + $0xd78] sm:$0xff] }
 0x471   : > { %4397 = vmatprep.subr.bf16.mxu1 %v4396_v16  ;;  %v2187_v23 = vld [vmem:[%s9458_s6 + $0x1950] sm:$0xff]  ;;  %v2220_v16 = vld [vmem:[%s9458_s6 + $0x1a58] sm:$0xff]  ;;  %v4328_v13 = vpack.c.bf16 %v1808_v48, %v1776_v4  ;;  %v2037_v48 = vld [vmem:[%s9458_s6 + $0x14a0] sm:$0xff] }
 0x472   : > { %v4226_v37 = vpack.c.bf16 %v2187_v23, %v2155_v18  ;;  %v1493_v23 = vld [vmem:[%s9458_s6 + $0x3a0] sm:$0xff]  ;;  %v2063_v4 = vld [vmem:[%s9458_s6 + $0x1570] sm:$0xff] }
 0x473   : > { %4207 = vmatpush1.bf16.msra.mxu0 %v4206_v43  ;;  %v4228_v43 = vpack.c.bf16 %v2252_v61, %v2220_v16  ;;  %v1526_v16 = vld [vmem:[%s9458_s6 + $0x4a8] sm:$0xff] }
 0x474   : > { %4399 = vmatpush1.bf16.msra.mxu1 %v4398_v10  ;;  %4209 = vmatprep.subr.bf16.mxu0 %v4208_v56  ;;  %v2219_v10 = vld [vmem:[%s9458_s6 + $0x1a50] sm:$0xff]  ;;  %v1558_v61 = vld [vmem:[%s9458_s6 + $0x5a8] sm:$0xff] }
 0x475   : > { %4401 = vmatprep.subr.bf16.mxu1 %v4400_v0  ;;  %v2251_v56 = vld [vmem:[%s9458_s6 + $0x1b50] sm:$0xff]  ;;  %v2284_v0 = vld [vmem:[%s9458_s6 + $0x1c58] sm:$0xff] }
 0x476   : > { %v4230_v6 = vpack.c.bf16 %v2251_v56, %v2219_v10  ;;  %v1525_v10 = vld [vmem:[%s9458_s6 + $0x4a0] sm:$0xff]  ;;  %v4504_v56 = vpack.c.bf16 %v1558_v61, %v1526_v16 }
 0x477   : > { %4211 = vmatpush1.bf16.msra.mxu0 %v4210_v62  ;;  %v4232_v62 = vpack.c.bf16 %v2316_v7, %v2284_v0  ;;  %v1590_v0 = vld [vmem:[%s9458_s6 + $0x6a8] sm:$0xff]  ;;  %v4506_v53 = vpack.c.bf16 %v1557_v12, %v1525_v10  ;;  %v1839_v12 = vld [vmem:[%s9458_s6 + $0xe70] sm:$0xff] }
 0x478   : > { %4403 = vmatpush1.bf16.msra.mxu1 %v4402_v8  ;;  %4213 = vmatprep.subr.bf16.mxu0 %v4212_v29  ;;  %v2283_v8 = vld [vmem:[%s9458_s6 + $0x1c50] sm:$0xff]  ;;  %v1622_v7 = vld [vmem:[%s9458_s6 + $0x7a8] sm:$0xff] }
 0x479   : > { %4405 = vmatprep.subr.bf16.mxu1 %v4404_v38  ;;  %v2315_v29 = vld [vmem:[%s9458_s6 + $0x1d50] sm:$0xff]  ;;  %v2348_v38 = vld [vmem:[%s9458_s6 + $0x1e58] sm:$0xff] }
 0x47a   : > { %v4234_v57 = vpack.c.bf16 %v2315_v29, %v2283_v8  ;;  %v1589_v8 = vld [vmem:[%s9458_s6 + $0x6a0] sm:$0xff]  ;;  %v4508_v29 = vpack.c.bf16 %v1622_v7, %v1590_v0 }
 0x47b   : > { %4215 = vmatpush1.bf16.msra.mxu0 %v4214_v35  ;;  %v4236_v35 = vpack.c.bf16 %v2380_v24, %v2348_v38  ;;  %v1654_v38 = vld [vmem:[%s9458_s6 + $0x8a8] sm:$0xff]  ;;  %v4510_v31 = vpack.c.bf16 %v1621_v21, %v1589_v8  ;;  %v1877_v7 = vld [vmem:[%s9458_s6 + $0xfa0] sm:$0xff]  ;;  %v1903_v21 = vld [vmem:[%s9458_s6 + $0x1070] sm:$0xff] }
 0x47c   : > { %4407 = vmatpush1.bf16.msra.mxu1 %v4406_v2  ;;  %4217 = vmatprep.subr.bf16.mxu0 %v4216_v41  ;;  %v2347_v2 = vld [vmem:[%s9458_s6 + $0x1e50] sm:$0xff]  ;;  %v1686_v24 = vld [vmem:[%s9458_s6 + $0x9a8] sm:$0xff] }
 0x47d   : > { %4409 = vmatprep.subr.bf16.mxu1 %v4408_v47  ;;  %v2379_v41 = vld [vmem:[%s9458_s6 + $0x1f50] sm:$0xff]  ;;  %v1392_v47 = vld [vmem:[%s9458_s6 + $0x78] sm:$0xff] }
 0x47e   : > { %v4238_v25 = vpack.c.bf16 %v2379_v41, %v2347_v2  ;;  %v1653_v2 = vld [vmem:[%s9458_s6 + $0x8a0] sm:$0xff]  ;;  %v4512_v41 = vpack.c.bf16 %v1686_v24, %v1654_v38 }
 0x47f   : > { %4219 = vmatpush1.bf16.msra.mxu0 %v4218_v60  ;;  %v4304_v60 = vpack.c.bf16 %v1424_v36, %v1392_v47  ;;  %v1718_v47 = vld [vmem:[%s9458_s6 + $0xaa8] sm:$0xff]  ;;  %v4514_v32 = vpack.c.bf16 %v1685_v5, %v1653_v2  ;;  %v1941_v24 = vld [vmem:[%s9458_s6 + $0x11a0] sm:$0xff]  ;;  %v1967_v5 = vld [vmem:[%s9458_s6 + $0x1270] sm:$0xff] }
 0x480   : > { %4411 = vmatpush1.bf16.msra.mxu1 %v4410_v14  ;;  %4221 = vmatprep.subr.bf16.mxu0 %v4220_v63  ;;  %v1391_v14 = vld [vmem:[%s9458_s6 + $0x70] sm:$0xff]  ;;  %v1750_v36 = vld [vmem:[%s9458_s6 + $0xba8] sm:$0xff] }
 0x481   : > { %4413 = vmatprep.subr.bf16.mxu1 %v4412_v46  ;;  %v1423_v63 = vld [vmem:[%s9458_s6 + $0x170] sm:$0xff]  ;;  %v1456_v46 = vld [vmem:[%s9458_s6 + $0x278] sm:$0xff] }
 0x482   : > { %v4306_v34 = vpack.c.bf16 %v1423_v63, %v1391_v14  ;;  %v4308_v18 = vpack.c.bf16 %v1488_v42, %v1456_v46  ;;  %v1717_v14 = vld [vmem:[%s9458_s6 + $0xaa0] sm:$0xff]  ;;  %v4516_v63 = vpack.c.bf16 %v1750_v36, %v1718_v47  ;;  %v1782_v46 = vld [vmem:[%s9458_s6 + $0xca8] sm:$0xff] }
 0x483   : > { %4223 = vmatpush1.bf16.msra.mxu0 %v4222_v11  ;;  %v1455_v11 = vld [vmem:[%s9458_s6 + $0x270] sm:$0xff]  ;;  %v1814_v42 = vld [vmem:[%s9458_s6 + $0xda8] sm:$0xff]  ;;  %v2005_v36 = vld [vmem:[%s9458_s6 + $0x13a0] sm:$0xff] }
 0x484   : > { %4415 = vmatpush1.bf16.msra.mxu1 %v4414_v49  ;;  %4225 = vmatprep.subr.bf16.mxu0 %v4224_v17  ;;  %v1487_v49 = vld [vmem:[%s9458_s6 + $0x370] sm:$0xff]  ;;  %v1461_v17 = vld [vmem:[%s9458_s6 + $0x2a0] sm:$0xff] }
 0x485   : > { %4417 = vmatprep.subr.bf16.mxu1 %v4416_v40  ;;  %v1552_v40 = vld [vmem:[%s9458_s6 + $0x578] sm:$0xff]  ;;  %v4310_v1 = vpack.c.bf16 %v1487_v49, %v1455_v11  ;;  %v4502_v50 = vpack.c.bf16 %v1493_v23, %v1461_v17  ;;  %v1807_v11 = vld [vmem:[%s9458_s6 + $0xd70] sm:$0xff]  ;;  %v1781_v49 = vld [vmem:[%s9458_s6 + $0xca0] sm:$0xff]  ;;  %v4520_v23 = vpack.c.bf16 %v1814_v42, %v1782_v46 }
 0x486   : > { %v2069_v42 = vld [vmem:[%s9458_s6 + $0x15a0] sm:$0xff] }
 0x487   : > { %4227 = vmatpush1.bf16.msra.mxu0 %v4226_v37  ;;  %v4312_v37 = vpack.c.bf16 %v1552_v40, %v1520_v27  ;;  %v1813_v27 = vld [vmem:[%s9458_s6 + $0xda0] sm:$0xff]  ;;  %v1840_v40 = vld [vmem:[%s9458_s6 + $0xe78] sm:$0xff] }
 0x488   : > { %4419 = vmatpush1.bf16.msra.mxu1 %v4418_v45  ;;  %4229 = vmatprep.subr.bf16.mxu0 %v4228_v43  ;;  %v1519_v45 = vld [vmem:[%s9458_s6 + $0x470] sm:$0xff]  ;;  %v4522_v10 = vpack.c.bf16 %v1813_v27, %v1781_v49  ;;  %v4538_v49 = vpack.c.bf16 %v2069_v42, %v2037_v48  ;;  %v2101_v27 = vld [vmem:[%s9458_s6 + $0x16a0] sm:$0xff]  ;;  %v1428_v42 = vld [vmem:[%s9458_s6 + $0x198] sm:$0xff] }
 0x489   : > { %4421 = vmatprep.subr.bf16.mxu1 %v4420_v26  ;;  %v1551_v43 = vld [vmem:[%s9458_s6 + $0x570] sm:$0xff]  ;;  %v1584_v26 = vld [vmem:[%s9458_s6 + $0x678] sm:$0xff]  ;;  %v2389_v48 = vld [vmem:[%s9458_s6 + $0x1fa0] sm:$0xff] }
 0x48a   : > { %v4314_v52 = vpack.c.bf16 %v1551_v43, %v1519_v45 }
 0x48b   : > { %4231 = vmatpush1.bf16.msra.mxu0 %v4230_v6  ;;  %v4316_v6 = vpack.c.bf16 %v1616_v9, %v1584_v26  ;;  %v1871_v26 = vld [vmem:[%s9458_s6 + $0xf70] sm:$0xff]  ;;  %v1845_v9 = vld [vmem:[%s9458_s6 + $0xea0] sm:$0xff] }
 0x48c   : > { %4423 = vmatpush1.bf16.msra.mxu1 %v4422_v3  ;;  %4233 = vmatprep.subr.bf16.mxu0 %v4232_v62  ;;  %v1583_v3 = vld [vmem:[%s9458_s6 + $0x670] sm:$0xff]  ;;  %v4526_v8 = vpack.c.bf16 %v1877_v7, %v1845_v9  ;;  %v2197_v9 = vld [vmem:[%s9458_s6 + $0x19a0] sm:$0xff]  ;;  %v2256_v7 = vld [vmem:[%s9458_s6 + $0x1b78] sm:$0xff] }
 0x48d   : > { %4425 = vmatprep.subr.bf16.mxu1 %v4424_v33  ;;  %v1615_v62 = vld [vmem:[%s9458_s6 + $0x770] sm:$0xff]  ;;  %v1648_v33 = vld [vmem:[%s9458_s6 + $0x878] sm:$0xff] }
 0x48e   : > { %v4318_v58 = vpack.c.bf16 %v1615_v62, %v1583_v3  ;;  %v1942_v3 = vld [vmem:[%s9458_s6 + $0x11a8] sm:$0xff]  ;;  %v4334_v62 = vpack.c.bf16 %v1871_v26, %v1839_v12  ;;  %v2165_v12 = vld [vmem:[%s9458_s6 + $0x18a0] sm:$0xff] }
 0x48f   : > { %4235 = vmatpush1.bf16.msra.mxu0 %v4234_v57  ;;  %v4320_v57 = vpack.c.bf16 %v1680_v22, %v1648_v33  ;;  %v1935_v33 = vld [vmem:[%s9458_s6 + $0x1170] sm:$0xff]  ;;  %v1909_v22 = vld [vmem:[%s9458_s6 + $0x10a0] sm:$0xff] }
 0x490   : > { %4427 = vmatpush1.bf16.msra.mxu1 %v4426_v20  ;;  %4237 = vmatprep.subr.bf16.mxu0 %v4236_v35  ;;  %v1647_v20 = vld [vmem:[%s9458_s6 + $0x870] sm:$0xff]  ;;  %v4530_v2 = vpack.c.bf16 %v1941_v24, %v1909_v22  ;;  %v2261_v22 = vld [vmem:[%s9458_s6 + $0x1ba0] sm:$0xff]  ;;  %v2320_v24 = vld [vmem:[%s9458_s6 + $0x1d78] sm:$0xff] }
 0x491   : > { %4429 = vmatprep.subr.bf16.mxu1 %v4428_v51  ;;  %v1679_v35 = vld [vmem:[%s9458_s6 + $0x970] sm:$0xff]  ;;  %v1712_v51 = vld [vmem:[%s9458_s6 + $0xa78] sm:$0xff] }
 0x492   : > { %v4322_v15 = vpack.c.bf16 %v1679_v35, %v1647_v20  ;;  %v2006_v20 = vld [vmem:[%s9458_s6 + $0x13a8] sm:$0xff]  ;;  %v4338_v35 = vpack.c.bf16 %v1935_v33, %v1903_v21  ;;  %v2229_v21 = vld [vmem:[%s9458_s6 + $0x1aa0] sm:$0xff] }
 0x493   : > { %4239 = vmatpush1.bf16.msra.mxu0 %v4238_v25  ;;  %v4324_v25 = vpack.c.bf16 %v1744_v55, %v1712_v51  ;;  %v1999_v51 = vld [vmem:[%s9458_s6 + $0x1370] sm:$0xff]  ;;  %v1973_v55 = vld [vmem:[%s9458_s6 + $0x12a0] sm:$0xff] }
 0x494   : > { %4431 = vmatpush1.bf16.msra.mxu1 %v4430_v39  ;;  %4305 = vmatprep.subr.bf16.mxu0 %v4304_v60  ;;  %v1711_v39 = vld [vmem:[%s9458_s6 + $0xa70] sm:$0xff] }
 0x495   : > { %4497 = vmatprep.subr.bf16.mxu1 %v4496_v54  ;;  %v1743_v60 = vld [vmem:[%s9458_s6 + $0xb70] sm:$0xff]  ;;  %v1749_v54 = vld [vmem:[%s9458_s6 + $0xba0] sm:$0xff] }
 0x496   : > { %2821 = vmatmul.mubr.f32.vlgmr.msra.gmra.mrb[22].mxu0 %v6747_v19  ;;  %v4518_v59 = vpack.c.bf16 %v1749_v54, %v1717_v14  ;;  %v4534_v14 = vpack.c.bf16 %v2005_v36, %v1973_v55  ;;  %v2031_v54 = vld [vmem:[%s9458_s6 + $0x1470] sm:$0xff]  ;;  %v2325_v55 = vld [vmem:[%s9458_s6 + $0x1da0] sm:$0xff]  ;;  %v2384_v36 = vld [vmem:[%s9458_s6 + $0x1f78] sm:$0xff] }
 0x497   : > { %3034 = vmatmul.mubr.f32.vlgmr.msra.gmra.mrb[8].mxu1 %v6747_v19  ;;  %4307 = vmatpush1.bf16.msra.mxu0 %v4306_v34  ;;  %v4326_v34 = vpack.c.bf16 %v1743_v60, %v1711_v39  ;;  %v2070_v39 = vld [vmem:[%s9458_s6 + $0x15a8] sm:$0xff]  ;;  %v4342_v60 = vpack.c.bf16 %v1999_v51, %v1967_v5  ;;  %v2293_v5 = vld [vmem:[%s9458_s6 + $0x1ca0] sm:$0xff] }
 0x498   : > { %2962 = vmatprep.mubr.f32.mxu0 %v6739_v28  ;;  %4499 = vmatpush1.bf16.msra.mxu1 %v4498_v30  ;;  %v1775_v30 = vld [vmem:[%s9458_s6 + $0xc70] sm:$0xff] }
 0x499   : > { %3175 = vmatprep.mubr.f32.mxu1 %v6739_v28  ;;  %4309 = vmatprep.subr.bf16.mxu0 %v4308_v18  ;;  %v4330_v43 = vpack.c.bf16 %v1807_v11, %v1775_v30  ;;  %v2134_v30 = vld [vmem:[%s9458_s6 + $0x17a8] sm:$0xff]  ;;  %v4346_v11 = vpack.c.bf16 %v2063_v4, %v2031_v54  ;;  %v2357_v54 = vld [vmem:[%s9458_s6 + $0x1ea0] sm:$0xff] }
 0x49a   : > { %4501 = vmatprep.subr.bf16.mxu1 %v4500_v44  ;;  %v1872_v44 = vld [vmem:[%s9458_s6 + $0xf78] sm:$0xff] }
 0x49b   : > { %4311 = vmatpush1.bf16.msra.mxu0 %v4310_v1  ;;  %v1846_v1 = vld [vmem:[%s9458_s6 + $0xea8] sm:$0xff] }
 0x49c   : > { %4503 = vmatpush1.bf16.msra.mxu1 %v4502_v50  ;;  %4313 = vmatprep.subr.bf16.mxu0 %v4312_v37  ;;  %v1878_v50 = vld [vmem:[%s9458_s6 + $0xfa8] sm:$0xff] }
 0x49d   : > { %4505 = vmatprep.subr.bf16.mxu1 %v4504_v56  ;;  %v4332_v56 = vpack.c.bf16 %v1872_v44, %v1840_v40  ;;  %v4524_v0 = vpack.c.bf16 %v1878_v50, %v1846_v1  ;;  %v2133_v44 = vld [vmem:[%s9458_s6 + $0x17a0] sm:$0xff]  ;;  %v2166_v1 = vld [vmem:[%s9458_s6 + $0x18a8] sm:$0xff] }
 0x49e   : > { %v2198_v50 = vld [vmem:[%s9458_s6 + $0x19a8] sm:$0xff] }
 0x49f   : > { %4315 = vmatpush1.bf16.msra.mxu0 %v4314_v52  ;;  %v1904_v52 = vld [vmem:[%s9458_s6 + $0x1078] sm:$0xff]  ;;  %v4544_v26 = vpack.c.bf16 %v2198_v50, %v2166_v1  ;;  %v1498_v1 = vld [vmem:[%s9458_s6 + $0x3c8] sm:$0xff] }
 0x4a0   : > { %4507 = vmatpush1.bf16.msra.mxu1 %v4506_v53  ;;  %4317 = vmatprep.subr.bf16.mxu0 %v4316_v6  ;;  %v1936_v53 = vld [vmem:[%s9458_s6 + $0x1178] sm:$0xff]  ;;  %v1910_v6 = vld [vmem:[%s9458_s6 + $0x10a8] sm:$0xff] }
 0x4a1   : > { %4509 = vmatprep.subr.bf16.mxu1 %v4508_v29  ;;  %v4336_v29 = vpack.c.bf16 %v1936_v53, %v1904_v52  ;;  %v4528_v38 = vpack.c.bf16 %v1942_v3, %v1910_v6  ;;  %v2230_v52 = vld [vmem:[%s9458_s6 + $0x1aa8] sm:$0xff]  ;;  %v4546_v3 = vpack.c.bf16 %v2197_v9, %v2165_v12  ;;  %v1524_v12 = vld [vmem:[%s9458_s6 + $0x498] sm:$0xff] }
 0x4a2   : > { %v2262_v53 = vld [vmem:[%s9458_s6 + $0x1ba8] sm:$0xff] }
 0x4a3   : > { %4319 = vmatpush1.bf16.msra.mxu0 %v4318_v58  ;;  %v1968_v58 = vld [vmem:[%s9458_s6 + $0x1278] sm:$0xff]  ;;  %v4548_v33 = vpack.c.bf16 %v2262_v53, %v2230_v52 }
 0x4a4   : > { %4511 = vmatpush1.bf16.msra.mxu1 %v4510_v31  ;;  %4321 = vmatprep.subr.bf16.mxu0 %v4320_v57  ;;  %v2000_v31 = vld [vmem:[%s9458_s6 + $0x1378] sm:$0xff]  ;;  %v1974_v57 = vld [vmem:[%s9458_s6 + $0x12a8] sm:$0xff] }
 0x4a5   : > { %4513 = vmatprep.subr.bf16.mxu1 %v4512_v41  ;;  %v4340_v41 = vpack.c.bf16 %v2000_v31, %v1968_v58  ;;  %v4532_v47 = vpack.c.bf16 %v2006_v20, %v1974_v57  ;;  %v2294_v58 = vld [vmem:[%s9458_s6 + $0x1ca8] sm:$0xff]  ;;  %v4550_v20 = vpack.c.bf16 %v2261_v22, %v2229_v21  ;;  %v1561_v21 = vld [vmem:[%s9458_s6 + $0x5c0] sm:$0xff]  ;;  %v1620_v22 = vld [vmem:[%s9458_s6 + $0x798] sm:$0xff] }
 0x4a6   : > { %v2326_v31 = vld [vmem:[%s9458_s6 + $0x1da8] sm:$0xff] }
 0x4a7   : > { %4323 = vmatpush1.bf16.msra.mxu0 %v4322_v15  ;;  %v2032_v15 = vld [vmem:[%s9458_s6 + $0x1478] sm:$0xff]  ;;  %v4552_v51 = vpack.c.bf16 %v2326_v31, %v2294_v58 }
 0x4a8   : > { %4515 = vmatpush1.bf16.msra.mxu1 %v4514_v32  ;;  %4325 = vmatprep.subr.bf16.mxu0 %v4324_v25  ;;  %v2064_v32 = vld [vmem:[%s9458_s6 + $0x1578] sm:$0xff]  ;;  %v2038_v25 = vld [vmem:[%s9458_s6 + $0x14a8] sm:$0xff] }
 0x4a9   : > { %v2467_v17 = vpop.f32.mrb[16].mxu0  ;;  %v2609_v18 = vpop.f32.mrb[2].mxu1  ;;  %4517 = vmatprep.subr.bf16.mxu1 %v4516_v63  ;;  %v4344_v63 = vpack.c.bf16 %v2064_v32, %v2032_v15  ;;  %v4536_v46 = vpack.c.bf16 %v2070_v39, %v2038_v25  ;;  %v2358_v15 = vld [vmem:[%s9458_s6 + $0x1ea8] sm:$0xff]  ;;  %v4554_v39 = vpack.c.bf16 %v2325_v55, %v2293_v5  ;;  %v1625_v5 = vld [vmem:[%s9458_s6 + $0x7c0] sm:$0xff]  ;;  %v1684_v55 = vld [vmem:[%s9458_s6 + $0x998] sm:$0xff] }
 0x4aa   : > { %v2469_v16 = vpop.f32.mrb[17].mxu0  ;;  %v2611_v61 = vpop.f32.mrb[3].mxu1  ;;  %v2390_v32 = vld [vmem:[%s9458_s6 + $0x1fa8] sm:$0xff] }
 0x4ab   : > { %v3569_v37 = vcombine.low %v2467_v17, %v2469_v16  ;;  %v3571_v45 = vcombine.low %v2609_v18, %v2611_v61  ;;  %4327 = vmatpush1.bf16.msra.mxu0 %v4326_v34  ;;  %v2096_v34 = vld [vmem:[%s9458_s6 + $0x1678] sm:$0xff]  ;;  %v2095_v18 = vld [vmem:[%s9458_s6 + $0x1670] sm:$0xff]  ;;  %v4556_v4 = vpack.c.bf16 %v2390_v32, %v2358_v15 }
 0x4ac   : > { %4519 = vmatpush1.bf16.msra.mxu1 %v4518_v59  ;;  %4329 = vmatprep.subr.bf16.mxu0 %v4328_v13  ;;  %v2128_v59 = vld [vmem:[%s9458_s6 + $0x1778] sm:$0xff]  ;;  %v2102_v13 = vld [vmem:[%s9458_s6 + $0x16a8] sm:$0xff] }
 0x4ad   : > { %3601 = vst [vmem:[%s8055_s15] sm:$0x77] %v3569_v37  ;;  %3603 = vst [vmem:[%s8055_s15 + $0x10] sm:$0x77] %v3571_v45  ;;  %4521 = vmatprep.subr.bf16.mxu1 %v4520_v23  ;;  %v4348_v17 = vpack.c.bf16 %v2128_v59, %v2096_v34  ;;  %v2127_v23 = vld [vmem:[%s9458_s6 + $0x1770] sm:$0xff]  ;;  %v4540_v40 = vpack.c.bf16 %v2134_v30, %v2102_v13  ;;  %v2160_v16 = vld [vmem:[%s9458_s6 + $0x1878] sm:$0xff]  ;;  %v4542_v45 = vpack.c.bf16 %v2133_v44, %v2101_v27 }
 0x4ae   : > { %v2192_v61 = vld [vmem:[%s9458_s6 + $0x1978] sm:$0xff]  ;;  %v4350_v37 = vpack.c.bf16 %v2127_v23, %v2095_v18  ;;  %v1402_v34 = vld [vmem:[%s9458_s6 + $0xc8] sm:$0xff]  ;;  %v4558_v30 = vpack.c.bf16 %v2389_v48, %v2357_v54  ;;  %v1401_v23 = vld [vmem:[%s9458_s6 + $0xc0] sm:$0xff] }
 0x4af   : > { %4331 = vmatpush1.bf16.msra.mxu0 %v4330_v43  ;;  %v4352_v43 = vpack.c.bf16 %v2192_v61, %v2160_v16  ;;  %v1434_v59 = vld [vmem:[%s9458_s6 + $0x1c8] sm:$0xff]  ;;  %v1433_v27 = vld [vmem:[%s9458_s6 + $0x1c0] sm:$0xff]  ;;  %v1492_v44 = vld [vmem:[%s9458_s6 + $0x398] sm:$0xff] }
 0x4b0   : > { %4523 = vmatpush1.bf16.msra.mxu1 %v4522_v10  ;;  %4333 = vmatprep.subr.bf16.mxu0 %v4332_v56  ;;  %v2159_v10 = vld [vmem:[%s9458_s6 + $0x1870] sm:$0xff]  ;;  %v4624_v18 = vpack.c.bf16 %v1434_v59, %v1402_v34  ;;  %v1466_v61 = vld [vmem:[%s9458_s6 + $0x2c8] sm:$0xff]  ;;  %v4626_v50 = vpack.c.bf16 %v1433_v27, %v1401_v23  ;;  %v1689_v54 = vld [vmem:[%s9458_s6 + $0x9c0] sm:$0xff] }
 0x4b1   : > { %4525 = vmatprep.subr.bf16.mxu1 %v4524_v0  ;;  %v2191_v56 = vld [vmem:[%s9458_s6 + $0x1970] sm:$0xff]  ;;  %v2224_v0 = vld [vmem:[%s9458_s6 + $0x1a78] sm:$0xff]  ;;  %v4628_v9 = vpack.c.bf16 %v1498_v1, %v1466_v61 }
 0x4b2   : > { %v4354_v6 = vpack.c.bf16 %v2191_v56, %v2159_v10  ;;  %v1497_v56 = vld [vmem:[%s9458_s6 + $0x3c0] sm:$0xff]  ;;  %v1748_v48 = vld [vmem:[%s9458_s6 + $0xb98] sm:$0xff] }
 0x4b3   : > { %4335 = vmatpush1.bf16.msra.mxu0 %v4334_v62  ;;  %v4356_v62 = vpack.c.bf16 %v2256_v7, %v2224_v0  ;;  %v1530_v0 = vld [vmem:[%s9458_s6 + $0x4c8] sm:$0xff]  ;;  %v1780_v23 = vld [vmem:[%s9458_s6 + $0xc98] sm:$0xff] }
 0x4b4   : > { %4527 = vmatpush1.bf16.msra.mxu1 %v4526_v8  ;;  %4337 = vmatprep.subr.bf16.mxu0 %v4336_v29  ;;  %v2223_v8 = vld [vmem:[%s9458_s6 + $0x1a70] sm:$0xff]  ;;  %v1562_v7 = vld [vmem:[%s9458_s6 + $0x5c8] sm:$0xff]  ;;  %v1812_v27 = vld [vmem:[%s9458_s6 + $0xd98] sm:$0xff] }
 0x4b5   : > { %4529 = vmatprep.subr.bf16.mxu1 %v4528_v38  ;;  %v2255_v29 = vld [vmem:[%s9458_s6 + $0x1b70] sm:$0xff]  ;;  %v2288_v38 = vld [vmem:[%s9458_s6 + $0x1c78] sm:$0xff]  ;;  %v4456_v1 = vpack.c.bf16 %v1812_v27, %v1780_v23  ;;  %v2041_v27 = vld [vmem:[%s9458_s6 + $0x14c0] sm:$0xff] }
 0x4b6   : > { %v4358_v57 = vpack.c.bf16 %v2255_v29, %v2223_v8  ;;  %v1529_v8 = vld [vmem:[%s9458_s6 + $0x4c0] sm:$0xff]  ;;  %v4632_v29 = vpack.c.bf16 %v1562_v7, %v1530_v0  ;;  %v2067_v23 = vld [vmem:[%s9458_s6 + $0x1590] sm:$0xff] }
 0x4b7   : > { %4339 = vmatpush1.bf16.msra.mxu0 %v4338_v35  ;;  %v4360_v35 = vpack.c.bf16 %v2320_v24, %v2288_v38  ;;  %v1594_v38 = vld [vmem:[%s9458_s6 + $0x6c8] sm:$0xff]  ;;  %v4634_v31 = vpack.c.bf16 %v1561_v21, %v1529_v8  ;;  %v1843_v21 = vld [vmem:[%s9458_s6 + $0xe90] sm:$0xff] }
 0x4b8   : > { %4531 = vmatpush1.bf16.msra.mxu1 %v4530_v2  ;;  %4341 = vmatprep.subr.bf16.mxu0 %v4340_v41  ;;  %v2287_v2 = vld [vmem:[%s9458_s6 + $0x1c70] sm:$0xff]  ;;  %v1626_v24 = vld [vmem:[%s9458_s6 + $0x7c8] sm:$0xff] }
 0x4b9   : > { %4533 = vmatprep.subr.bf16.mxu1 %v4532_v47  ;;  %v2319_v41 = vld [vmem:[%s9458_s6 + $0x1d70] sm:$0xff]  ;;  %v2352_v47 = vld [vmem:[%s9458_s6 + $0x1e78] sm:$0xff] }
 0x4ba   : > { %v4362_v25 = vpack.c.bf16 %v2319_v41, %v2287_v2  ;;  %v1593_v2 = vld [vmem:[%s9458_s6 + $0x6c0] sm:$0xff]  ;;  %v4636_v41 = vpack.c.bf16 %v1626_v24, %v1594_v38 }
 0x4bb   : > { %4343 = vmatpush1.bf16.msra.mxu0 %v4342_v60  ;;  %v4364_v60 = vpack.c.bf16 %v2384_v36, %v2352_v47  ;;  %v1658_v47 = vld [vmem:[%s9458_s6 + $0x8c8] sm:$0xff]  ;;  %v4638_v32 = vpack.c.bf16 %v1625_v5, %v1593_v2  ;;  %v1881_v24 = vld [vmem:[%s9458_s6 + $0xfc0] sm:$0xff]  ;;  %v1907_v5 = vld [vmem:[%s9458_s6 + $0x1090] sm:$0xff] }
 0x4bc   : > { %4535 = vmatpush1.bf16.msra.mxu1 %v4534_v14  ;;  %4345 = vmatprep.subr.bf16.mxu0 %v4344_v63  ;;  %v2351_v14 = vld [vmem:[%s9458_s6 + $0x1e70] sm:$0xff]  ;;  %v1690_v36 = vld [vmem:[%s9458_s6 + $0x9c8] sm:$0xff] }
 0x4bd   : > { %4537 = vmatprep.subr.bf16.mxu1 %v4536_v46  ;;  %v2383_v63 = vld [vmem:[%s9458_s6 + $0x1f70] sm:$0xff]  ;;  %v1396_v46 = vld [vmem:[%s9458_s6 + $0x98] sm:$0xff] }
 0x4be   : > { %v4366_v13 = vpack.c.bf16 %v2383_v63, %v2351_v14  ;;  %v1657_v14 = vld [vmem:[%s9458_s6 + $0x8c0] sm:$0xff]  ;;  %v4640_v63 = vpack.c.bf16 %v1690_v36, %v1658_v47 }
 0x4bf   : > { %4347 = vmatpush1.bf16.msra.mxu0 %v4346_v11  ;;  %v4432_v11 = vpack.c.bf16 %v1428_v42, %v1396_v46  ;;  %v1722_v46 = vld [vmem:[%s9458_s6 + $0xac8] sm:$0xff]  ;;  %v4642_v59 = vpack.c.bf16 %v1689_v54, %v1657_v14  ;;  %v1945_v36 = vld [vmem:[%s9458_s6 + $0x11c0] sm:$0xff]  ;;  %v1971_v54 = vld [vmem:[%s9458_s6 + $0x1290] sm:$0xff] }
 0x4c0   : > { %4539 = vmatpush1.bf16.msra.mxu1 %v4538_v49  ;;  %4349 = vmatprep.subr.bf16.mxu0 %v4348_v17  ;;  %v1395_v49 = vld [vmem:[%s9458_s6 + $0x90] sm:$0xff]  ;;  %v1754_v42 = vld [vmem:[%s9458_s6 + $0xbc8] sm:$0xff] }
 0x4c1   : > { %4541 = vmatprep.subr.bf16.mxu1 %v4540_v40  ;;  %v1427_v17 = vld [vmem:[%s9458_s6 + $0x190] sm:$0xff]  ;;  %v1460_v40 = vld [vmem:[%s9458_s6 + $0x298] sm:$0xff] }
 0x4c2   : > { %v4434_v16 = vpack.c.bf16 %v1427_v17, %v1395_v49  ;;  %v4436_v10 = vpack.c.bf16 %v1492_v44, %v1460_v40  ;;  %v1721_v49 = vld [vmem:[%s9458_s6 + $0xac0] sm:$0xff]  ;;  %v4644_v17 = vpack.c.bf16 %v1754_v42, %v1722_v46  ;;  %v1786_v40 = vld [vmem:[%s9458_s6 + $0xcc8] sm:$0xff] }
 0x4c3   : > { %4351 = vmatpush1.bf16.msra.mxu0 %v4350_v37  ;;  %v1459_v37 = vld [vmem:[%s9458_s6 + $0x290] sm:$0xff]  ;;  %v1818_v44 = vld [vmem:[%s9458_s6 + $0xdc8] sm:$0xff]  ;;  %v2009_v42 = vld [vmem:[%s9458_s6 + $0x13c0] sm:$0xff] }
 0x4c4   : > { %4543 = vmatpush1.bf16.msra.mxu1 %v4542_v45  ;;  %4353 = vmatprep.subr.bf16.mxu0 %v4352_v43  ;;  %v1491_v45 = vld [vmem:[%s9458_s6 + $0x390] sm:$0xff]  ;;  %v1465_v43 = vld [vmem:[%s9458_s6 + $0x2c0] sm:$0xff] }
 0x4c5   : > { %4545 = vmatprep.subr.bf16.mxu1 %v4544_v26  ;;  %v1556_v26 = vld [vmem:[%s9458_s6 + $0x598] sm:$0xff]  ;;  %v4438_v52 = vpack.c.bf16 %v1491_v45, %v1459_v37  ;;  %v4630_v53 = vpack.c.bf16 %v1497_v56, %v1465_v43  ;;  %v1811_v37 = vld [vmem:[%s9458_s6 + $0xd90] sm:$0xff]  ;;  %v1785_v45 = vld [vmem:[%s9458_s6 + $0xcc0] sm:$0xff]  ;;  %v4648_v56 = vpack.c.bf16 %v1818_v44, %v1786_v40 }
 0x4c6   : > { %v2073_v44 = vld [vmem:[%s9458_s6 + $0x15c0] sm:$0xff] }
 0x4c7   : > { %4355 = vmatpush1.bf16.msra.mxu0 %v4354_v6  ;;  %v4440_v6 = vpack.c.bf16 %v1556_v26, %v1524_v12  ;;  %v1817_v12 = vld [vmem:[%s9458_s6 + $0xdc0] sm:$0xff]  ;;  %v1844_v26 = vld [vmem:[%s9458_s6 + $0xe98] sm:$0xff] }
 0x4c8   : > { %4547 = vmatpush1.bf16.msra.mxu1 %v4546_v3  ;;  %4357 = vmatprep.subr.bf16.mxu0 %v4356_v62  ;;  %v1523_v3 = vld [vmem:[%s9458_s6 + $0x490] sm:$0xff]  ;;  %v4650_v8 = vpack.c.bf16 %v1817_v12, %v1785_v45  ;;  %v4666_v45 = vpack.c.bf16 %v2073_v44, %v2041_v27  ;;  %v2105_v12 = vld [vmem:[%s9458_s6 + $0x16c0] sm:$0xff]  ;;  %v1432_v44 = vld [vmem:[%s9458_s6 + $0x1b8] sm:$0xff] }
 0x4c9   : > { %4549 = vmatprep.subr.bf16.mxu1 %v4548_v33  ;;  %v1555_v62 = vld [vmem:[%s9458_s6 + $0x590] sm:$0xff]  ;;  %v1588_v33 = vld [vmem:[%s9458_s6 + $0x698] sm:$0xff]  ;;  %v2393_v27 = vld [vmem:[%s9458_s6 + $0x1fc0] sm:$0xff] }
 0x4ca   : > { %v4442_v58 = vpack.c.bf16 %v1555_v62, %v1523_v3 }
 0x4cb   : > { %4359 = vmatpush1.bf16.msra.mxu0 %v4358_v57  ;;  %v4444_v57 = vpack.c.bf16 %v1620_v22, %v1588_v33  ;;  %v1875_v33 = vld [vmem:[%s9458_s6 + $0xf90] sm:$0xff]  ;;  %v1849_v22 = vld [vmem:[%s9458_s6 + $0xec0] sm:$0xff] }
 0x4cc   : > { %4551 = vmatpush1.bf16.msra.mxu1 %v4550_v20  ;;  %4361 = vmatprep.subr.bf16.mxu0 %v4360_v35  ;;  %v1587_v20 = vld [vmem:[%s9458_s6 + $0x690] sm:$0xff]  ;;  %v4654_v2 = vpack.c.bf16 %v1881_v24, %v1849_v22  ;;  %v2201_v22 = vld [vmem:[%s9458_s6 + $0x19c0] sm:$0xff]  ;;  %v2260_v24 = vld [vmem:[%s9458_s6 + $0x1b98] sm:$0xff] }
 0x4cd   : > { %4553 = vmatprep.subr.bf16.mxu1 %v4552_v51  ;;  %v1619_v35 = vld [vmem:[%s9458_s6 + $0x790] sm:$0xff]  ;;  %v1652_v51 = vld [vmem:[%s9458_s6 + $0x898] sm:$0xff] }
 0x4ce   : > { %v4446_v15 = vpack.c.bf16 %v1619_v35, %v1587_v20  ;;  %v1946_v20 = vld [vmem:[%s9458_s6 + $0x11c8] sm:$0xff]  ;;  %v4462_v35 = vpack.c.bf16 %v1875_v33, %v1843_v21  ;;  %v2169_v21 = vld [vmem:[%s9458_s6 + $0x18c0] sm:$0xff] }
 0x4cf   : > { %4363 = vmatpush1.bf16.msra.mxu0 %v4362_v25  ;;  %v4448_v25 = vpack.c.bf16 %v1684_v55, %v1652_v51  ;;  %v1939_v51 = vld [vmem:[%s9458_s6 + $0x1190] sm:$0xff]  ;;  %v1913_v55 = vld [vmem:[%s9458_s6 + $0x10c0] sm:$0xff] }
 0x4d0   : > { %4555 = vmatpush1.bf16.msra.mxu1 %v4554_v39  ;;  %4365 = vmatprep.subr.bf16.mxu0 %v4364_v60  ;;  %v1651_v39 = vld [vmem:[%s9458_s6 + $0x890] sm:$0xff]  ;;  %v4658_v14 = vpack.c.bf16 %v1945_v36, %v1913_v55  ;;  %v2265_v55 = vld [vmem:[%s9458_s6 + $0x1bc0] sm:$0xff]  ;;  %v2324_v36 = vld [vmem:[%s9458_s6 + $0x1d98] sm:$0xff] }
 0x4d1   : > { %4557 = vmatprep.subr.bf16.mxu1 %v4556_v4  ;;  %v1683_v60 = vld [vmem:[%s9458_s6 + $0x990] sm:$0xff]  ;;  %v1716_v4 = vld [vmem:[%s9458_s6 + $0xa98] sm:$0xff] }
 0x4d2   : > { %v4450_v34 = vpack.c.bf16 %v1683_v60, %v1651_v39  ;;  %v2010_v39 = vld [vmem:[%s9458_s6 + $0x13c8] sm:$0xff]  ;;  %v4466_v60 = vpack.c.bf16 %v1939_v51, %v1907_v5  ;;  %v2233_v5 = vld [vmem:[%s9458_s6 + $0x1ac0] sm:$0xff] }
 0x4d3   : > { %4367 = vmatpush1.bf16.msra.mxu0 %v4366_v13  ;;  %v4452_v13 = vpack.c.bf16 %v1748_v48, %v1716_v4  ;;  %v2003_v4 = vld [vmem:[%s9458_s6 + $0x1390] sm:$0xff]  ;;  %v1977_v48 = vld [vmem:[%s9458_s6 + $0x12c0] sm:$0xff] }
 0x4d4   : > { %4559 = vmatpush1.bf16.msra.mxu1 %v4558_v30  ;;  %4433 = vmatprep.subr.bf16.mxu0 %v4432_v11  ;;  %v1715_v30 = vld [vmem:[%s9458_s6 + $0xa90] sm:$0xff] }
 0x4d5   : > { %4625 = vmatprep.subr.bf16.mxu1 %v4624_v18  ;;  %v1747_v11 = vld [vmem:[%s9458_s6 + $0xb90] sm:$0xff]  ;;  %v1753_v18 = vld [vmem:[%s9458_s6 + $0xbc0] sm:$0xff] }
 0x4d6   : > { %2963 = vmatmul.mubr.f32.vlgmr.msra.gmra.mrb[24].mxu0 %v6747_v19  ;;  %v4646_v61 = vpack.c.bf16 %v1753_v18, %v1721_v49  ;;  %v4662_v49 = vpack.c.bf16 %v2009_v42, %v1977_v48  ;;  %v2035_v18 = vld [vmem:[%s9458_s6 + $0x1490] sm:$0xff]  ;;  %v2329_v48 = vld [vmem:[%s9458_s6 + $0x1dc0] sm:$0xff]  ;;  %v2388_v42 = vld [vmem:[%s9458_s6 + $0x1f98] sm:$0xff] }
 0x4d7   : > { %3176 = vmatmul.mubr.f32.vlgmr.msra.gmra.mrb[10].mxu1 %v6747_v19  ;;  %4435 = vmatpush1.bf16.msra.mxu0 %v4434_v16  ;;  %v4454_v16 = vpack.c.bf16 %v1747_v11, %v1715_v30  ;;  %v2074_v30 = vld [vmem:[%s9458_s6 + $0x15c8] sm:$0xff]  ;;  %v4470_v11 = vpack.c.bf16 %v2003_v4, %v1971_v54  ;;  %v2297_v54 = vld [vmem:[%s9458_s6 + $0x1cc0] sm:$0xff] }
 0x4d8   : > { %3104 = vmatprep.mubr.f32.mxu0 %v6739_v28  ;;  %4627 = vmatpush1.bf16.msra.mxu1 %v4626_v50  ;;  %v1779_v50 = vld [vmem:[%s9458_s6 + $0xc90] sm:$0xff] }
 0x4d9   : > { %3317 = vmatprep.mubr.f32.mxu1 %v6739_v28  ;;  %4437 = vmatprep.subr.bf16.mxu0 %v4436_v10  ;;  %v4458_v62 = vpack.c.bf16 %v1811_v37, %v1779_v50  ;;  %v2138_v50 = vld [vmem:[%s9458_s6 + $0x17c8] sm:$0xff]  ;;  %v4474_v37 = vpack.c.bf16 %v2067_v23, %v2035_v18  ;;  %v2361_v18 = vld [vmem:[%s9458_s6 + $0x1ec0] sm:$0xff] }
 0x4da   : > { %4629 = vmatprep.subr.bf16.mxu1 %v4628_v9  ;;  %v1876_v9 = vld [vmem:[%s9458_s6 + $0xf98] sm:$0xff] }
 0x4db   : > { %4439 = vmatpush1.bf16.msra.mxu0 %v4438_v52  ;;  %v1850_v52 = vld [vmem:[%s9458_s6 + $0xec8] sm:$0xff] }
 0x4dc   : > { %4631 = vmatpush1.bf16.msra.mxu1 %v4630_v53  ;;  %4441 = vmatprep.subr.bf16.mxu0 %v4440_v6  ;;  %v1882_v53 = vld [vmem:[%s9458_s6 + $0xfc8] sm:$0xff] }
 0x4dd   : > { %4633 = vmatprep.subr.bf16.mxu1 %v4632_v29  ;;  %v4460_v29 = vpack.c.bf16 %v1876_v9, %v1844_v26  ;;  %v4652_v38 = vpack.c.bf16 %v1882_v53, %v1850_v52  ;;  %v2137_v9 = vld [vmem:[%s9458_s6 + $0x17c0] sm:$0xff]  ;;  %v2170_v52 = vld [vmem:[%s9458_s6 + $0x18c8] sm:$0xff] }
 0x4de   : > { %v2202_v53 = vld [vmem:[%s9458_s6 + $0x19c8] sm:$0xff] }
 0x4df   : > { %4443 = vmatpush1.bf16.msra.mxu0 %v4442_v58  ;;  %v1908_v58 = vld [vmem:[%s9458_s6 + $0x1098] sm:$0xff]  ;;  %v4672_v33 = vpack.c.bf16 %v2202_v53, %v2170_v52  ;;  %v1502_v52 = vld [vmem:[%s9458_s6 + $0x3e8] sm:$0xff] }
 0x4e0   : > { %4635 = vmatpush1.bf16.msra.mxu1 %v4634_v31  ;;  %4445 = vmatprep.subr.bf16.mxu0 %v4444_v57  ;;  %v1940_v31 = vld [vmem:[%s9458_s6 + $0x1198] sm:$0xff]  ;;  %v1914_v57 = vld [vmem:[%s9458_s6 + $0x10c8] sm:$0xff] }
 0x4e1   : > { %4637 = vmatprep.subr.bf16.mxu1 %v4636_v41  ;;  %v4464_v41 = vpack.c.bf16 %v1940_v31, %v1908_v58  ;;  %v4656_v47 = vpack.c.bf16 %v1946_v20, %v1914_v57  ;;  %v2234_v58 = vld [vmem:[%s9458_s6 + $0x1ac8] sm:$0xff]  ;;  %v4674_v20 = vpack.c.bf16 %v2201_v22, %v2169_v21  ;;  %v1528_v21 = vld [vmem:[%s9458_s6 + $0x4b8] sm:$0xff] }
 0x4e2   : > { %v2266_v31 = vld [vmem:[%s9458_s6 + $0x1bc8] sm:$0xff] }
 0x4e3   : > { %4447 = vmatpush1.bf16.msra.mxu0 %v4446_v15  ;;  %v1972_v15 = vld [vmem:[%s9458_s6 + $0x1298] sm:$0xff]  ;;  %v4676_v51 = vpack.c.bf16 %v2266_v31, %v2234_v58 }
 0x4e4   : > { %4639 = vmatpush1.bf16.msra.mxu1 %v4638_v32  ;;  %4449 = vmatprep.subr.bf16.mxu0 %v4448_v25  ;;  %v2004_v32 = vld [vmem:[%s9458_s6 + $0x1398] sm:$0xff]  ;;  %v1978_v25 = vld [vmem:[%s9458_s6 + $0x12c8] sm:$0xff] }
 0x4e5   : > { %4641 = vmatprep.subr.bf16.mxu1 %v4640_v63  ;;  %v4468_v63 = vpack.c.bf16 %v2004_v32, %v1972_v15  ;;  %v4660_v46 = vpack.c.bf16 %v2010_v39, %v1978_v25  ;;  %v2298_v15 = vld [vmem:[%s9458_s6 + $0x1cc8] sm:$0xff]  ;;  %v4678_v39 = vpack.c.bf16 %v2265_v55, %v2233_v5  ;;  %v1565_v5 = vld [vmem:[%s9458_s6 + $0x5e0] sm:$0xff]  ;;  %v1624_v55 = vld [vmem:[%s9458_s6 + $0x7b8] sm:$0xff] }
 0x4e6   : > { %v2330_v32 = vld [vmem:[%s9458_s6 + $0x1dc8] sm:$0xff] }
 0x4e7   : > { %4451 = vmatpush1.bf16.msra.mxu0 %v4450_v34  ;;  %v2036_v34 = vld [vmem:[%s9458_s6 + $0x1498] sm:$0xff]  ;;  %v4680_v4 = vpack.c.bf16 %v2330_v32, %v2298_v15 }
 0x4e8   : > { %4643 = vmatpush1.bf16.msra.mxu1 %v4642_v59  ;;  %4453 = vmatprep.subr.bf16.mxu0 %v4452_v13  ;;  %v2068_v59 = vld [vmem:[%s9458_s6 + $0x1598] sm:$0xff]  ;;  %v2042_v13 = vld [vmem:[%s9458_s6 + $0x14c8] sm:$0xff] }
 0x4e9   : > { %v2538_v43 = vpop.f32.mrb[18].mxu0  ;;  %v2751_v10 = vpop.f32.mrb[4].mxu1  ;;  %4645 = vmatprep.subr.bf16.mxu1 %v4644_v17  ;;  %v4472_v17 = vpack.c.bf16 %v2068_v59, %v2036_v34  ;;  %v4664_v40 = vpack.c.bf16 %v2074_v30, %v2042_v13  ;;  %v2362_v34 = vld [vmem:[%s9458_s6 + $0x1ec8] sm:$0xff]  ;;  %v4682_v30 = vpack.c.bf16 %v2329_v48, %v2297_v54  ;;  %v1629_v54 = vld [vmem:[%s9458_s6 + $0x7e0] sm:$0xff]  ;;  %v1688_v48 = vld [vmem:[%s9458_s6 + $0x9b8] sm:$0xff] }
 0x4ea   : > { %v2540_v0 = vpop.f32.mrb[19].mxu0  ;;  %v2753_v7 = vpop.f32.mrb[5].mxu1  ;;  %v2394_v59 = vld [vmem:[%s9458_s6 + $0x1fc8] sm:$0xff] }
 0x4eb   : > { %v3570_v6 = vcombine.low %v2538_v43, %v2540_v0  ;;  %v3573_v3 = vcombine.low %v2751_v10, %v2753_v7  ;;  %4455 = vmatpush1.bf16.msra.mxu0 %v4454_v16  ;;  %v2100_v16 = vld [vmem:[%s9458_s6 + $0x1698] sm:$0xff]  ;;  %v2099_v10 = vld [vmem:[%s9458_s6 + $0x1690] sm:$0xff]  ;;  %v4684_v23 = vpack.c.bf16 %v2394_v59, %v2362_v34 }
 0x4ec   : > { %4647 = vmatpush1.bf16.msra.mxu1 %v4646_v61  ;;  %4457 = vmatprep.subr.bf16.mxu0 %v4456_v1  ;;  %v2132_v61 = vld [vmem:[%s9458_s6 + $0x1798] sm:$0xff]  ;;  %v2106_v1 = vld [vmem:[%s9458_s6 + $0x16c8] sm:$0xff] }
 0x4ed   : > { %3602 = vst [vmem:[%s8055_s15 + $0x8] sm:$0x77] %v3570_v6  ;;  %3605 = vst [vmem:[%s8055_s15 + $0x20] sm:$0x77] %v3573_v3  ;;  %4649 = vmatprep.subr.bf16.mxu1 %v4648_v56  ;;  %v4476_v43 = vpack.c.bf16 %v2132_v61, %v2100_v16  ;;  %v2131_v56 = vld [vmem:[%s9458_s6 + $0x1790] sm:$0xff]  ;;  %v4668_v26 = vpack.c.bf16 %v2138_v50, %v2106_v1  ;;  %v2164_v0 = vld [vmem:[%s9458_s6 + $0x1898] sm:$0xff]  ;;  %v4670_v3 = vpack.c.bf16 %v2137_v9, %v2105_v12 }
 0x4ee   : > { %v2196_v7 = vld [vmem:[%s9458_s6 + $0x1998] sm:$0xff]  ;;  %v4478_v6 = vpack.c.bf16 %v2131_v56, %v2099_v10  ;;  %v1406_v16 = vld [vmem:[%s9458_s6 + $0xe8] sm:$0xff]  ;;  %v4686_v50 = vpack.c.bf16 %v2393_v27, %v2361_v18  ;;  %v1405_v56 = vld [vmem:[%s9458_s6 + $0xe0] sm:$0xff] }
 0x4ef   : > { %4459 = vmatpush1.bf16.msra.mxu0 %v4458_v62  ;;  %v4480_v62 = vpack.c.bf16 %v2196_v7, %v2164_v0  ;;  %v1438_v61 = vld [vmem:[%s9458_s6 + $0x1e8] sm:$0xff]  ;;  %v1437_v12 = vld [vmem:[%s9458_s6 + $0x1e0] sm:$0xff]  ;;  %v1496_v9 = vld [vmem:[%s9458_s6 + $0x3b8] sm:$0xff] }
 0x4f0   : > { %4651 = vmatpush1.bf16.msra.mxu1 %v4650_v8  ;;  %4461 = vmatprep.subr.bf16.mxu0 %v4460_v29  ;;  %v2163_v8 = vld [vmem:[%s9458_s6 + $0x1890] sm:$0xff]  ;;  %v4752_v10 = vpack.c.bf16 %v1438_v61, %v1406_v16  ;;  %v1470_v7 = vld [vmem:[%s9458_s6 + $0x2e8] sm:$0xff]  ;;  %v4754_v53 = vpack.c.bf16 %v1437_v12, %v1405_v56  ;;  %v1693_v18 = vld [vmem:[%s9458_s6 + $0x9e0] sm:$0xff] }
 0x4f1   : > { %4653 = vmatprep.subr.bf16.mxu1 %v4652_v38  ;;  %v2195_v29 = vld [vmem:[%s9458_s6 + $0x1990] sm:$0xff]  ;;  %v2228_v38 = vld [vmem:[%s9458_s6 + $0x1a98] sm:$0xff]  ;;  %v4756_v22 = vpack.c.bf16 %v1502_v52, %v1470_v7 }
 0x4f2   : > { %v4482_v57 = vpack.c.bf16 %v2195_v29, %v2163_v8  ;;  %v1501_v29 = vld [vmem:[%s9458_s6 + $0x3e0] sm:$0xff]  ;;  %v1752_v27 = vld [vmem:[%s9458_s6 + $0xbb8] sm:$0xff] }
 0x4f3   : > { %4463 = vmatpush1.bf16.msra.mxu0 %v4462_v35  ;;  %v4484_v35 = vpack.c.bf16 %v2260_v24, %v2228_v38  ;;  %v1534_v38 = vld [vmem:[%s9458_s6 + $0x4e8] sm:$0xff]  ;;  %v1784_v56 = vld [vmem:[%s9458_s6 + $0xcb8] sm:$0xff] }
 0x4f4   : > { %4655 = vmatpush1.bf16.msra.mxu1 %v4654_v2  ;;  %4465 = vmatprep.subr.bf16.mxu0 %v4464_v41  ;;  %v2227_v2 = vld [vmem:[%s9458_s6 + $0x1a90] sm:$0xff]  ;;  %v1566_v24 = vld [vmem:[%s9458_s6 + $0x5e8] sm:$0xff]  ;;  %v1816_v12 = vld [vmem:[%s9458_s6 + $0xdb8] sm:$0xff] }
 0x4f5   : > { %4657 = vmatprep.subr.bf16.mxu1 %v4656_v47  ;;  %v2259_v41 = vld [vmem:[%s9458_s6 + $0x1b90] sm:$0xff]  ;;  %v2292_v47 = vld [vmem:[%s9458_s6 + $0x1c98] sm:$0xff]  ;;  %v4584_v52 = vpack.c.bf16 %v1816_v12, %v1784_v56  ;;  %v2045_v12 = vld [vmem:[%s9458_s6 + $0x14e0] sm:$0xff] }
 0x4f6   : > { %v4486_v25 = vpack.c.bf16 %v2259_v41, %v2227_v2  ;;  %v1533_v2 = vld [vmem:[%s9458_s6 + $0x4e0] sm:$0xff]  ;;  %v4760_v41 = vpack.c.bf16 %v1566_v24, %v1534_v38  ;;  %v1854_v24 = vld [vmem:[%s9458_s6 + $0xee8] sm:$0xff]  ;;  %v2071_v56 = vld [vmem:[%s9458_s6 + $0x15b0] sm:$0xff] }
 0x4f7   : > { %4467 = vmatpush1.bf16.msra.mxu0 %v4466_v60  ;;  %v4488_v60 = vpack.c.bf16 %v2324_v36, %v2292_v47  ;;  %v1598_v47 = vld [vmem:[%s9458_s6 + $0x6e8] sm:$0xff]  ;;  %v4762_v32 = vpack.c.bf16 %v1565_v5, %v1533_v2  ;;  %v1847_v5 = vld [vmem:[%s9458_s6 + $0xeb0] sm:$0xff] }
 0x4f8   : > { %4659 = vmatpush1.bf16.msra.mxu1 %v4658_v14  ;;  %4469 = vmatprep.subr.bf16.mxu0 %v4468_v63  ;;  %v2291_v14 = vld [vmem:[%s9458_s6 + $0x1c90] sm:$0xff]  ;;  %v1630_v36 = vld [vmem:[%s9458_s6 + $0x7e8] sm:$0xff] }
 0x4f9   : > { %4661 = vmatprep.subr.bf16.mxu1 %v4660_v46  ;;  %v2323_v63 = vld [vmem:[%s9458_s6 + $0x1d90] sm:$0xff]  ;;  %v2356_v46 = vld [vmem:[%s9458_s6 + $0x1e98] sm:$0xff] }
 0x4fa   : > { %v4490_v13 = vpack.c.bf16 %v2323_v63, %v2291_v14  ;;  %v1597_v14 = vld [vmem:[%s9458_s6 + $0x6e0] sm:$0xff]  ;;  %v4764_v63 = vpack.c.bf16 %v1630_v36, %v1598_v47 }
 0x4fb   : > { %4471 = vmatpush1.bf16.msra.mxu0 %v4470_v11  ;;  %v4492_v11 = vpack.c.bf16 %v2388_v42, %v2356_v46  ;;  %v1662_v46 = vld [vmem:[%s9458_s6 + $0x8e8] sm:$0xff]  ;;  %v4766_v59 = vpack.c.bf16 %v1629_v54, %v1597_v14  ;;  %v1885_v36 = vld [vmem:[%s9458_s6 + $0xfe0] sm:$0xff]  ;;  %v1911_v54 = vld [vmem:[%s9458_s6 + $0x10b0] sm:$0xff] }
 0x4fc   : > { %4663 = vmatpush1.bf16.msra.mxu1 %v4662_v49  ;;  %4473 = vmatprep.subr.bf16.mxu0 %v4472_v17  ;;  %v2355_v49 = vld [vmem:[%s9458_s6 + $0x1e90] sm:$0xff]  ;;  %v1694_v42 = vld [vmem:[%s9458_s6 + $0x9e8] sm:$0xff] }
 0x4fd   : > { %4665 = vmatprep.subr.bf16.mxu1 %v4664_v40  ;;  %v2387_v17 = vld [vmem:[%s9458_s6 + $0x1f90] sm:$0xff]  ;;  %v1400_v40 = vld [vmem:[%s9458_s6 + $0xb8] sm:$0xff] }
 0x4fe   : > { %v4494_v1 = vpack.c.bf16 %v2387_v17, %v2355_v49  ;;  %v1661_v49 = vld [vmem:[%s9458_s6 + $0x8e0] sm:$0xff]  ;;  %v4768_v17 = vpack.c.bf16 %v1694_v42, %v1662_v46 }
 0x4ff   : > { %4475 = vmatpush1.bf16.msra.mxu0 %v4474_v37  ;;  %v4560_v37 = vpack.c.bf16 %v1432_v44, %v1400_v40  ;;  %v1726_v40 = vld [vmem:[%s9458_s6 + $0xae8] sm:$0xff]  ;;  %v4770_v61 = vpack.c.bf16 %v1693_v18, %v1661_v49  ;;  %v1949_v42 = vld [vmem:[%s9458_s6 + $0x11e0] sm:$0xff]  ;;  %v1975_v18 = vld [vmem:[%s9458_s6 + $0x12b0] sm:$0xff] }
 0x500   : > { %4667 = vmatpush1.bf16.msra.mxu1 %v4666_v45  ;;  %4477 = vmatprep.subr.bf16.mxu0 %v4476_v43  ;;  %v1399_v45 = vld [vmem:[%s9458_s6 + $0xb0] sm:$0xff]  ;;  %v1758_v44 = vld [vmem:[%s9458_s6 + $0xbe8] sm:$0xff] }
 0x501   : > { %4669 = vmatprep.subr.bf16.mxu1 %v4668_v26  ;;  %v1431_v43 = vld [vmem:[%s9458_s6 + $0x1b0] sm:$0xff]  ;;  %v1464_v26 = vld [vmem:[%s9458_s6 + $0x2b8] sm:$0xff] }
 0x502   : > { %v4562_v0 = vpack.c.bf16 %v1431_v43, %v1399_v45  ;;  %v4564_v8 = vpack.c.bf16 %v1496_v9, %v1464_v26  ;;  %v1725_v45 = vld [vmem:[%s9458_s6 + $0xae0] sm:$0xff]  ;;  %v4772_v43 = vpack.c.bf16 %v1758_v44, %v1726_v40  ;;  %v1790_v26 = vld [vmem:[%s9458_s6 + $0xce8] sm:$0xff] }
 0x503   : > { %4479 = vmatpush1.bf16.msra.mxu0 %v4478_v6  ;;  %v1463_v6 = vld [vmem:[%s9458_s6 + $0x2b0] sm:$0xff]  ;;  %v1822_v9 = vld [vmem:[%s9458_s6 + $0xde8] sm:$0xff]  ;;  %v2013_v44 = vld [vmem:[%s9458_s6 + $0x13e0] sm:$0xff] }
 0x504   : > { %4671 = vmatpush1.bf16.msra.mxu1 %v4670_v3  ;;  %4481 = vmatprep.subr.bf16.mxu0 %v4480_v62  ;;  %v1495_v3 = vld [vmem:[%s9458_s6 + $0x3b0] sm:$0xff]  ;;  %v1469_v62 = vld [vmem:[%s9458_s6 + $0x2e0] sm:$0xff] }
 0x505   : > { %4673 = vmatprep.subr.bf16.mxu1 %v4672_v33  ;;  %v1560_v33 = vld [vmem:[%s9458_s6 + $0x5b8] sm:$0xff]  ;;  %v4566_v58 = vpack.c.bf16 %v1495_v3, %v1463_v6  ;;  %v4758_v31 = vpack.c.bf16 %v1501_v29, %v1469_v62  ;;  %v1815_v6 = vld [vmem:[%s9458_s6 + $0xdb0] sm:$0xff]  ;;  %v1789_v3 = vld [vmem:[%s9458_s6 + $0xce0] sm:$0xff] }
 0x506   : > { %v1821_v29 = vld [vmem:[%s9458_s6 + $0xde0] sm:$0xff] }
 0x507   : > { %4483 = vmatpush1.bf16.msra.mxu0 %v4482_v57  ;;  %v4568_v57 = vpack.c.bf16 %v1560_v33, %v1528_v21  ;;  %v1848_v21 = vld [vmem:[%s9458_s6 + $0xeb8] sm:$0xff]  ;;  %v4778_v2 = vpack.c.bf16 %v1821_v29, %v1789_v3  ;;  %v2135_v29 = vld [vmem:[%s9458_s6 + $0x17b0] sm:$0xff] }
 0x508   : > { %4675 = vmatpush1.bf16.msra.mxu1 %v4674_v20  ;;  %4485 = vmatprep.subr.bf16.mxu0 %v4484_v35  ;;  %v1527_v20 = vld [vmem:[%s9458_s6 + $0x4b0] sm:$0xff]  ;;  %v1880_v33 = vld [vmem:[%s9458_s6 + $0xfb8] sm:$0xff] }
 0x509   : > { %4677 = vmatprep.subr.bf16.mxu1 %v4676_v51  ;;  %v1559_v35 = vld [vmem:[%s9458_s6 + $0x5b0] sm:$0xff]  ;;  %v1592_v51 = vld [vmem:[%s9458_s6 + $0x6b8] sm:$0xff] }
 0x50a   : > { %v4570_v15 = vpack.c.bf16 %v1559_v35, %v1527_v20 }
 0x50b   : > { %4487 = vmatpush1.bf16.msra.mxu0 %v4486_v25  ;;  %v4572_v25 = vpack.c.bf16 %v1624_v55, %v1592_v51  ;;  %v1879_v51 = vld [vmem:[%s9458_s6 + $0xfb0] sm:$0xff]  ;;  %v1853_v55 = vld [vmem:[%s9458_s6 + $0xee0] sm:$0xff] }
 0x50c   : > { %4679 = vmatpush1.bf16.msra.mxu1 %v4678_v39  ;;  %4489 = vmatprep.subr.bf16.mxu0 %v4488_v60  ;;  %v1591_v39 = vld [vmem:[%s9458_s6 + $0x6b0] sm:$0xff]  ;;  %v4782_v14 = vpack.c.bf16 %v1885_v36, %v1853_v55  ;;  %v2205_v55 = vld [vmem:[%s9458_s6 + $0x19e0] sm:$0xff]  ;;  %v2264_v36 = vld [vmem:[%s9458_s6 + $0x1bb8] sm:$0xff] }
 0x50d   : > { %4681 = vmatprep.subr.bf16.mxu1 %v4680_v4  ;;  %v1623_v60 = vld [vmem:[%s9458_s6 + $0x7b0] sm:$0xff]  ;;  %v1656_v4 = vld [vmem:[%s9458_s6 + $0x8b8] sm:$0xff] }
 0x50e   : > { %v4574_v34 = vpack.c.bf16 %v1623_v60, %v1591_v39  ;;  %v1950_v39 = vld [vmem:[%s9458_s6 + $0x11e8] sm:$0xff]  ;;  %v4590_v60 = vpack.c.bf16 %v1879_v51, %v1847_v5  ;;  %v2173_v5 = vld [vmem:[%s9458_s6 + $0x18e0] sm:$0xff] }
 0x50f   : > { %4491 = vmatpush1.bf16.msra.mxu0 %v4490_v13  ;;  %v4576_v13 = vpack.c.bf16 %v1688_v48, %v1656_v4  ;;  %v1943_v4 = vld [vmem:[%s9458_s6 + $0x11b0] sm:$0xff]  ;;  %v1917_v48 = vld [vmem:[%s9458_s6 + $0x10e0] sm:$0xff] }
 0x510   : > { %4683 = vmatpush1.bf16.msra.mxu1 %v4682_v30  ;;  %4493 = vmatprep.subr.bf16.mxu0 %v4492_v11  ;;  %v1655_v30 = vld [vmem:[%s9458_s6 + $0x8b0] sm:$0xff]  ;;  %v4786_v49 = vpack.c.bf16 %v1949_v42, %v1917_v48  ;;  %v2269_v48 = vld [vmem:[%s9458_s6 + $0x1be0] sm:$0xff]  ;;  %v2328_v42 = vld [vmem:[%s9458_s6 + $0x1db8] sm:$0xff] }
 0x511   : > { %4685 = vmatprep.subr.bf16.mxu1 %v4684_v23  ;;  %v1687_v11 = vld [vmem:[%s9458_s6 + $0x9b0] sm:$0xff]  ;;  %v1720_v23 = vld [vmem:[%s9458_s6 + $0xab8] sm:$0xff] }
 0x512   : > { %v4578_v16 = vpack.c.bf16 %v1687_v11, %v1655_v30  ;;  %v2014_v30 = vld [vmem:[%s9458_s6 + $0x13e8] sm:$0xff]  ;;  %v4594_v11 = vpack.c.bf16 %v1943_v4, %v1911_v54  ;;  %v2237_v54 = vld [vmem:[%s9458_s6 + $0x1ae0] sm:$0xff] }
 0x513   : > { %4495 = vmatpush1.bf16.msra.mxu0 %v4494_v1  ;;  %v4580_v1 = vpack.c.bf16 %v1752_v27, %v1720_v23  ;;  %v2007_v23 = vld [vmem:[%s9458_s6 + $0x13b0] sm:$0xff]  ;;  %v1981_v27 = vld [vmem:[%s9458_s6 + $0x12e0] sm:$0xff] }
 0x514   : > { %4687 = vmatpush1.bf16.msra.mxu1 %v4686_v50  ;;  %4561 = vmatprep.subr.bf16.mxu0 %v4560_v37  ;;  %v1719_v50 = vld [vmem:[%s9458_s6 + $0xab0] sm:$0xff] }
 0x515   : > { %4753 = vmatprep.subr.bf16.mxu1 %v4752_v10  ;;  %v1751_v37 = vld [vmem:[%s9458_s6 + $0xbb0] sm:$0xff]  ;;  %v1757_v10 = vld [vmem:[%s9458_s6 + $0xbe0] sm:$0xff] }
 0x516   : > { %3105 = vmatmul.mubr.f32.vlgmr.msra.gmra.mrb[26].mxu0 %v6747_v19  ;;  %v4774_v7 = vpack.c.bf16 %v1757_v10, %v1725_v45  ;;  %v4790_v45 = vpack.c.bf16 %v2013_v44, %v1981_v27  ;;  %v2039_v10 = vld [vmem:[%s9458_s6 + $0x14b0] sm:$0xff]  ;;  %v2333_v27 = vld [vmem:[%s9458_s6 + $0x1de0] sm:$0xff]  ;;  %v2392_v44 = vld [vmem:[%s9458_s6 + $0x1fb8] sm:$0xff] }
 0x517   : > { %3318 = vmatmul.mubr.f32.vlgmr.msra.gmra.mrb[12].mxu1 %v6747_v19  ;;  %4563 = vmatpush1.bf16.msra.mxu0 %v4562_v0  ;;  %v4582_v0 = vpack.c.bf16 %v1751_v37, %v1719_v50  ;;  %v2078_v50 = vld [vmem:[%s9458_s6 + $0x15e8] sm:$0xff]  ;;  %v4598_v37 = vpack.c.bf16 %v2007_v23, %v1975_v18  ;;  %v2301_v18 = vld [vmem:[%s9458_s6 + $0x1ce0] sm:$0xff] }
 0x518   : > { %3246 = vmatprep.mubr.f32.mxu0 %v6739_v28  ;;  %4755 = vmatpush1.bf16.msra.mxu1 %v4754_v53  ;;  %v1783_v53 = vld [vmem:[%s9458_s6 + $0xcb0] sm:$0xff] }
 0x519   : > { %3459 = vmatprep.mubr.f32.mxu1 %v6739_v28  ;;  %4565 = vmatprep.subr.bf16.mxu0 %v4564_v8  ;;  %v4776_v8 = vpack.c.bf16 %v1822_v9, %v1790_v26  ;;  %v4586_v20 = vpack.c.bf16 %v1815_v6, %v1783_v53  ;;  %v2077_v9 = vld [vmem:[%s9458_s6 + $0x15e0] sm:$0xff]  ;;  %v2142_v53 = vld [vmem:[%s9458_s6 + $0x17e8] sm:$0xff]  ;;  %v4602_v6 = vpack.c.bf16 %v2071_v56, %v2039_v10 }
 0x51a   : > { %4757 = vmatprep.subr.bf16.mxu1 %v4756_v22  ;;  %v4794_v3 = vpack.c.bf16 %v2077_v9, %v2045_v12  ;;  %v2365_v10 = vld [vmem:[%s9458_s6 + $0x1ee0] sm:$0xff]  ;;  %v1436_v9 = vld [vmem:[%s9458_s6 + $0x1d8] sm:$0xff] }
 0x51b   : > { %4567 = vmatpush1.bf16.msra.mxu0 %v4566_v58  ;;  %v1886_v58 = vld [vmem:[%s9458_s6 + $0xfe8] sm:$0xff]  ;;  %v2397_v12 = vld [vmem:[%s9458_s6 + $0x1fe0] sm:$0xff] }
 0x51c   : > { %4759 = vmatpush1.bf16.msra.mxu1 %v4758_v31  ;;  %4569 = vmatprep.subr.bf16.mxu0 %v4568_v57  ;;  %v4780_v47 = vpack.c.bf16 %v1886_v58, %v1854_v24  ;;  %v2200_v24 = vld [vmem:[%s9458_s6 + $0x19b8] sm:$0xff]  ;;  %v2174_v58 = vld [vmem:[%s9458_s6 + $0x18e8] sm:$0xff] }
 0x51d   : > { %4761 = vmatprep.subr.bf16.mxu1 %v4760_v41  ;;  %v4588_v41 = vpack.c.bf16 %v1880_v33, %v1848_v21  ;;  %v2109_v21 = vld [vmem:[%s9458_s6 + $0x16e0] sm:$0xff] }
 0x51f   : > { %4571 = vmatpush1.bf16.msra.mxu0 %v4570_v15  ;;  %v1912_v15 = vld [vmem:[%s9458_s6 + $0x10b8] sm:$0xff] }
 0x520   : > { %4763 = vmatpush1.bf16.msra.mxu1 %v4762_v32  ;;  %4573 = vmatprep.subr.bf16.mxu0 %v4572_v25  ;;  %v1944_v32 = vld [vmem:[%s9458_s6 + $0x11b8] sm:$0xff]  ;;  %v1918_v25 = vld [vmem:[%s9458_s6 + $0x10e8] sm:$0xff] }
 0x521   : > { %4765 = vmatprep.subr.bf16.mxu1 %v4764_v63  ;;  %v4592_v63 = vpack.c.bf16 %v1944_v32, %v1912_v15  ;;  %v4784_v46 = vpack.c.bf16 %v1950_v39, %v1918_v25  ;;  %v2238_v15 = vld [vmem:[%s9458_s6 + $0x1ae8] sm:$0xff]  ;;  %v4802_v39 = vpack.c.bf16 %v2205_v55, %v2173_v5  ;;  %v1595_v5 = vld [vmem:[%s9458_s6 + $0x6d0] sm:$0xff]  ;;  %v1660_v55 = vld [vmem:[%s9458_s6 + $0x8d8] sm:$0xff] }
 0x522   : > { %v2270_v32 = vld [vmem:[%s9458_s6 + $0x1be8] sm:$0xff] }
 0x523   : > { %4575 = vmatpush1.bf16.msra.mxu0 %v4574_v34  ;;  %v1976_v34 = vld [vmem:[%s9458_s6 + $0x12b8] sm:$0xff]  ;;  %v4804_v4 = vpack.c.bf16 %v2270_v32, %v2238_v15  ;;  %v1659_v32 = vld [vmem:[%s9458_s6 + $0x8d0] sm:$0xff] }
 0x524   : > { %4767 = vmatpush1.bf16.msra.mxu1 %v4766_v59  ;;  %4577 = vmatprep.subr.bf16.mxu0 %v4576_v13  ;;  %v2008_v59 = vld [vmem:[%s9458_s6 + $0x13b8] sm:$0xff]  ;;  %v1982_v13 = vld [vmem:[%s9458_s6 + $0x12e8] sm:$0xff] }
 0x525   : > { %4769 = vmatprep.subr.bf16.mxu1 %v4768_v17  ;;  %v4596_v17 = vpack.c.bf16 %v2008_v59, %v1976_v34  ;;  %v4788_v40 = vpack.c.bf16 %v2014_v30, %v1982_v13  ;;  %v2302_v34 = vld [vmem:[%s9458_s6 + $0x1ce8] sm:$0xff]  ;;  %v4806_v30 = vpack.c.bf16 %v2269_v48, %v2237_v54  ;;  %v1723_v54 = vld [vmem:[%s9458_s6 + $0xad0] sm:$0xff]  ;;  %v1788_v48 = vld [vmem:[%s9458_s6 + $0xcd8] sm:$0xff] }
 0x526   : > { %v2334_v59 = vld [vmem:[%s9458_s6 + $0x1de8] sm:$0xff] }
 0x527   : > { %4579 = vmatpush1.bf16.msra.mxu0 %v4578_v16  ;;  %v2040_v16 = vld [vmem:[%s9458_s6 + $0x14b8] sm:$0xff]  ;;  %v4808_v23 = vpack.c.bf16 %v2334_v59, %v2302_v34  ;;  %v1787_v59 = vld [vmem:[%s9458_s6 + $0xcd0] sm:$0xff] }
 0x528   : > { %4771 = vmatpush1.bf16.msra.mxu1 %v4770_v61  ;;  %4581 = vmatprep.subr.bf16.mxu0 %v4580_v1  ;;  %v2072_v61 = vld [vmem:[%s9458_s6 + $0x15b8] sm:$0xff]  ;;  %v2046_v1 = vld [vmem:[%s9458_s6 + $0x14e8] sm:$0xff] }
 0x529   : > { %v2680_v62 = vpop.f32.mrb[20].mxu0  ;;  %4773 = vmatprep.subr.bf16.mxu1 %v4772_v43  ;;  %v4600_v43 = vpack.c.bf16 %v2072_v61, %v2040_v16  ;;  %v4792_v26 = vpack.c.bf16 %v2078_v50, %v2046_v1  ;;  %v2366_v16 = vld [vmem:[%s9458_s6 + $0x1ee8] sm:$0xff]  ;;  %v4810_v50 = vpack.c.bf16 %v2333_v27, %v2301_v18 }
 0x52a   : > { %v2893_v22 = vpop.f32.mrb[6].mxu1  ;;  %v2682_v38 = vpop.f32.mrb[21].mxu0  ;;  %v2398_v61 = vld [vmem:[%s9458_s6 + $0x1fe8] sm:$0xff] }
 0x52b   : > { %v3572_v31 = vcombine.low %v2680_v62, %v2682_v38  ;;  %v2895_v57 = vpop.f32.mrb[7].mxu1  ;;  %4583 = vmatpush1.bf16.msra.mxu0 %v4582_v0  ;;  %v2104_v0 = vld [vmem:[%s9458_s6 + $0x16b8] sm:$0xff]  ;;  %v4812_v56 = vpack.c.bf16 %v2398_v61, %v2366_v16  ;;  %v1851_v61 = vld [vmem:[%s9458_s6 + $0xed0] sm:$0xff] }
 0x52c   : > { %v3575_v35 = vcombine.low %v2893_v22, %v2895_v57  ;;  %4775 = vmatpush1.bf16.msra.mxu1 %v4774_v7  ;;  %4585 = vmatprep.subr.bf16.mxu0 %v4584_v52  ;;  %v2136_v7 = vld [vmem:[%s9458_s6 + $0x17b8] sm:$0xff]  ;;  %v2110_v52 = vld [vmem:[%s9458_s6 + $0x16e8] sm:$0xff]  ;;  %v2141_v22 = vld [vmem:[%s9458_s6 + $0x17e0] sm:$0xff] }
 0x52d   : > { %3604 = vst [vmem:[%s8055_s15 + $0x18] sm:$0x77] %v3572_v31  ;;  %4777 = vmatprep.subr.bf16.mxu1 %v4776_v8  ;;  %v4604_v62 = vpack.c.bf16 %v2136_v7, %v2104_v0  ;;  %v2103_v8 = vld [vmem:[%s9458_s6 + $0x16b0] sm:$0xff]  ;;  %v4796_v33 = vpack.c.bf16 %v2142_v53, %v2110_v52  ;;  %v2168_v38 = vld [vmem:[%s9458_s6 + $0x18b8] sm:$0xff]  ;;  %v2206_v31 = vld [vmem:[%s9458_s6 + $0x19e8] sm:$0xff]  ;;  %v4814_v7 = vpack.c.bf16 %v2397_v12, %v2365_v10 }
 0x52e   : > { %3607 = vst [vmem:[%s8055_s15 + $0x30] sm:$0x77] %v3575_v35  ;;  %v4606_v57 = vpack.c.bf16 %v2135_v29, %v2103_v8  ;;  %v4608_v35 = vpack.c.bf16 %v2200_v24, %v2168_v38  ;;  %v4800_v51 = vpack.c.bf16 %v2206_v31, %v2174_v58  ;;  %v1403_v53 = vld [vmem:[%s9458_s6 + $0xd0] sm:$0xff]  ;;  %v1564_v38 = vld [vmem:[%s9458_s6 + $0x5d8] sm:$0xff] }
 0x52f   : > { %4587 = vmatpush1.bf16.msra.mxu0 %v4586_v20  ;;  %v4798_v20 = vpack.c.bf16 %v2141_v22, %v2109_v21  ;;  %v1467_v21 = vld [vmem:[%s9458_s6 + $0x2d0] sm:$0xff]  ;;  %v1532_v22 = vld [vmem:[%s9458_s6 + $0x4d8] sm:$0xff] }
 0x530   : > { %4779 = vmatpush1.bf16.msra.mxu1 %v4778_v2  ;;  %4589 = vmatprep.subr.bf16.mxu0 %v4588_v41  ;;  %v2167_v2 = vld [vmem:[%s9458_s6 + $0x18b0] sm:$0xff]  ;;  %v4696_v58 = vpack.c.bf16 %v1564_v38, %v1532_v22  ;;  %v1980_v12 = vld [vmem:[%s9458_s6 + $0x12d8] sm:$0xff] }
 0x531   : > { %4781 = vmatprep.subr.bf16.mxu1 %v4780_v47  ;;  %v2199_v41 = vld [vmem:[%s9458_s6 + $0x19b0] sm:$0xff]  ;;  %v2232_v47 = vld [vmem:[%s9458_s6 + $0x1ab8] sm:$0xff] }
 0x532   : > { %v4610_v25 = vpack.c.bf16 %v2199_v41, %v2167_v2  ;;  %v1531_v31 = vld [vmem:[%s9458_s6 + $0x4d0] sm:$0xff] }
 0x533   : > { %4591 = vmatpush1.bf16.msra.mxu0 %v4590_v60  ;;  %v4612_v60 = vpack.c.bf16 %v2264_v36, %v2232_v47  ;;  %v1692_v47 = vld [vmem:[%s9458_s6 + $0x9d8] sm:$0xff]  ;;  %v1915_v10 = vld [vmem:[%s9458_s6 + $0x10d0] sm:$0xff] }
 0x534   : > { %4783 = vmatpush1.bf16.msra.mxu1 %v4782_v14  ;;  %4593 = vmatprep.subr.bf16.mxu0 %v4592_v63  ;;  %v2231_v14 = vld [vmem:[%s9458_s6 + $0x1ab0] sm:$0xff]  ;;  %v4704_v15 = vpack.c.bf16 %v1692_v47, %v1660_v55 }
 0x535   : > { %4785 = vmatprep.subr.bf16.mxu1 %v4784_v46  ;;  %v2263_v63 = vld [vmem:[%s9458_s6 + $0x1bb0] sm:$0xff]  ;;  %v2296_v46 = vld [vmem:[%s9458_s6 + $0x1cb8] sm:$0xff] }
 0x536   : > { %v4614_v13 = vpack.c.bf16 %v2263_v63, %v2231_v14 }
 0x537   : > { %4595 = vmatpush1.bf16.msra.mxu0 %v4594_v11  ;;  %v4616_v11 = vpack.c.bf16 %v2328_v42, %v2296_v46  ;;  %v1820_v46 = vld [vmem:[%s9458_s6 + $0xdd8] sm:$0xff] }
 0x538   : > { %4787 = vmatpush1.bf16.msra.mxu1 %v4786_v49  ;;  %4597 = vmatprep.subr.bf16.mxu0 %v4596_v17  ;;  %v2295_v49 = vld [vmem:[%s9458_s6 + $0x1cb0] sm:$0xff]  ;;  %v4712_v34 = vpack.c.bf16 %v1820_v46, %v1788_v48 }
 0x539   : > { %4789 = vmatprep.subr.bf16.mxu1 %v4788_v40  ;;  %v2327_v17 = vld [vmem:[%s9458_s6 + $0x1db0] sm:$0xff]  ;;  %v2360_v40 = vld [vmem:[%s9458_s6 + $0x1eb8] sm:$0xff] }
 0x53a   : > { %v4618_v1 = vpack.c.bf16 %v2327_v17, %v2295_v49  ;;  %v1884_v49 = vld [vmem:[%s9458_s6 + $0xfd8] sm:$0xff] }
 0x53b   : > { %4599 = vmatpush1.bf16.msra.mxu0 %v4598_v37  ;;  %v4620_v37 = vpack.c.bf16 %v2392_v44, %v2360_v40 }
 0x53c   : > { %4791 = vmatpush1.bf16.msra.mxu1 %v4790_v45  ;;  %4601 = vmatprep.subr.bf16.mxu0 %v4600_v43  ;;  %v2359_v45 = vld [vmem:[%s9458_s6 + $0x1eb0] sm:$0xff] }
 0x53d   : > { %4793 = vmatprep.subr.bf16.mxu1 %v4792_v26  ;;  %v2391_v43 = vld [vmem:[%s9458_s6 + $0x1fb0] sm:$0xff]  ;;  %v1404_v26 = vld [vmem:[%s9458_s6 + $0xd8] sm:$0xff] }
 0x53e   : > { %v4622_v0 = vpack.c.bf16 %v2391_v43, %v2359_v45  ;;  %v4688_v52 = vpack.c.bf16 %v1436_v9, %v1404_v26  ;;  %v2012_v26 = vld [vmem:[%s9458_s6 + $0x13d8] sm:$0xff] }
 0x53f   : > { %4603 = vmatpush1.bf16.msra.mxu0 %v4602_v6  ;;  %v1435_v6 = vld [vmem:[%s9458_s6 + $0x1d0] sm:$0xff] }
 0x540   : > { %4795 = vmatpush1.bf16.msra.mxu1 %v4794_v3  ;;  %4605 = vmatprep.subr.bf16.mxu0 %v4604_v62  ;;  %v1468_v3 = vld [vmem:[%s9458_s6 + $0x2d8] sm:$0xff]  ;;  %v4690_v8 = vpack.c.bf16 %v1435_v6, %v1403_v53 }
 0x541   : > { %4797 = vmatprep.subr.bf16.mxu1 %v4796_v33  ;;  %v1500_v62 = vld [vmem:[%s9458_s6 + $0x3d8] sm:$0xff]  ;;  %v1499_v33 = vld [vmem:[%s9458_s6 + $0x3d0] sm:$0xff] }
 0x542   : > { %v4692_v29 = vpack.c.bf16 %v1500_v62, %v1468_v3  ;;  %v4694_v24 = vpack.c.bf16 %v1499_v33, %v1467_v21  ;;  %v2044_v53 = vld [vmem:[%s9458_s6 + $0x14d8] sm:$0xff] }
 0x543   : > { %4607 = vmatpush1.bf16.msra.mxu0 %v4606_v57  ;;  %v1563_v57 = vld [vmem:[%s9458_s6 + $0x5d0] sm:$0xff]  ;;  %v2076_v6 = vld [vmem:[%s9458_s6 + $0x15d8] sm:$0xff] }
 0x544   : > { %4799 = vmatpush1.bf16.msra.mxu1 %v4798_v20  ;;  %4609 = vmatprep.subr.bf16.mxu0 %v4608_v35  ;;  %v1596_v20 = vld [vmem:[%s9458_s6 + $0x6d8] sm:$0xff]  ;;  %v4698_v2 = vpack.c.bf16 %v1563_v57, %v1531_v31  ;;  %v4728_v62 = vpack.c.bf16 %v2076_v6, %v2044_v53  ;;  %v1663_v6 = vld [vmem:[%s9458_s6 + $0x8f0] sm:$0xff] }
 0x545   : > { %4801 = vmatprep.subr.bf16.mxu1 %v4800_v51  ;;  %v1628_v35 = vld [vmem:[%s9458_s6 + $0x7d8] sm:$0xff]  ;;  %v1627_v51 = vld [vmem:[%s9458_s6 + $0x7d0] sm:$0xff] }
 0x546   : > { %v4700_v41 = vpack.c.bf16 %v1628_v35, %v1596_v20  ;;  %v4702_v36 = vpack.c.bf16 %v1627_v51, %v1595_v5  ;;  %v2108_v21 = vld [vmem:[%s9458_s6 + $0x16d8] sm:$0xff] }
 0x547   : > { %4611 = vmatpush1.bf16.msra.mxu0 %v4610_v25  ;;  %v1691_v25 = vld [vmem:[%s9458_s6 + $0x9d0] sm:$0xff]  ;;  %v2140_v33 = vld [vmem:[%s9458_s6 + $0x17d8] sm:$0xff] }
 0x548   : > { %4803 = vmatpush1.bf16.msra.mxu1 %v4802_v39  ;;  %4613 = vmatprep.subr.bf16.mxu0 %v4612_v60  ;;  %v1724_v39 = vld [vmem:[%s9458_s6 + $0xad8] sm:$0xff]  ;;  %v4706_v14 = vpack.c.bf16 %v1691_v25, %v1659_v32  ;;  %v4732_v38 = vpack.c.bf16 %v2140_v33, %v2108_v21  ;;  %v1727_v33 = vld [vmem:[%s9458_s6 + $0xaf0] sm:$0xff] }
 0x549   : > { %4805 = vmatprep.subr.bf16.mxu1 %v4804_v4  ;;  %v1756_v60 = vld [vmem:[%s9458_s6 + $0xbd8] sm:$0xff]  ;;  %v1755_v4 = vld [vmem:[%s9458_s6 + $0xbd0] sm:$0xff] }
 0x54a   : > { %v4708_v63 = vpack.c.bf16 %v1756_v60, %v1724_v39  ;;  %v4710_v42 = vpack.c.bf16 %v1755_v4, %v1723_v54  ;;  %v2172_v31 = vld [vmem:[%s9458_s6 + $0x18d8] sm:$0xff] }
 0x54b   : > { %4615 = vmatpush1.bf16.msra.mxu0 %v4614_v13  ;;  %v1819_v13 = vld [vmem:[%s9458_s6 + $0xdd0] sm:$0xff]  ;;  %v2204_v57 = vld [vmem:[%s9458_s6 + $0x19d8] sm:$0xff] }
 0x54c   : > { %4807 = vmatpush1.bf16.msra.mxu1 %v4806_v30  ;;  %4617 = vmatprep.subr.bf16.mxu0 %v4616_v11  ;;  %v1852_v11 = vld [vmem:[%s9458_s6 + $0xed8] sm:$0xff]  ;;  %v4714_v40 = vpack.c.bf16 %v1819_v13, %v1787_v59  ;;  %v4736_v35 = vpack.c.bf16 %v2204_v57, %v2172_v31  ;;  %v1791_v57 = vld [vmem:[%s9458_s6 + $0xcf0] sm:$0xff] }
 0x54d   : > { %4809 = vmatprep.subr.bf16.mxu1 %v4808_v23  ;;  %v4716_v16 = vpack.c.bf16 %v1884_v49, %v1852_v11  ;;  %v2236_v5 = vld [vmem:[%s9458_s6 + $0x1ad8] sm:$0xff]  ;;  %v1407_v49 = vld [vmem:[%s9458_s6 + $0xf0] sm:$0xff] }
 0x54e   : > { %v2268_v51 = vld [vmem:[%s9458_s6 + $0x1bd8] sm:$0xff] }
 0x54f   : > { %4619 = vmatpush1.bf16.msra.mxu0 %v4618_v1  ;;  %v1883_v1 = vld [vmem:[%s9458_s6 + $0xfd0] sm:$0xff]  ;;  %v4740_v47 = vpack.c.bf16 %v2268_v51, %v2236_v5  ;;  %v2300_v32 = vld [vmem:[%s9458_s6 + $0x1cd8] sm:$0xff] }
 0x550   : > { %4811 = vmatpush1.bf16.msra.mxu1 %v4810_v50  ;;  %4621 = vmatprep.subr.bf16.mxu0 %v4620_v37  ;;  %v1916_v50 = vld [vmem:[%s9458_s6 + $0x10d8] sm:$0xff]  ;;  %v4718_v45 = vpack.c.bf16 %v1883_v1, %v1851_v61 }
 0x551   : > { %4813 = vmatprep.subr.bf16.mxu1 %v4812_v56  ;;  %v1948_v37 = vld [vmem:[%s9458_s6 + $0x11d8] sm:$0xff]  ;;  %v1947_v56 = vld [vmem:[%s9458_s6 + $0x11d0] sm:$0xff] }
 0x552   : > { %v4720_v43 = vpack.c.bf16 %v1948_v37, %v1916_v50  ;;  %v4722_v9 = vpack.c.bf16 %v1947_v56, %v1915_v10  ;;  %v2332_v25 = vld [vmem:[%s9458_s6 + $0x1dd8] sm:$0xff] }
 0x553   : > { %4623 = vmatpush1.bf16.msra.mxu0 %v4622_v0  ;;  %v4724_v0 = vpack.c.bf16 %v2012_v26, %v1980_v12  ;;  %v4744_v60 = vpack.c.bf16 %v2332_v25, %v2300_v32  ;;  %v2364_v54 = vld [vmem:[%s9458_s6 + $0x1ed8] sm:$0xff]  ;;  %v1599_v26 = vld [vmem:[%s9458_s6 + $0x6f0] sm:$0xff] }
 0x554   : > { %4815 = vmatpush1.bf16.msra.mxu1 %v4814_v7  ;;  %4689 = vmatprep.subr.bf16.mxu0 %v4688_v52  ;;  %v1979_v7 = vld [vmem:[%s9458_s6 + $0x12d0] sm:$0xff]  ;;  %v2396_v4 = vld [vmem:[%s9458_s6 + $0x1fd8] sm:$0xff] }
 0x555   : > { %v2011_v52 = vld [vmem:[%s9458_s6 + $0x13d0] sm:$0xff]  ;;  %v4748_v46 = vpack.c.bf16 %v2396_v4, %v2364_v54  ;;  %v1408_v59 = vld [vmem:[%s9458_s6 + $0xf8] sm:$0xff] }
 0x556   : > { %3247 = vmatmul.mubr.f32.vlgmr.msra.gmra.mrb[28].mxu0 %v6747_v19  ;;  %v4726_v3 = vpack.c.bf16 %v2011_v52, %v1979_v7  ;;  %v1440_v13 = vld [vmem:[%s9458_s6 + $0x1f8] sm:$0xff]  ;;  %v1855_v25 = vld [vmem:[%s9458_s6 + $0xef0] sm:$0xff] }
 0x557   : > { %3460 = vmatmul.mubr.f32.vlgmr.msra.gmra.mrb[14].mxu1 %v6747_v19  ;;  %4691 = vmatpush1.bf16.msra.mxu0 %v4690_v8  ;;  %v2043_v8 = vld [vmem:[%s9458_s6 + $0x14d0] sm:$0xff]  ;;  %v4816_v11 = vpack.c.bf16 %v1440_v13, %v1408_v59  ;;  %v1536_v61 = vld [vmem:[%s9458_s6 + $0x4f8] sm:$0xff] }
 0x558   : > { %3388 = vmatprep.mubr.f32.mxu0 %v6739_v28  ;;  %4693 = vmatprep.subr.bf16.mxu0 %v4692_v29  ;;  %v2075_v29 = vld [vmem:[%s9458_s6 + $0x15d0] sm:$0xff]  ;;  %v1568_v1 = vld [vmem:[%s9458_s6 + $0x5f8] sm:$0xff] }
 0x559   : > { %v4730_v22 = vpack.c.bf16 %v2075_v29, %v2043_v8  ;;  %v4824_v37 = vpack.c.bf16 %v1568_v1, %v1536_v61  ;;  %v1600_v10 = vld [vmem:[%s9458_s6 + $0x6f8] sm:$0xff]  ;;  %v1919_v4 = vld [vmem:[%s9458_s6 + $0x10f0] sm:$0xff] }
 0x55a   : > { %v1632_v56 = vld [vmem:[%s9458_s6 + $0x7f8] sm:$0xff]  ;;  %v1983_v13 = vld [vmem:[%s9458_s6 + $0x12f0] sm:$0xff] }
 0x55b   : > { %4695 = vmatpush1.bf16.msra.mxu0 %v4694_v24  ;;  %v2107_v24 = vld [vmem:[%s9458_s6 + $0x16d0] sm:$0xff]  ;;  %v4828_v12 = vpack.c.bf16 %v1632_v56, %v1600_v10  ;;  %v1696_v7 = vld [vmem:[%s9458_s6 + $0x9f8] sm:$0xff] }
 0x55c   : > { %4697 = vmatprep.subr.bf16.mxu0 %v4696_v58  ;;  %v2139_v58 = vld [vmem:[%s9458_s6 + $0x17d0] sm:$0xff]  ;;  %v1760_v8 = vld [vmem:[%s9458_s6 + $0xbf8] sm:$0xff] }
 0x55d   : > { %v4734_v20 = vpack.c.bf16 %v2139_v58, %v2107_v24  ;;  %v1824_v24 = vld [vmem:[%s9458_s6 + $0xdf8] sm:$0xff]  ;;  %v2111_v1 = vld [vmem:[%s9458_s6 + $0x16f0] sm:$0xff] }
 0x55e   : > { %v2175_v56 = vld [vmem:[%s9458_s6 + $0x18f0] sm:$0xff] }
 0x55f   : > { %4699 = vmatpush1.bf16.msra.mxu0 %v4698_v2  ;;  %v2171_v2 = vld [vmem:[%s9458_s6 + $0x18d0] sm:$0xff] }
 0x560   : > { %4701 = vmatprep.subr.bf16.mxu0 %v4700_v41  ;;  %v2203_v41 = vld [vmem:[%s9458_s6 + $0x19d0] sm:$0xff] }
 0x561   : > { %v4738_v55 = vpack.c.bf16 %v2203_v41, %v2171_v2  ;;  %v1856_v2 = vld [vmem:[%s9458_s6 + $0xef8] sm:$0xff] }
 0x562   : > { %v1888_v41 = vld [vmem:[%s9458_s6 + $0xff8] sm:$0xff] }
 0x563   : > { %4703 = vmatpush1.bf16.msra.mxu0 %v4702_v36  ;;  %v2235_v36 = vld [vmem:[%s9458_s6 + $0x1ad0] sm:$0xff]  ;;  %v4844_v32 = vpack.c.bf16 %v1888_v41, %v1856_v2 }
 0x564   : > { %4705 = vmatprep.subr.bf16.mxu0 %v4704_v15  ;;  %v2267_v15 = vld [vmem:[%s9458_s6 + $0x1bd0] sm:$0xff] }
 0x565   : > { %v4742_v39 = vpack.c.bf16 %v2267_v15, %v2235_v36 }
 0x567   : > { %4707 = vmatpush1.bf16.msra.mxu0 %v4706_v14  ;;  %v2299_v14 = vld [vmem:[%s9458_s6 + $0x1cd0] sm:$0xff] }
 0x568   : > { %4709 = vmatprep.subr.bf16.mxu0 %v4708_v63  ;;  %v2331_v63 = vld [vmem:[%s9458_s6 + $0x1dd0] sm:$0xff] }
 0x569   : > { %v2822_v30 = vpop.f32.mrb[22].mxu0  ;;  %v4746_v48 = vpack.c.bf16 %v2331_v63, %v2299_v14  ;;  %v1952_v14 = vld [vmem:[%s9458_s6 + $0x11f8] sm:$0xff] }
 0x56a   : > { %v3035_v17 = vpop.f32.mrb[8].mxu1  ;;  %v2824_v18 = vpop.f32.mrb[23].mxu0 }
 0x56b   : > { %v3574_v23 = vcombine.low %v2822_v30, %v2824_v18  ;;  %v3037_v27 = vpop.f32.mrb[9].mxu1  ;;  %4711 = vmatpush1.bf16.msra.mxu0 %v4710_v42  ;;  %v2363_v42 = vld [vmem:[%s9458_s6 + $0x1ed0] sm:$0xff]  ;;  %v1472_v18 = vld [vmem:[%s9458_s6 + $0x2f8] sm:$0xff] }
 0x56c   : > { %v3577_v44 = vcombine.low %v3035_v17, %v3037_v27  ;;  %4713 = vmatprep.subr.bf16.mxu0 %v4712_v34  ;;  %v2395_v34 = vld [vmem:[%s9458_s6 + $0x1fd0] sm:$0xff] }
 0x56d   : > { %3606 = vst [vmem:[%s8055_s15 + $0x28] sm:$0x77] %v3574_v23  ;;  %v4750_v30 = vpack.c.bf16 %v2395_v34, %v2363_v42  ;;  %v1439_v17 = vld [vmem:[%s9458_s6 + $0x1f0] sm:$0xff]  ;;  %v1504_v23 = vld [vmem:[%s9458_s6 + $0x3f8] sm:$0xff] }
 0x56e   : > { %3609 = vst [vmem:[%s8055_s15 + $0x40] sm:$0x77] %v3577_v44  ;;  %v4818_v27 = vpack.c.bf16 %v1439_v17, %v1407_v49  ;;  %v1471_v44 = vld [vmem:[%s9458_s6 + $0x2f0] sm:$0xff]  ;;  %v2016_v42 = vld [vmem:[%s9458_s6 + $0x13f8] sm:$0xff] }
 0x56f   : > { %4715 = vmatpush1.bf16.msra.mxu0 %v4714_v40  ;;  %v4820_v40 = vpack.c.bf16 %v1504_v23, %v1472_v18  ;;  %v2080_v49 = vld [vmem:[%s9458_s6 + $0x15f8] sm:$0xff]  ;;  %v2047_v23 = vld [vmem:[%s9458_s6 + $0x14f0] sm:$0xff] }
 0x570   : > { %4717 = vmatprep.subr.bf16.mxu0 %v4716_v16  ;;  %v1503_v16 = vld [vmem:[%s9458_s6 + $0x3f0] sm:$0xff] }
 0x571   : > { %v4822_v50 = vpack.c.bf16 %v1503_v16, %v1471_v44  ;;  %v2144_v44 = vld [vmem:[%s9458_s6 + $0x17f8] sm:$0xff] }
 0x573   : > { %4719 = vmatpush1.bf16.msra.mxu0 %v4718_v45  ;;  %v1535_v45 = vld [vmem:[%s9458_s6 + $0x4f0] sm:$0xff] }
 0x574   : > { %4721 = vmatprep.subr.bf16.mxu0 %v4720_v43  ;;  %v1567_v43 = vld [vmem:[%s9458_s6 + $0x5f0] sm:$0xff] }
 0x577   : > { %4723 = vmatpush1.bf16.msra.mxu0 %v4722_v9  ;;  %v1631_v9 = vld [vmem:[%s9458_s6 + $0x7f0] sm:$0xff] }
 0x578   : > { %4725 = vmatprep.subr.bf16.mxu0 %v4724_v0  ;;  %v1664_v0 = vld [vmem:[%s9458_s6 + $0x8f8] sm:$0xff]  ;;  %v4830_v52 = vpack.c.bf16 %v1631_v9, %v1599_v26 }
 0x579   : > { %v4832_v53 = vpack.c.bf16 %v1696_v7, %v1664_v0  ;;  %v2272_v26 = vld [vmem:[%s9458_s6 + $0x1bf8] sm:$0xff]  ;;  %v2239_v7 = vld [vmem:[%s9458_s6 + $0x1af0] sm:$0xff] }
 0x57b   : > { %4727 = vmatpush1.bf16.msra.mxu0 %v4726_v3  ;;  %v1695_v3 = vld [vmem:[%s9458_s6 + $0x9f0] sm:$0xff] }
 0x57c   : > { %4729 = vmatprep.subr.bf16.mxu0 %v4728_v62  ;;  %v1728_v62 = vld [vmem:[%s9458_s6 + $0xaf8] sm:$0xff]  ;;  %v4834_v29 = vpack.c.bf16 %v1695_v3, %v1663_v6 }
 0x57d   : > { %v4836_v21 = vpack.c.bf16 %v1760_v8, %v1728_v62  ;;  %v2336_v6 = vld [vmem:[%s9458_s6 + $0x1df8] sm:$0xff]  ;;  %v2303_v8 = vld [vmem:[%s9458_s6 + $0x1cf0] sm:$0xff] }
 0x57f   : > { %4731 = vmatpush1.bf16.msra.mxu0 %v4730_v22  ;;  %v1759_v22 = vld [vmem:[%s9458_s6 + $0xbf0] sm:$0xff] }
 0x580   : > { %4733 = vmatprep.subr.bf16.mxu0 %v4732_v38  ;;  %v1792_v38 = vld [vmem:[%s9458_s6 + $0xcf8] sm:$0xff]  ;;  %v4838_v58 = vpack.c.bf16 %v1759_v22, %v1727_v33 }
 0x581   : > { %v4840_v31 = vpack.c.bf16 %v1824_v24, %v1792_v38  ;;  %v2400_v33 = vld [vmem:[%s9458_s6 + $0x1ff8] sm:$0xff]  ;;  %v2367_v24 = vld [vmem:[%s9458_s6 + $0x1ef0] sm:$0xff] }
 0x583   : > { %4735 = vmatpush1.bf16.msra.mxu0 %v4734_v20  ;;  %v1823_v20 = vld [vmem:[%s9458_s6 + $0xdf0] sm:$0xff] }
 0x584   : > { %4737 = vmatprep.subr.bf16.mxu0 %v4736_v35  ;;  %v4842_v36 = vpack.c.bf16 %v1823_v20, %v1791_v57 }
 0x587   : > { %4739 = vmatpush1.bf16.msra.mxu0 %v4738_v55 }
 0x588   : > { %4741 = vmatprep.subr.bf16.mxu0 %v4740_v47 }
 0x58b   : > { %4743 = vmatpush1.bf16.msra.mxu0 %v4742_v39  ;;  %v1887_v39 = vld [vmem:[%s9458_s6 + $0xff0] sm:$0xff] }
 0x58c   : > { %4745 = vmatprep.subr.bf16.mxu0 %v4744_v60  ;;  %v1920_v60 = vld [vmem:[%s9458_s6 + $0x10f8] sm:$0xff]  ;;  %v4846_v63 = vpack.c.bf16 %v1887_v39, %v1855_v25 }
 0x58d   : > { %v4848_v54 = vpack.c.bf16 %v1952_v14, %v1920_v60 }
 0x58f   : > { %4747 = vmatpush1.bf16.msra.mxu0 %v4746_v48  ;;  %v1951_v48 = vld [vmem:[%s9458_s6 + $0x11f0] sm:$0xff] }
 0x590   : > { %4749 = vmatprep.subr.bf16.mxu0 %v4748_v46  ;;  %v1984_v46 = vld [vmem:[%s9458_s6 + $0x12f8] sm:$0xff]  ;;  %v4850_v34 = vpack.c.bf16 %v1951_v48, %v1919_v4 }
 0x591   : > { %v4852_v59 = vpack.c.bf16 %v2016_v42, %v1984_v46 }
 0x593   : > { %4751 = vmatpush1.bf16.msra.mxu0 %v4750_v30  ;;  %v2015_v30 = vld [vmem:[%s9458_s6 + $0x13f0] sm:$0xff] }
 0x594   : > { %4817 = vmatprep.subr.bf16.mxu0 %v4816_v11  ;;  %v2048_v11 = vld [vmem:[%s9458_s6 + $0x14f8] sm:$0xff]  ;;  %v4854_v17 = vpack.c.bf16 %v2015_v30, %v1983_v13 }
 0x595   : > { %v4856_v18 = vpack.c.bf16 %v2080_v49, %v2048_v11 }
 0x596   : > { %3389 = vmatmul.mubr.f32.vlgmr.msra.gmra.mrb[30].mxu0 %v6747_v19 }
 0x597   : > { %4819 = vmatpush1.bf16.msra.mxu0 %v4818_v27  ;;  %3530 = vmatprep.mubr.f32.mxu0 %v6739_v28  ;;  %v4826_v28 = vpack.c.bf16 %v1567_v43, %v1535_v45  ;;  %v2079_v27 = vld [vmem:[%s9458_s6 + $0x15f0] sm:$0xff]  ;;  %v2208_v45 = vld [vmem:[%s9458_s6 + $0x19f8] sm:$0xff] }
 0x598   : > { %4821 = vmatprep.subr.bf16.mxu0 %v4820_v40  ;;  %v2112_v40 = vld [vmem:[%s9458_s6 + $0x16f8] sm:$0xff]  ;;  %v4858_v16 = vpack.c.bf16 %v2079_v27, %v2047_v23 }
 0x599   : > { %v4860_v61 = vpack.c.bf16 %v2144_v44, %v2112_v40 }
 0x59b   : > { %4823 = vmatpush1.bf16.msra.mxu0 %v4822_v50  ;;  %v2143_v50 = vld [vmem:[%s9458_s6 + $0x17f0] sm:$0xff] }
 0x59c   : > { %4825 = vmatprep.subr.bf16.mxu0 %v4824_v37  ;;  %v2176_v37 = vld [vmem:[%s9458_s6 + $0x18f8] sm:$0xff]  ;;  %v4862_v43 = vpack.c.bf16 %v2143_v50, %v2111_v1 }
 0x59d   : > { %v4864_v10 = vpack.c.bf16 %v2208_v45, %v2176_v37 }
 0x59f   : > { %4827 = vmatpush1.bf16.msra.mxu0 %v4826_v28  ;;  %v2207_v28 = vld [vmem:[%s9458_s6 + $0x19f0] sm:$0xff] }
 0x5a0   : > { %4829 = vmatprep.subr.bf16.mxu0 %v4828_v12  ;;  %v2240_v12 = vld [vmem:[%s9458_s6 + $0x1af8] sm:$0xff]  ;;  %v4866_v9 = vpack.c.bf16 %v2207_v28, %v2175_v56 }
 0x5a1   : > { %v4868_v0 = vpack.c.bf16 %v2272_v26, %v2240_v12 }
 0x5a3   : > { %4831 = vmatpush1.bf16.msra.mxu0 %v4830_v52  ;;  %v2271_v52 = vld [vmem:[%s9458_s6 + $0x1bf0] sm:$0xff] }
 0x5a4   : > { %4833 = vmatprep.subr.bf16.mxu0 %v4832_v53  ;;  %v2304_v53 = vld [vmem:[%s9458_s6 + $0x1cf8] sm:$0xff]  ;;  %v4870_v3 = vpack.c.bf16 %v2271_v52, %v2239_v7 }
 0x5a5   : > { %v4872_v62 = vpack.c.bf16 %v2336_v6, %v2304_v53 }
 0x5a7   : > { %4835 = vmatpush1.bf16.msra.mxu0 %v4834_v29  ;;  %v2335_v29 = vld [vmem:[%s9458_s6 + $0x1df0] sm:$0xff] }
 0x5a8   : > { %4837 = vmatprep.subr.bf16.mxu0 %v4836_v21  ;;  %v2368_v21 = vld [vmem:[%s9458_s6 + $0x1ef8] sm:$0xff]  ;;  %v4874_v22 = vpack.c.bf16 %v2335_v29, %v2303_v8 }
 0x5a9   : > { %v2964_v35 = vpop.f32.mrb[24].mxu0  ;;  %v4876_v38 = vpack.c.bf16 %v2400_v33, %v2368_v21 }
 0x5aa   : > { %v3177_v5 = vpop.f32.mrb[10].mxu1  ;;  %v2966_v51 = vpop.f32.mrb[25].mxu0 }
 0x5ab   : > { %v3576_v55 = vcombine.low %v2964_v35, %v2966_v51  ;;  %v3179_v47 = vpop.f32.mrb[11].mxu1  ;;  %4839 = vmatpush1.bf16.msra.mxu0 %v4838_v58  ;;  %v2399_v58 = vld [vmem:[%s9458_s6 + $0x1ff0] sm:$0xff] }
 0x5ac   : > { %v3579_v15 = vcombine.low %v3177_v5, %v3179_v47  ;;  %4841 = vmatprep.subr.bf16.mxu0 %v4840_v31  ;;  %v4878_v31 = vpack.c.bf16 %v2399_v58, %v2367_v24 }
 0x5ad   : > { %3608 = vst [vmem:[%s8055_s15 + $0x38] sm:$0x77] %v3576_v55 }
 0x5ae   : > { %3611 = vst [vmem:[%s8055_s15 + $0x50] sm:$0x77] %v3579_v15 }
 0x5af   : > { %4843 = vmatpush1.bf16.msra.mxu0 %v4842_v36 }
 0x5b0   : > { %4845 = vmatprep.subr.bf16.mxu0 %v4844_v32 }
 0x5b3   : > { %4847 = vmatpush1.bf16.msra.mxu0 %v4846_v63 }
 0x5b4   : > { %4849 = vmatprep.subr.bf16.mxu0 %v4848_v54 }
 0x5b7   : > { %4851 = vmatpush1.bf16.msra.mxu0 %v4850_v34 }
 0x5b8   : > { %4853 = vmatprep.subr.bf16.mxu0 %v4852_v59 }
 0x5bb   : > { %4855 = vmatpush1.bf16.msra.mxu0 %v4854_v17 }
 0x5bc   : > { %4857 = vmatprep.subr.bf16.mxu0 %v4856_v18 }
 0x5bf   : > { %4859 = vmatpush1.bf16.msra.mxu0 %v4858_v16 }
 0x5c0   : > { %4861 = vmatprep.subr.bf16.mxu0 %v4860_v61 }
 0x5c3   : > { %4863 = vmatpush1.bf16.msra.mxu0 %v4862_v43 }
 0x5c4   : > { %4865 = vmatprep.subr.bf16.mxu0 %v4864_v10 }
 0x5c7   : > { %4867 = vmatpush1.bf16.msra.mxu0 %v4866_v9 }
 0x5c8   : > { %4869 = vmatprep.subr.bf16.mxu0 %v4868_v0 }
 0x5cb   : > { %4871 = vmatpush1.bf16.msra.mxu0 %v4870_v3 }
 0x5cc   : > { %4873 = vmatprep.subr.bf16.mxu0 %v4872_v62 }
 0x5cf   : > { %4875 = vmatpush1.bf16.msra.mxu0 %v4874_v22 }
 0x5d0   : > { %4877 = vmatprep.subr.bf16.mxu0 %v4876_v38 }
 0x5d3   : > { %4879 = vmatpush1.bf16.msra.mxu0 %v4878_v31 }
 0x5d6   : > { %3531 = vmatmul.mubr.f32.vlgmr.msra.gmra.mrb[32].mxu0 %v6747_v19 }
 0x5e9   : > { %v3106_v57 = vpop.f32.mrb[26].mxu0 }
 0x5ea   : > { %v3319_v20 = vpop.f32.mrb[12].mxu1  ;;  %v3108_v35 = vpop.f32.mrb[27].mxu0 }
 0x5eb   : > { %v3578_v2 = vcombine.low %v3106_v57, %v3108_v35  ;;  %v3321_v41 = vpop.f32.mrb[13].mxu1 }
 0x5ec   : > { %v3581_v5 = vcombine.low %v3319_v20, %v3321_v41 }
 0x5ed   : > { %3610 = vst [vmem:[%s8055_s15 + $0x48] sm:$0x77] %v3578_v2 }
 0x5ee   : > { %3613 = vst [vmem:[%s8055_s15 + $0x60] sm:$0x77] %v3581_v5 }
 0x629   : > { %v3248_v51 = vpop.f32.mrb[28].mxu0 }
 0x62a   : > { %v3461_v55 = vpop.f32.mrb[14].mxu1  ;;  %v3250_v47 = vpop.f32.mrb[29].mxu0 }
 0x62b   : > { %v3580_v36 = vcombine.low %v3248_v51, %v3250_v47  ;;  %v3463_v15 = vpop.f32.mrb[15].mxu1 }
 0x62c   : > { %v3583_v32 = vcombine.low %v3461_v55, %v3463_v15 }
 0x62d   : > { %3612 = vst [vmem:[%s8055_s15 + $0x58] sm:$0x77] %v3580_v36 }
 0x62e   : > { %3615 = vst [vmem:[%s8055_s15 + $0x70] sm:$0x77] %v3583_v32 }
 0x669   : > { %v3390_v19 = vpop.f32.mrb[30].mxu0 }
 0x66a   : > { %v3392_v25 = vpop.f32.mrb[31].mxu0 }
 0x66b   : > { %v3582_v39 = vcombine.low %v3390_v19, %v3392_v25 }
 0x66d   : > { %3614 = vst [vmem:[%s8055_s15 + $0x68] sm:$0x77] %v3582_v39 }
 0x6a9   : > { %v3532_v60 = vpop.f32.mrb[32].mxu0 }
 0x6aa   : > { %v3534_v14 = vpop.f32.mrb[33].mxu0 }
 0x6ab   : > { %v3584_v63 = vcombine.low %v3532_v60, %v3534_v14 }
 0x6ad   : > { %3616 = vst [vmem:[%s8055_s15 + $0x78] sm:$0x77] %v3584_v63 }
 0x6ae PF: > { %s17_s24 = sadd.s32 1, %s4916_s24  }
 0x6af   : > { %p14_p4 = scmp.ge.s32.totalorder %s17_s24, 4  }
 0x6b1   :  { %16 = sbr.rel (!%p14_p4) target bundleno = 1 (0x1), region = 78 }

</bundles_post_ra>
